<compile_context>
chip_gen: v7x
topology: tpu7x:2x2x1
jax: 0.10.0
libtpu: 0.0.40
codegen_flags: <defaults>
</compile_context>

<pallas_src>
import functools
import math

import jax
import jax.numpy as jnp
from jax.experimental import pallas as pl
from jax.experimental.pallas import tpu as pltpu

_BF16 = jnp.bfloat16
_F32 = jnp.float32


# ----------------------------------------------------------------------------
# BlockSpec helpers: grid = (batch,); batched tensors get a (1, C, T) block
# (last two dims equal the full array dims), weights/biases are shared.
# ----------------------------------------------------------------------------
def _spec_batched(shape):
    nd = len(shape)
    return pl.BlockSpec((1,) + tuple(shape[1:]), lambda b: (b,) + (0,) * (nd - 1))


def _spec_shared(shape):
    nd = len(shape)
    return pl.BlockSpec(tuple(shape), lambda b: (0,) * nd)


# Batch axis is fully independent -> "parallel" (lets v7x shard it across its
# 2 TensorCores; measured-neutral on v5e/v6e). Explicit VMEM limit; the demo
# working set is tiny, production tiles should be re-derived per generation.
_CPARAMS = pltpu.CompilerParams(
    dimension_semantics=("parallel",),
    vmem_limit_bytes=64 * 1024 * 1024,
)


# ----------------------------------------------------------------------------
# Kernels (each program works on one batch element: refs are (1, C, T) blocks)
# ----------------------------------------------------------------------------
def _matmul_bias_kernel(x_ref, w_ref, b_ref, o_ref):
    # out = W @ x + b  (bf16 operands, f32 accumulation). Used for the polyphase
    # ConvTranspose1d upsample.
    o_ref[0] = (jnp.dot(w_ref[...], x_ref[0], preferred_element_type=_F32)
                + b_ref[...])


def _flow_kernel(xc_ref, mel_ref, invw_ref, wstart_ref, bstart_ref,
                 wdil_ref, wcond_ref, bgate_ref,
                 wres_ref, bres_ref, wskip_ref, bskip_ref,
                 wt_ref, bt_ref, ws_ref, bs_ref,
                 xcout_ref, logs_ref, xpad_ref,
                 *, K, n_layers, H, T, S, PADL):
    # Fused flow: invertible 1x1 conv -> WN start conv -> n_layers dilated gated
    # layers (residual + skip held in VMEM) -> end conv -> affine coupling.
    y = jnp.dot(invw_ref[...], xc_ref[0], preferred_element_type=_F32)   # (C, T) f32
    yb = y.astype(_BF16)
    mel = mel_ref[0]                                                     # (mel_ch, T) bf16
    # w_start is zero-padded to full C columns, so no channel split is needed.
    res = jnp.dot(wstart_ref[...], yb, preferred_element_type=_F32) + bstart_ref[...]
    skip = jnp.zeros((S, T), _F32)
    xpad_ref[...] = jnp.zeros_like(xpad_ref)          # zero the halo columns once

    for l in range(n_layers):                         # unrolled; n_layers is small
        d = 1 << l
        pad = (K - 1) * d // 2
        xpad_ref[:, pl.ds(PADL, T)] = res.astype(_BF16)   # lane-aligned store
        # Fold the K dilated taps into one MXU contraction of depth K*R.
        taps = [xpad_ref[:, pl.ds(PADL - pad + k * d, T)] for k in range(K)]
        xcat = jnp.concatenate(taps, axis=0)                             # (K*R, T) bf16
        acc = (jnp.dot(wdil_ref[l], xcat, preferred_element_type=_F32)
               + jnp.dot(wcond_ref[l], mel, preferred_element_type=_F32)
               + bgate_ref[l])                                           # (2H, T) f32
        z = (jnp.tanh(acc[:H, :]) * jax.nn.sigmoid(acc[H:, :])).astype(_BF16)
        res = res + jnp.dot(wres_ref[l], z, preferred_element_type=_F32) + bres_ref[l]
        skip = skip + jnp.dot(wskip_ref[l], z, preferred_element_type=_F32) + bskip_ref[l]

    skipb = skip.astype(_BF16)
    # End-conv weights are zero-padded to full C rows: rows < n_half produce
    # t = 0, log_s = 0, so x_a passes through exactly and no sublane split /
    # jnp.concatenate of (x_a, x_b') is needed.
    t_full = jnp.dot(wt_ref[...], skipb, preferred_element_type=_F32) + bt_ref[...]
    s_full = jnp.dot(ws_ref[...], skipb, preferred_element_type=_F32) + bs_ref[...]
    xcout_ref[0] = jnp.exp(s_full) * y + t_full
    logs_ref[...] = jnp.sum(s_full).reshape(1, 1, 1)   # == sum(log_s)


# ----------------------------------------------------------------------------
# pallas_call wrappers
# ----------------------------------------------------------------------------
def matmul_bias_apply(x, w, b):
    B, _, Q = x.shape
    O = w.shape[0]
    return pl.pallas_call(
        _matmul_bias_kernel, grid=(B,),
        in_specs=[_spec_batched(x.shape), _spec_shared(w.shape), _spec_shared(b.shape)],
        out_specs=_spec_batched((B, O, Q)),
        out_shape=jax.ShapeDtypeStruct((B, O, Q), _F32),
        compiler_params=_CPARAMS,
    )(x, w, b)


def flow_apply(xc, mel_bf, invw, wstart, bstart, wdil, wcond, bgate,
               wres, bres, wskip, bskip, wt, bt, ws, bs,
               *, K, n_layers, H, max_dilation):
    B, C, T = xc.shape
    R = wstart.shape[0]
    S = wskip.shape[1]
    padmax = (K - 1) * max_dilation // 2
    PADL = ((padmax + 127) // 128) * 128 if padmax else 0   # lane-aligned halo offset
    kern = functools.partial(_flow_kernel, K=K, n_layers=n_layers, H=H,
                             T=T, S=S, PADL=PADL)
    args = (xc, mel_bf, invw, wstart, bstart, wdil, wcond, bgate,
            wres, bres, wskip, bskip, wt, bt, ws, bs)
    in_specs = ([_spec_batched(xc.shape), _spec_batched(mel_bf.shape)]
                + [_spec_shared(a.shape) for a in args[2:]])
    return pl.pallas_call(
        kern, grid=(B,),
        in_specs=in_specs,
        out_specs=(_spec_batched((B, C, T)),
                   pl.BlockSpec((1, 1, 1), lambda b: (b, 0, 0))),
        out_shape=(jax.ShapeDtypeStruct((B, C, T), _F32),
                   jax.ShapeDtypeStruct((B, 1, 1), _F32)),
        scratch_shapes=[pltpu.VMEM((R, T + 2 * PADL), _BF16)],
        compiler_params=_CPARAMS,
    )(*args)


# ----------------------------------------------------------------------------
# Deterministic parameter initialization (shapes follow the module __init__;
# per-layer WN weights are stored stacked along an (n_layers, ...) axis)
# ----------------------------------------------------------------------------
def init_params(key, cfg):
    wn = cfg['wn_config']
    R, S, H = wn['residual_channels'], wn['skip_channels'], wn['hidden_channels']
    K = wn['kernel_size']
    n_layers = int(math.log2(wn['max_dilation'])) + 1
    mel_ch = cfg['n_mels'] * cfg['n_groups']

    keys = iter(jax.random.split(key, 4 + 8 * cfg['n_flows']))

    def nrm(shape, scale=0.05):
        return scale * jax.random.normal(next(keys), shape, _F32)

    params = {
        'up_v': nrm((cfg['n_mels'], cfg['n_mels'], cfg['win_length']), 0.2),
        'up_g': jnp.ones((cfg['n_mels'],), _F32),
        'up_b': jnp.zeros((cfg['n_mels'], 1), _F32),
        'flows': [],
    }

    n_channels = cfg['n_groups']
    for i in range(cfg['n_flows']):
        if i % cfg['n_early_every'] == 0 and i:
            n_channels -= cfg['n_early_size']
        n_half = n_channels // 2
        # orthogonal weight with positive determinant for the invertible 1x1 conv
        a = jax.random.normal(next(keys), (n_channels, n_channels), _F32)
        q, _ = jnp.linalg.qr(a)
        sign, _ = jnp.linalg.slogdet(q)
        q = q.at[:, 0].set(q[:, 0] * sign)

        flow = {
            'inv_w': q,
            'w_start': nrm((R, n_half)), 'b_start': jnp.zeros((R, 1), _F32),
            'w_dil': nrm((n_layers, K, 2 * H, R)),
            'b_dil': jnp.zeros((n_layers, 2 * H, 1), _F32),
            'w_cond': nrm((n_layers, 2 * H, mel_ch)),
            'b_cond': jnp.zeros((n_layers, 2 * H, 1), _F32),
            'w_res': nrm((n_layers, R, H)),
            'b_res': jnp.zeros((n_layers, R, 1), _F32),
            'w_skip': nrm((n_layers, S, H)),
            'b_skip': jnp.zeros((n_layers, S, 1), _F32),
            'w_end': nrm((2 * n_half, S), 0.02),
            'b_end': jnp.zeros((2 * n_half, 1), _F32),
        }
        params['flows'].append(flow)
    return params


# ----------------------------------------------------------------------------
# WaveGlow.forward
# ----------------------------------------------------------------------------
def waveglow_forward(params, x, mels, cfg):
    wn = cfg['wn_config']
    R, S, H = wn['residual_channels'], wn['skip_channels'], wn['hidden_channels']
    K = wn['kernel_size']
    n_layers = int(math.log2(wn['max_dilation'])) + 1
    g = cfg['n_groups']
    sigma = cfg['sigma']
    n_mels = cfg['n_mels']

    x = x.astype(_F32)
    mels = mels.astype(_F32)
    B, T_audio = x.shape
    Tm = mels.shape[-1]

    # ---- upsample: weight-normalised ConvTranspose1d as a polyphase matmul ----
    v, gnorm, ub = params['up_v'], params['up_g'], params['up_b']
    norm = jnp.sqrt(jnp.sum(v * v, axis=(1, 2), keepdims=True))
    w = gnorm[:, None, None] * v / norm                               # (Cin, Cout, Kw)
    Kw, s = cfg['win_length'], cfg['hop_length']
    M = -(-Kw // s)                                                   # taps per phase
    # phase-major weight: W_all[r*Cout+co, m*Cin+ci] = w[ci, co, m*s + r]
    w_p = jnp.pad(w, ((0, 0), (0, 0), (0, M * s - Kw)))
    w_all = (w_p.reshape(n_mels, n_mels, M, s)
             .transpose(3, 1, 2, 0).reshape(s * n_mels, M * n_mels))
    b_all = jnp.tile(ub, (s, 1))                                      # (s*Cout, 1)
    # shifted input stack: x_stack[b, m*Cin+ci, q] = mels[b, ci, q-m] (0 outside)
    Q = Tm + M - 1
    xp = jnp.pad(mels, ((0, 0), (0, 0), (M - 1, M - 1)))
    x_stack = jnp.concatenate(
        [xp[:, :, M - 1 - m: M - 1 - m + Q] for m in range(M)], axis=1)
    up = matmul_bias_apply(x_stack.astype(_BF16), w_all.astype(_BF16), b_all)
    up = up.reshape(B, s, n_mels, Q).transpose(0, 2, 3, 1).reshape(B, n_mels, Q * s)
    mels_up = up[:, :, :(Tm - 1) * s + Kw]                            # true ConvT length
    if mels_up.shape[-1] > T_audio:
        mels_up = mels_up[:, :, :T_audio]

    # ---- unfold / regroup (pure reshapes; glue) ----
    nF = T_audio // g
    nFm = mels_up.shape[-1] // g
    if nFm != nF:
        raise ValueError(
            f"mel frames ({nFm}) != audio frames ({nF}): the upsampled mel is too "
            f"short for the audio length (same failure mode as the PyTorch module).")
    x_g = x[:, :nF * g].reshape(B, nF, g).transpose(0, 2, 1)           # (B, g, nF)
    mels_g = mels_up[:, :, :nF * g].reshape(B, n_mels, nF, g)
    mels_g = mels_g.transpose(0, 2, 1, 3).reshape(B, nF, n_mels * g)
    mels_g = mels_g.transpose(0, 2, 1)                                 # (B, n_mels*g, nF)
    mels_g_bf = mels_g.astype(_BF16)                                   # reused by all flows

    ldj = jnp.zeros((1,), _F32)
    output = []
    xc = x_g
    for i in range(cfg['n_flows']):
        if i % cfg['n_early_every'] == 0 and i:
            output.append(xc[:, :cfg['n_early_size'], :])
            xc = xc[:, cfg['n_early_size']:, :]
        fp = params['flows'][i]
        C = xc.shape[1]
        n_half = C // 2

        # invertible 1x1 conv log-determinant (det(W) > 0 by construction)
        _, logabsdet = jnp.linalg.slogdet(fp['inv_w'])
        logdet_w = B * nF * logabsdet

        # weight prep for the fused kernel (tiny ops on small weight tensors):
        #   * start conv padded to full C columns (ignores x_b),
        #   * dilated taps flattened to (2H, K*R),
        #   * end conv split into t / log_s halves, zero-padded to full C rows.
        wstart = jnp.concatenate(
            [fp['w_start'], jnp.zeros((R, C - n_half), _F32)], axis=1).astype(_BF16)
        wdil = (fp['w_dil'].transpose(0, 2, 1, 3)
                .reshape(n_layers, 2 * H, K * R).astype(_BF16))
        wcond = fp['w_cond'].astype(_BF16)
        bgate = fp['b_dil'] + fp['b_cond']
        wres, bres = fp['w_res'].astype(_BF16), fp['b_res']
        wskip, bskip = fp['w_skip'].astype(_BF16), fp['b_skip']
        zr = jnp.zeros((n_half, S), _F32)
        zb = jnp.zeros((n_half, 1), _F32)
        wt = jnp.concatenate([zr, fp['w_end'][:n_half]], axis=0).astype(_BF16)
        ws = jnp.concatenate([zr, fp['w_end'][n_half:]], axis=0).astype(_BF16)
        bt = jnp.concatenate([zb, fp['b_end'][:n_half]], axis=0)
        bs = jnp.concatenate([zb, fp['b_end'][n_half:]], axis=0)

        xc, logs = flow_apply(
            xc, mels_g_bf, fp['inv_w'], wstart, fp['b_start'],
            wdil, wcond, bgate, wres, bres, wskip, bskip, wt, bt, ws, bs,
            K=K, n_layers=n_layers, H=H, max_dilation=wn['max_dilation'])
        ldj = ldj + logdet_w + jnp.sum(logs)

    z = jnp.concatenate(output, axis=1)
    loss = jnp.sum(z * z) / (2.0 * sigma * sigma) - ldj
    return loss


# ----------------------------------------------------------------------------
if __name__ == "__main__":
    cfg = dict(
        n_mels=8, n_flows=4, n_groups=8, n_early_every=2, n_early_size=2,
        win_length=8, hop_length=4, sigma=1.0,
        wn_config=dict(residual_channels=16, skip_channels=16,
                       hidden_channels=16, kernel_size=3, max_dilation=4),
    )
    key = jax.random.PRNGKey(0)
    kp, kx, km = jax.random.split(key, 3)
    params = init_params(kp, cfg)

    # 1024 audio samples grouped by 8 -> 128 frames: lane-dense time axis.
    B, T_audio, T_mel = 2, 1024, 256
    x = jax.random.normal(kx, (B, T_audio), jnp.float32)
    mels = jax.random.normal(km, (B, cfg['n_mels'], T_mel), jnp.float32)

    fwd = jax.jit(lambda p, a, m: waveglow_forward(p, a, m, cfg))
    loss = fwd(params, x, mels)
    jax.block_until_ready(loss)
    assert loss.shape == (1,)
    assert bool(jnp.all(jnp.isfinite(loss)))
    print("KERNEL_OK")
</pallas_src>

<mosaic_0001>
module attributes {stable_mosaic.version = 11 : i64} {
  func.func @_matmul_bias_kernel(%arg0: i32, %arg1: memref<1x16x257xbf16, #tpu.memory_space<vmem>>, %arg2: memref<32x16xbf16, #tpu.memory_space<vmem>>, %arg3: memref<32x1xf32, #tpu.memory_space<vmem>>, %arg4: memref<1x32x257xf32, #tpu.memory_space<vmem>>) attributes {dimension_semantics = [#tpu.dimension_semantics<parallel>], iteration_bounds = array<i64: 2>, scalar_prefetch = 0 : i64, scratch_operands = 0 : i64, tpu.core_type = #tpu.core_type<tc>, window_params = [{transform_indices = @transform_0, window_bounds = array<i64: 1, 16, 257>}, {pipeline_mode = #tpu.pipeline_mode<synchronous>, transform_indices = @transform_1, window_bounds = array<i64: 32, 16>}, {pipeline_mode = #tpu.pipeline_mode<synchronous>, transform_indices = @transform_2, window_bounds = array<i64: 32, 1>}, {transform_indices = @transform_3, window_bounds = array<i64: 1, 32, 257>}]} {
    %c0 = arith.constant 0 : index
    %c0_0 = arith.constant 0 : index
    %0 = vector.load %arg2[%c0, %c0_0] : memref<32x16xbf16, #tpu.memory_space<vmem>>, vector<32x16xbf16>
    %c0_1 = arith.constant 0 : index
    %c0_2 = arith.constant 0 : index
    %c0_3 = arith.constant 0 : index
    %1 = vector.load %arg1[%c0_1, %c0_2, %c0_3] : memref<1x16x257xbf16, #tpu.memory_space<vmem>>, vector<1x16x257xbf16>
    %2 = vector.shape_cast %1 : vector<1x16x257xbf16> to vector<16x257xbf16>
    %cst = arith.constant dense<0.000000e+00> : vector<32x257xf32>
    %3 = tpu.matmul %0, %2, %cst {dimension_numbers = #tpu.dot_dimension_numbers<[1], [0], [0], [1], [0, 0, 1, 1], [], []>} : vector<32x16xbf16>, vector<16x257xbf16>, vector<32x257xf32> -> vector<32x257xf32>
    %c0_4 = arith.constant 0 : index
    %c0_5 = arith.constant 0 : index
    %4 = vector.load %arg3[%c0_4, %c0_5] : memref<32x1xf32, #tpu.memory_space<vmem>>, vector<32x1xf32>
    %5 = vector.broadcast %4 : vector<32x1xf32> to vector<32x257xf32>
    %6 = arith.addf %3, %5 : vector<32x257xf32>
    %c0_6 = arith.constant 0 : index
    %c0_7 = arith.constant 0 : index
    %c0_8 = arith.constant 0 : index
    %7 = vector.load %arg4[%c0_6, %c0_7, %c0_8] : memref<1x32x257xf32, #tpu.memory_space<vmem>>, vector<1x32x257xf32>
    %8 = vector.shape_cast %7 : vector<1x32x257xf32> to vector<32x257xf32>
    %9 = vector.shape_cast %6 : vector<32x257xf32> to vector<1x32x257xf32>
    tpu.vector_store %arg4[%c0_6, %c0_7, %c0_8], %9 {strides = array<i32>} : memref<1x32x257xf32, #tpu.memory_space<vmem>>, vector<1x32x257xf32>,
    return
  }
  func.func @transform_0(%arg0: i32) -> (i32, i32, i32) {
    %c0_i32 = arith.constant 0 : i32
    %c0_i32_0 = arith.constant 0 : i32
    %c0_i32_1 = arith.constant 0 : i32
    return %arg0, %c0_i32, %c0_i32_0 : i32, i32, i32
  }
  func.func @transform_1(%arg0: i32) -> (i32, i32) {
    %c0_i32 = arith.constant 0 : i32
    %c0_i32_0 = arith.constant 0 : i32
    %c0_i32_1 = arith.constant 0 : i32
    return %c0_i32, %c0_i32_0 : i32, i32
  }
  func.func @transform_2(%arg0: i32) -> (i32, i32) {
    %c0_i32 = arith.constant 0 : i32
    %c0_i32_0 = arith.constant 0 : i32
    %c0_i32_1 = arith.constant 0 : i32
    return %c0_i32, %c0_i32_0 : i32, i32
  }
  func.func @transform_3(%arg0: i32) -> (i32, i32, i32) {
    %c0_i32 = arith.constant 0 : i32
    %c0_i32_0 = arith.constant 0 : i32
    %c0_i32_1 = arith.constant 0 : i32
    return %arg0, %c0_i32, %c0_i32_0 : i32, i32, i32
  }
}

module attributes {stable_mosaic.version = 11 : i64} {
  func.func @_flow_kernel(%arg0: i32, %arg1: memref<1x8x128xf32, #tpu.memory_space<vmem>>, %arg2: memref<1x64x128xbf16, #tpu.memory_space<vmem>>, %arg3: memref<8x8xf32, #tpu.memory_space<vmem>>, %arg4: memref<16x8xbf16, #tpu.memory_space<vmem>>, %arg5: memref<16x1xf32, #tpu.memory_space<vmem>>, %arg6: memref<3x32x48xbf16, #tpu.memory_space<vmem>>, %arg7: memref<3x32x64xbf16, #tpu.memory_space<vmem>>, %arg8: memref<3x32x1xf32, #tpu.memory_space<vmem>>, %arg9: memref<3x16x16xbf16, #tpu.memory_space<vmem>>, %arg10: memref<3x16x1xf32, #tpu.memory_space<vmem>>, %arg11: memref<3x16x16xbf16, #tpu.memory_space<vmem>>, %arg12: memref<3x16x1xf32, #tpu.memory_space<vmem>>, %arg13: memref<8x16xbf16, #tpu.memory_space<vmem>>, %arg14: memref<8x1xf32, #tpu.memory_space<vmem>>, %arg15: memref<8x16xbf16, #tpu.memory_space<vmem>>, %arg16: memref<8x1xf32, #tpu.memory_space<vmem>>, %arg17: memref<1x8x128xf32, #tpu.memory_space<vmem>>, %arg18: memref<1x1x1xf32, #tpu.memory_space<vmem>>, %arg19: memref<16x384xbf16, #tpu.memory_space<vmem>>) attributes {dimension_semantics = [#tpu.dimension_semantics<parallel>], iteration_bounds = array<i64: 2>, scalar_prefetch = 0 : i64, scratch_operands = 1 : i64, tpu.core_type = #tpu.core_type<tc>, window_params = [{transform_indices = @transform_0, window_bounds = array<i64: 1, 8, 128>}, {transform_indices = @transform_1, window_bounds = array<i64: 1, 64, 128>}, {pipeline_mode = #tpu.pipeline_mode<synchronous>, transform_indices = @transform_2, window_bounds = array<i64: 8, 8>}, {pipeline_mode = #tpu.pipeline_mode<synchronous>, transform_indices = @transform_3, window_bounds = array<i64: 16, 8>}, {pipeline_mode = #tpu.pipeline_mode<synchronous>, transform_indices = @transform_4, window_bounds = array<i64: 16, 1>}, {pipeline_mode = #tpu.pipeline_mode<synchronous>, transform_indices = @transform_5, window_bounds = array<i64: 3, 32, 48>}, {pipeline_mode = #tpu.pipeline_mode<synchronous>, transform_indices = @transform_6, window_bounds = array<i64: 3, 32, 64>}, {pipeline_mode = #tpu.pipeline_mode<synchronous>, transform_indices = @transform_7, window_bounds = array<i64: 3, 32, 1>}, {pipeline_mode = #tpu.pipeline_mode<synchronous>, transform_indices = @transform_8, window_bounds = array<i64: 3, 16, 16>}, {pipeline_mode = #tpu.pipeline_mode<synchronous>, transform_indices = @transform_9, window_bounds = array<i64: 3, 16, 1>}, {pipeline_mode = #tpu.pipeline_mode<synchronous>, transform_indices = @transform_10, window_bounds = array<i64: 3, 16, 16>}, {pipeline_mode = #tpu.pipeline_mode<synchronous>, transform_indices = @transform_11, window_bounds = array<i64: 3, 16, 1>}, {pipeline_mode = #tpu.pipeline_mode<synchronous>, transform_indices = @transform_12, window_bounds = array<i64: 8, 16>}, {pipeline_mode = #tpu.pipeline_mode<synchronous>, transform_indices = @transform_13, window_bounds = array<i64: 8, 1>}, {pipeline_mode = #tpu.pipeline_mode<synchronous>, transform_indices = @transform_14, window_bounds = array<i64: 8, 16>}, {pipeline_mode = #tpu.pipeline_mode<synchronous>, transform_indices = @transform_15, window_bounds = array<i64: 8, 1>}, {transform_indices = @transform_16, window_bounds = array<i64: 1, 8, 128>}, {transform_indices = @transform_17, window_bounds = array<i64: 1, 1, 1>}]} {
    %c0 = arith.constant 0 : index
    %c0_0 = arith.constant 0 : index
    %0 = vector.load %arg3[%c0, %c0_0] : memref<8x8xf32, #tpu.memory_space<vmem>>, vector<8x8xf32>
    %c0_1 = arith.constant 0 : index
    %c0_2 = arith.constant 0 : index
    %c0_3 = arith.constant 0 : index
    %1 = vector.load %arg1[%c0_1, %c0_2, %c0_3] : memref<1x8x128xf32, #tpu.memory_space<vmem>>, vector<1x8x128xf32>
    %2 = vector.shape_cast %1 : vector<1x8x128xf32> to vector<8x128xf32>
    %cst = arith.constant dense<0.000000e+00> : vector<8x128xf32>
    %3 = tpu.matmul %0, %2, %cst {dimension_numbers = #tpu.dot_dimension_numbers<[1], [0], [0], [1], [0, 0, 1, 1], [], []>} : vector<8x8xf32>, vector<8x128xf32>, vector<8x128xf32> -> vector<8x128xf32>
    %4 = arith.truncf %3 : vector<8x128xf32> to vector<8x128xbf16>
    %c0_4 = arith.constant 0 : index
    %c0_5 = arith.constant 0 : index
    %c0_6 = arith.constant 0 : index
    %5 = vector.load %arg2[%c0_4, %c0_5, %c0_6] : memref<1x64x128xbf16, #tpu.memory_space<vmem>>, vector<1x64x128xbf16>
    %6 = vector.shape_cast %5 : vector<1x64x128xbf16> to vector<64x128xbf16>
    %c0_7 = arith.constant 0 : index
    %c0_8 = arith.constant 0 : index
    %7 = vector.load %arg4[%c0_7, %c0_8] : memref<16x8xbf16, #tpu.memory_space<vmem>>, vector<16x8xbf16>
    %cst_9 = arith.constant dense<0.000000e+00> : vector<16x128xf32>
    %8 = tpu.matmul %7, %4, %cst_9 {dimension_numbers = #tpu.dot_dimension_numbers<[1], [0], [0], [1], [0, 0, 1, 1], [], []>} : vector<16x8xbf16>, vector<8x128xbf16>, vector<16x128xf32> -> vector<16x128xf32>
    %c0_10 = arith.constant 0 : index
    %c0_11 = arith.constant 0 : index
    %9 = vector.load %arg5[%c0_10, %c0_11] : memref<16x1xf32, #tpu.memory_space<vmem>>, vector<16x1xf32>
    %10 = vector.broadcast %9 : vector<16x1xf32> to vector<16x128xf32>
    %11 = arith.addf %8, %10 : vector<16x128xf32>
    %cst_12 = arith.constant 0.000000e+00 : f32
    %12 = vector.broadcast %cst_12 : f32 to vector<16x128xf32>
    %cst_13 = arith.constant 0.000000e+00 : bf16
    %13 = vector.broadcast %cst_13 : bf16 to vector<16x384xbf16>
    %c0_14 = arith.constant 0 : index
    %c0_15 = arith.constant 0 : index
    %14 = vector.load %arg19[%c0_14, %c0_15] : memref<16x384xbf16, #tpu.memory_space<vmem>>, vector<16x384xbf16>
    tpu.vector_store %arg19[%c0_14, %c0_15], %13 {strides = array<i32>} : memref<16x384xbf16, #tpu.memory_space<vmem>>, vector<16x384xbf16>,
    %15 = arith.truncf %11 : vector<16x128xf32> to vector<16x128xbf16>
    %c0_16 = arith.constant 0 : index
    %c128 = arith.constant 128 : index
    %16 = vector.load %arg19[%c0_16, %c128] : memref<16x384xbf16, #tpu.memory_space<vmem>>, vector<16x128xbf16>
    tpu.vector_store %arg19[%c0_16, %c128], %15 {strides = array<i32>} : memref<16x384xbf16, #tpu.memory_space<vmem>>, vector<16x128xbf16>,
    %c0_17 = arith.constant 0 : index
    %c127 = arith.constant 127 : index
    %17 = vector.load %arg19[%c0_17, %c127] : memref<16x384xbf16, #tpu.memory_space<vmem>>, vector<16x128xbf16>
    %c0_18 = arith.constant 0 : index
    %c128_19 = arith.constant 128 : index
    %18 = vector.load %arg19[%c0_18, %c128_19] : memref<16x384xbf16, #tpu.memory_space<vmem>>, vector<16x128xbf16>
    %c0_20 = arith.constant 0 : index
    %c129 = arith.constant 129 : index
    %19 = vector.load %arg19[%c0_20, %c129] : memref<16x384xbf16, #tpu.memory_space<vmem>>, vector<16x128xbf16>
    %20 = tpu.concatenate %17, %18, %19 in 0 : vector<16x128xbf16>, vector<16x128xbf16>, vector<16x128xbf16> -> vector<48x128xbf16>
    %c0_21 = arith.constant 0 : index
    %c0_22 = arith.constant 0 : index
    %c0_23 = arith.constant 0 : index
    %21 = vector.load %arg6[%c0_21, %c0_22, %c0_23] : memref<3x32x48xbf16, #tpu.memory_space<vmem>>, vector<1x32x48xbf16>
    %22 = vector.shape_cast %21 : vector<1x32x48xbf16> to vector<32x48xbf16>
    %cst_24 = arith.constant dense<0.000000e+00> : vector<32x128xf32>
    %23 = tpu.matmul %22, %20, %cst_24 {dimension_numbers = #tpu.dot_dimension_numbers<[1], [0], [0], [1], [0, 0, 1, 1], [], []>} : vector<32x48xbf16>, vector<48x128xbf16>, vector<32x128xf32> -> vector<32x128xf32>
    %c0_25 = arith.constant 0 : index
    %c0_26 = arith.constant 0 : index
    %c0_27 = arith.constant 0 : index
    %24 = vector.load %arg7[%c0_25, %c0_26, %c0_27] : memref<3x32x64xbf16, #tpu.memory_space<vmem>>, vector<1x32x64xbf16>
    %25 = vector.shape_cast %24 : vector<1x32x64xbf16> to vector<32x64xbf16>
    %cst_28 = arith.constant dense<0.000000e+00> : vector<32x128xf32>
    %26 = tpu.matmul %25, %6, %cst_28 {dimension_numbers = #tpu.dot_dimension_numbers<[1], [0], [0], [1], [0, 0, 1, 1], [], []>} : vector<32x64xbf16>, vector<64x128xbf16>, vector<32x128xf32> -> vector<32x128xf32>
    %27 = arith.addf %23, %26 : vector<32x128xf32>
    %c0_29 = arith.constant 0 : index
    %c0_30 = arith.constant 0 : index
    %c0_31 = arith.constant 0 : index
    %28 = vector.load %arg8[%c0_29, %c0_30, %c0_31] : memref<3x32x1xf32, #tpu.memory_space<vmem>>, vector<1x32x1xf32>
    %29 = vector.shape_cast %28 : vector<1x32x1xf32> to vector<32x1xf32>
    %30 = vector.broadcast %29 : vector<32x1xf32> to vector<32x128xf32>
    %31 = arith.addf %27, %30 : vector<32x128xf32>
    %32 = vector.extract_strided_slice %31 {offsets = [0, 0], sizes = [16, 128], strides = [1, 1]} : vector<32x128xf32> to vector<16x128xf32>
    %33 = math.tanh %32 : vector<16x128xf32>
    %34 = vector.extract_strided_slice %31 {offsets = [16, 0], sizes = [16, 128], strides = [1, 1]} : vector<32x128xf32> to vector<16x128xf32>
    %35 = arith.negf %34 : vector<16x128xf32>
    %36 = math.exp %35 : vector<16x128xf32>
    %cst_32 = arith.constant 1.000000e+00 : f32
    %37 = vector.broadcast %cst_32 : f32 to vector<16x128xf32>
    %38 = arith.addf %37, %36 : vector<16x128xf32>
    %39 = arith.divf %37, %38 : vector<16x128xf32>
    %40 = arith.mulf %33, %39 : vector<16x128xf32>
    %41 = arith.truncf %40 : vector<16x128xf32> to vector<16x128xbf16>
    %c0_33 = arith.constant 0 : index
    %c0_34 = arith.constant 0 : index
    %c0_35 = arith.constant 0 : index
    %42 = vector.load %arg9[%c0_33, %c0_34, %c0_35] : memref<3x16x16xbf16, #tpu.memory_space<vmem>>, vector<1x16x16xbf16>
    %43 = vector.shape_cast %42 : vector<1x16x16xbf16> to vector<16x16xbf16>
    %cst_36 = arith.constant dense<0.000000e+00> : vector<16x128xf32>
    %44 = tpu.matmul %43, %41, %cst_36 {dimension_numbers = #tpu.dot_dimension_numbers<[1], [0], [0], [1], [0, 0, 1, 1], [], []>} : vector<16x16xbf16>, vector<16x128xbf16>, vector<16x128xf32> -> vector<16x128xf32>
    %45 = arith.addf %11, %44 : vector<16x128xf32>
    %c0_37 = arith.constant 0 : index
    %c0_38 = arith.constant 0 : index
    %c0_39 = arith.constant 0 : index
    %46 = vector.load %arg10[%c0_37, %c0_38, %c0_39] : memref<3x16x1xf32, #tpu.memory_space<vmem>>, vector<1x16x1xf32>
    %47 = vector.shape_cast %46 : vector<1x16x1xf32> to vector<16x1xf32>
    %48 = vector.broadcast %47 : vector<16x1xf32> to vector<16x128xf32>
    %49 = arith.addf %45, %48 : vector<16x128xf32>
    %c0_40 = arith.constant 0 : index
    %c0_41 = arith.constant 0 : index
    %c0_42 = arith.constant 0 : index
    %50 = vector.load %arg11[%c0_40, %c0_41, %c0_42] : memref<3x16x16xbf16, #tpu.memory_space<vmem>>, vector<1x16x16xbf16>
    %51 = vector.shape_cast %50 : vector<1x16x16xbf16> to vector<16x16xbf16>
    %cst_43 = arith.constant dense<0.000000e+00> : vector<16x128xf32>
    %52 = tpu.matmul %51, %41, %cst_43 {dimension_numbers = #tpu.dot_dimension_numbers<[1], [0], [0], [1], [0, 0, 1, 1], [], []>} : vector<16x16xbf16>, vector<16x128xbf16>, vector<16x128xf32> -> vector<16x128xf32>
    %53 = arith.addf %12, %52 : vector<16x128xf32>
    %c0_44 = arith.constant 0 : index
    %c0_45 = arith.constant 0 : index
    %c0_46 = arith.constant 0 : index
    %54 = vector.load %arg12[%c0_44, %c0_45, %c0_46] : memref<3x16x1xf32, #tpu.memory_space<vmem>>, vector<1x16x1xf32>
    %55 = vector.shape_cast %54 : vector<1x16x1xf32> to vector<16x1xf32>
    %56 = vector.broadcast %55 : vector<16x1xf32> to vector<16x128xf32>
    %57 = arith.addf %53, %56 : vector<16x128xf32>
    %58 = arith.truncf %49 : vector<16x128xf32> to vector<16x128xbf16>
    %c0_47 = arith.constant 0 : index
    %c128_48 = arith.constant 128 : index
    %59 = vector.load %arg19[%c0_47, %c128_48] : memref<16x384xbf16, #tpu.memory_space<vmem>>, vector<16x128xbf16>
    tpu.vector_store %arg19[%c0_47, %c128_48], %58 {strides = array<i32>} : memref<16x384xbf16, #tpu.memory_space<vmem>>, vector<16x128xbf16>,
    %c0_49 = arith.constant 0 : index
    %c126 = arith.constant 126 : index
    %60 = vector.load %arg19[%c0_49, %c126] : memref<16x384xbf16, #tpu.memory_space<vmem>>, vector<16x128xbf16>
    %c0_50 = arith.constant 0 : index
    %c128_51 = arith.constant 128 : index
    %61 = vector.load %arg19[%c0_50, %c128_51] : memref<16x384xbf16, #tpu.memory_space<vmem>>, vector<16x128xbf16>
    %c0_52 = arith.constant 0 : index
    %c130 = arith.constant 130 : index
    %62 = vector.load %arg19[%c0_52, %c130] : memref<16x384xbf16, #tpu.memory_space<vmem>>, vector<16x128xbf16>
    %63 = tpu.concatenate %60, %61, %62 in 0 : vector<16x128xbf16>, vector<16x128xbf16>, vector<16x128xbf16> -> vector<48x128xbf16>
    %c1 = arith.constant 1 : index
    %c0_53 = arith.constant 0 : index
    %c0_54 = arith.constant 0 : index
    %64 = vector.load %arg6[%c1, %c0_53, %c0_54] : memref<3x32x48xbf16, #tpu.memory_space<vmem>>, vector<1x32x48xbf16>
    %65 = vector.shape_cast %64 : vector<1x32x48xbf16> to vector<32x48xbf16>
    %cst_55 = arith.constant dense<0.000000e+00> : vector<32x128xf32>
    %66 = tpu.matmul %65, %63, %cst_55 {dimension_numbers = #tpu.dot_dimension_numbers<[1], [0], [0], [1], [0, 0, 1, 1], [], []>} : vector<32x48xbf16>, vector<48x128xbf16>, vector<32x128xf32> -> vector<32x128xf32>
    %c1_56 = arith.constant 1 : index
    %c0_57 = arith.constant 0 : index
    %c0_58 = arith.constant 0 : index
    %67 = vector.load %arg7[%c1_56, %c0_57, %c0_58] : memref<3x32x64xbf16, #tpu.memory_space<vmem>>, vector<1x32x64xbf16>
    %68 = vector.shape_cast %67 : vector<1x32x64xbf16> to vector<32x64xbf16>
    %cst_59 = arith.constant dense<0.000000e+00> : vector<32x128xf32>
    %69 = tpu.matmul %68, %6, %cst_59 {dimension_numbers = #tpu.dot_dimension_numbers<[1], [0], [0], [1], [0, 0, 1, 1], [], []>} : vector<32x64xbf16>, vector<64x128xbf16>, vector<32x128xf32> -> vector<32x128xf32>
    %70 = arith.addf %66, %69 : vector<32x128xf32>
    %c1_60 = arith.constant 1 : index
    %c0_61 = arith.constant 0 : index
    %c0_62 = arith.constant 0 : index
    %71 = vector.load %arg8[%c1_60, %c0_61, %c0_62] : memref<3x32x1xf32, #tpu.memory_space<vmem>>, vector<1x32x1xf32>
    %72 = vector.shape_cast %71 : vector<1x32x1xf32> to vector<32x1xf32>
    %73 = vector.broadcast %72 : vector<32x1xf32> to vector<32x128xf32>
    %74 = arith.addf %70, %73 : vector<32x128xf32>
    %75 = vector.extract_strided_slice %74 {offsets = [0, 0], sizes = [16, 128], strides = [1, 1]} : vector<32x128xf32> to vector<16x128xf32>
    %76 = math.tanh %75 : vector<16x128xf32>
    %77 = vector.extract_strided_slice %74 {offsets = [16, 0], sizes = [16, 128], strides = [1, 1]} : vector<32x128xf32> to vector<16x128xf32>
    %78 = arith.negf %77 : vector<16x128xf32>
    %79 = math.exp %78 : vector<16x128xf32>
    %cst_63 = arith.constant 1.000000e+00 : f32
    %80 = vector.broadcast %cst_63 : f32 to vector<16x128xf32>
    %81 = arith.addf %80, %79 : vector<16x128xf32>
    %82 = arith.divf %80, %81 : vector<16x128xf32>
    %83 = arith.mulf %76, %82 : vector<16x128xf32>
    %84 = arith.truncf %83 : vector<16x128xf32> to vector<16x128xbf16>
    %c1_64 = arith.constant 1 : index
    %c0_65 = arith.constant 0 : index
    %c0_66 = arith.constant 0 : index
    %85 = vector.load %arg9[%c1_64, %c0_65, %c0_66] : memref<3x16x16xbf16, #tpu.memory_space<vmem>>, vector<1x16x16xbf16>
    %86 = vector.shape_cast %85 : vector<1x16x16xbf16> to vector<16x16xbf16>
    %cst_67 = arith.constant dense<0.000000e+00> : vector<16x128xf32>
    %87 = tpu.matmul %86, %84, %cst_67 {dimension_numbers = #tpu.dot_dimension_numbers<[1], [0], [0], [1], [0, 0, 1, 1], [], []>} : vector<16x16xbf16>, vector<16x128xbf16>, vector<16x128xf32> -> vector<16x128xf32>
    %88 = arith.addf %49, %87 : vector<16x128xf32>
    %c1_68 = arith.constant 1 : index
    %c0_69 = arith.constant 0 : index
    %c0_70 = arith.constant 0 : index
    %89 = vector.load %arg10[%c1_68, %c0_69, %c0_70] : memref<3x16x1xf32, #tpu.memory_space<vmem>>, vector<1x16x1xf32>
    %90 = vector.shape_cast %89 : vector<1x16x1xf32> to vector<16x1xf32>
    %91 = vector.broadcast %90 : vector<16x1xf32> to vector<16x128xf32>
    %92 = arith.addf %88, %91 : vector<16x128xf32>
    %c1_71 = arith.constant 1 : index
    %c0_72 = arith.constant 0 : index
    %c0_73 = arith.constant 0 : index
    %93 = vector.load %arg11[%c1_71, %c0_72, %c0_73] : memref<3x16x16xbf16, #tpu.memory_space<vmem>>, vector<1x16x16xbf16>
    %94 = vector.shape_cast %93 : vector<1x16x16xbf16> to vector<16x16xbf16>
    %cst_74 = arith.constant dense<0.000000e+00> : vector<16x128xf32>
    %95 = tpu.matmul %94, %84, %cst_74 {dimension_numbers = #tpu.dot_dimension_numbers<[1], [0], [0], [1], [0, 0, 1, 1], [], []>} : vector<16x16xbf16>, vector<16x128xbf16>, vector<16x128xf32> -> vector<16x128xf32>
    %96 = arith.addf %57, %95 : vector<16x128xf32>
    %c1_75 = arith.constant 1 : index
    %c0_76 = arith.constant 0 : index
    %c0_77 = arith.constant 0 : index
    %97 = vector.load %arg12[%c1_75, %c0_76, %c0_77] : memref<3x16x1xf32, #tpu.memory_space<vmem>>, vector<1x16x1xf32>
    %98 = vector.shape_cast %97 : vector<1x16x1xf32> to vector<16x1xf32>
    %99 = vector.broadcast %98 : vector<16x1xf32> to vector<16x128xf32>
    %100 = arith.addf %96, %99 : vector<16x128xf32>
    %101 = arith.truncf %92 : vector<16x128xf32> to vector<16x128xbf16>
    %c0_78 = arith.constant 0 : index
    %c128_79 = arith.constant 128 : index
    %102 = vector.load %arg19[%c0_78, %c128_79] : memref<16x384xbf16, #tpu.memory_space<vmem>>, vector<16x128xbf16>
    tpu.vector_store %arg19[%c0_78, %c128_79], %101 {strides = array<i32>} : memref<16x384xbf16, #tpu.memory_space<vmem>>, vector<16x128xbf16>,
    %c0_80 = arith.constant 0 : index
    %c124 = arith.constant 124 : index
    %103 = vector.load %arg19[%c0_80, %c124] : memref<16x384xbf16, #tpu.memory_space<vmem>>, vector<16x128xbf16>
    %c0_81 = arith.constant 0 : index
    %c128_82 = arith.constant 128 : index
    %104 = vector.load %arg19[%c0_81, %c128_82] : memref<16x384xbf16, #tpu.memory_space<vmem>>, vector<16x128xbf16>
    %c0_83 = arith.constant 0 : index
    %c132 = arith.constant 132 : index
    %105 = vector.load %arg19[%c0_83, %c132] : memref<16x384xbf16, #tpu.memory_space<vmem>>, vector<16x128xbf16>
    %106 = tpu.concatenate %103, %104, %105 in 0 : vector<16x128xbf16>, vector<16x128xbf16>, vector<16x128xbf16> -> vector<48x128xbf16>
    %c2 = arith.constant 2 : index
    %c0_84 = arith.constant 0 : index
    %c0_85 = arith.constant 0 : index
    %107 = vector.load %arg6[%c2, %c0_84, %c0_85] : memref<3x32x48xbf16, #tpu.memory_space<vmem>>, vector<1x32x48xbf16>
    %108 = vector.shape_cast %107 : vector<1x32x48xbf16> to vector<32x48xbf16>
    %cst_86 = arith.constant dense<0.000000e+00> : vector<32x128xf32>
    %109 = tpu.matmul %108, %106, %cst_86 {dimension_numbers = #tpu.dot_dimension_numbers<[1], [0], [0], [1], [0, 0, 1, 1], [], []>} : vector<32x48xbf16>, vector<48x128xbf16>, vector<32x128xf32> -> vector<32x128xf32>
    %c2_87 = arith.constant 2 : index
    %c0_88 = arith.constant 0 : index
    %c0_89 = arith.constant 0 : index
    %110 = vector.load %arg7[%c2_87, %c0_88, %c0_89] : memref<3x32x64xbf16, #tpu.memory_space<vmem>>, vector<1x32x64xbf16>
    %111 = vector.shape_cast %110 : vector<1x32x64xbf16> to vector<32x64xbf16>
    %cst_90 = arith.constant dense<0.000000e+00> : vector<32x128xf32>
    %112 = tpu.matmul %111, %6, %cst_90 {dimension_numbers = #tpu.dot_dimension_numbers<[1], [0], [0], [1], [0, 0, 1, 1], [], []>} : vector<32x64xbf16>, vector<64x128xbf16>, vector<32x128xf32> -> vector<32x128xf32>
    %113 = arith.addf %109, %112 : vector<32x128xf32>
    %c2_91 = arith.constant 2 : index
    %c0_92 = arith.constant 0 : index
    %c0_93 = arith.constant 0 : index
    %114 = vector.load %arg8[%c2_91, %c0_92, %c0_93] : memref<3x32x1xf32, #tpu.memory_space<vmem>>, vector<1x32x1xf32>
    %115 = vector.shape_cast %114 : vector<1x32x1xf32> to vector<32x1xf32>
    %116 = vector.broadcast %115 : vector<32x1xf32> to vector<32x128xf32>
    %117 = arith.addf %113, %116 : vector<32x128xf32>
    %118 = vector.extract_strided_slice %117 {offsets = [0, 0], sizes = [16, 128], strides = [1, 1]} : vector<32x128xf32> to vector<16x128xf32>
    %119 = math.tanh %118 : vector<16x128xf32>
    %120 = vector.extract_strided_slice %117 {offsets = [16, 0], sizes = [16, 128], strides = [1, 1]} : vector<32x128xf32> to vector<16x128xf32>
    %121 = arith.negf %120 : vector<16x128xf32>
    %122 = math.exp %121 : vector<16x128xf32>
    %cst_94 = arith.constant 1.000000e+00 : f32
    %123 = vector.broadcast %cst_94 : f32 to vector<16x128xf32>
    %124 = arith.addf %123, %122 : vector<16x128xf32>
    %125 = arith.divf %123, %124 : vector<16x128xf32>
    %126 = arith.mulf %119, %125 : vector<16x128xf32>
    %127 = arith.truncf %126 : vector<16x128xf32> to vector<16x128xbf16>
    %c2_95 = arith.constant 2 : index
    %c0_96 = arith.constant 0 : index
    %c0_97 = arith.constant 0 : index
    %128 = vector.load %arg11[%c2_95, %c0_96, %c0_97] : memref<3x16x16xbf16, #tpu.memory_space<vmem>>, vector<1x16x16xbf16>
    %129 = vector.shape_cast %128 : vector<1x16x16xbf16> to vector<16x16xbf16>
    %cst_98 = arith.constant dense<0.000000e+00> : vector<16x128xf32>
    %130 = tpu.matmul %129, %127, %cst_98 {dimension_numbers = #tpu.dot_dimension_numbers<[1], [0], [0], [1], [0, 0, 1, 1], [], []>} : vector<16x16xbf16>, vector<16x128xbf16>, vector<16x128xf32> -> vector<16x128xf32>
    %131 = arith.addf %100, %130 : vector<16x128xf32>
    %c2_99 = arith.constant 2 : index
    %c0_100 = arith.constant 0 : index
    %c0_101 = arith.constant 0 : index
    %132 = vector.load %arg12[%c2_99, %c0_100, %c0_101] : memref<3x16x1xf32, #tpu.memory_space<vmem>>, vector<1x16x1xf32>
    %133 = vector.shape_cast %132 : vector<1x16x1xf32> to vector<16x1xf32>
    %134 = vector.broadcast %133 : vector<16x1xf32> to vector<16x128xf32>
    %135 = arith.addf %131, %134 : vector<16x128xf32>
    %136 = arith.truncf %135 : vector<16x128xf32> to vector<16x128xbf16>
    %c0_102 = arith.constant 0 : index
    %c0_103 = arith.constant 0 : index
    %137 = vector.load %arg13[%c0_102, %c0_103] : memref<8x16xbf16, #tpu.memory_space<vmem>>, vector<8x16xbf16>
    %cst_104 = arith.constant dense<0.000000e+00> : vector<8x128xf32>
    %138 = tpu.matmul %137, %136, %cst_104 {dimension_numbers = #tpu.dot_dimension_numbers<[1], [0], [0], [1], [0, 0, 1, 1], [], []>} : vector<8x16xbf16>, vector<16x128xbf16>, vector<8x128xf32> -> vector<8x128xf32>
    %c0_105 = arith.constant 0 : index
    %c0_106 = arith.constant 0 : index
    %139 = vector.load %arg14[%c0_105, %c0_106] : memref<8x1xf32, #tpu.memory_space<vmem>>, vector<8x1xf32>
    %140 = vector.broadcast %139 : vector<8x1xf32> to vector<8x128xf32>
    %141 = arith.addf %138, %140 : vector<8x128xf32>
    %c0_107 = arith.constant 0 : index
    %c0_108 = arith.constant 0 : index
    %142 = vector.load %arg15[%c0_107, %c0_108] : memref<8x16xbf16, #tpu.memory_space<vmem>>, vector<8x16xbf16>
    %cst_109 = arith.constant dense<0.000000e+00> : vector<8x128xf32>
    %143 = tpu.matmul %142, %136, %cst_109 {dimension_numbers = #tpu.dot_dimension_numbers<[1], [0], [0], [1], [0, 0, 1, 1], [], []>} : vector<8x16xbf16>, vector<16x128xbf16>, vector<8x128xf32> -> vector<8x128xf32>
    %c0_110 = arith.constant 0 : index
    %c0_111 = arith.constant 0 : index
    %144 = vector.load %arg16[%c0_110, %c0_111] : memref<8x1xf32, #tpu.memory_space<vmem>>, vector<8x1xf32>
    %145 = vector.broadcast %144 : vector<8x1xf32> to vector<8x128xf32>
    %146 = arith.addf %143, %145 : vector<8x128xf32>
    %147 = math.exp %146 : vector<8x128xf32>
    %148 = arith.mulf %147, %3 : vector<8x128xf32>
    %149 = arith.addf %148, %141 : vector<8x128xf32>
    %c0_112 = arith.constant 0 : index
    %c0_113 = arith.constant 0 : index
    %c0_114 = arith.constant 0 : index
    %150 = vector.load %arg17[%c0_112, %c0_113, %c0_114] : memref<1x8x128xf32, #tpu.memory_space<vmem>>, vector<1x8x128xf32>
    %151 = vector.shape_cast %150 : vector<1x8x128xf32> to vector<8x128xf32>
    %152 = vector.shape_cast %149 : vector<8x128xf32> to vector<1x8x128xf32>
    tpu.vector_store %arg17[%c0_112, %c0_113, %c0_114], %152 {strides = array<i32>} : memref<1x8x128xf32, #tpu.memory_space<vmem>>, vector<1x8x128xf32>,
    %153 = vector.shape_cast %146 : vector<8x128xf32> to vector<1x8x128xf32>
    %cst_115 = arith.constant dense<0.000000e+00> : vector<1xf32>
    %154 = vector.multi_reduction <add>, %153, %cst_115 [1, 2] : vector<1x8x128xf32> to vector<1xf32>
    %155 = vector.shape_cast %154 : vector<1xf32> to vector<1x1x1xf32>
    %156 = vector.extract %155[0, 0, 0] : f32 from vector<1x1x1xf32>
    %157 = vector.broadcast %156 : f32 to vector<1x1x1xf32>
    %c0_116 = arith.constant 0 : index
    %c0_117 = arith.constant 0 : index
    %c0_118 = arith.constant 0 : index
    %158 = vector.load %arg18[%c0_116, %c0_117, %c0_118] : memref<1x1x1xf32, #tpu.memory_space<vmem>>, vector<1x1x1xf32>
    tpu.vector_store %arg18[%c0_116, %c0_117, %c0_118], %157 {strides = array<i32>} : memref<1x1x1xf32, #tpu.memory_space<vmem>>, vector<1x1x1xf32>,
    return
  }
  func.func @transform_0(%arg0: i32) -> (i32, i32, i32) {
    %c0_i32 = arith.constant 0 : i32
    %c0_i32_0 = arith.constant 0 : i32
    %c0_i32_1 = arith.constant 0 : i32
    return %arg0, %c0_i32, %c0_i32_0 : i32, i32, i32
  }
  func.func @transform_1(%arg0: i32) -> (i32, i32, i32) {
    %c0_i32 = arith.constant 0 : i32
    %c0_i32_0 = arith.constant 0 : i32
    %c0_i32_1 = arith.constant 0 : i32
    return %arg0, %c0_i32, %c0_i32_0 : i32, i32, i32
  }
  func.func @transform_2(%arg0: i32) -> (i32, i32) {
    %c0_i32 = arith.constant 0 : i32
    %c0_i32_0 = arith.constant 0 : i32
    %c0_i32_1 = arith.constant 0 : i32
    return %c0_i32, %c0_i32_0 : i32, i32
  }
  func.func @transform_3(%arg0: i32) -> (i32, i32) {
    %c0_i32 = arith.constant 0 : i32
    %c0_i32_0 = arith.constant 0 : i32
    %c0_i32_1 = arith.constant 0 : i32
    return %c0_i32, %c0_i32_0 : i32, i32
  }
  func.func @transform_4(%arg0: i32) -> (i32, i32) {
    %c0_i32 = arith.constant 0 : i32
    %c0_i32_0 = arith.constant 0 : i32
    %c0_i32_1 = arith.constant 0 : i32
    return %c0_i32, %c0_i32_0 : i32, i32
  }
  func.func @transform_5(%arg0: i32) -> (i32, i32, i32) {
    %c0_i32 = arith.constant 0 : i32
    %c0_i32_0 = arith.constant 0 : i32
    %c0_i32_1 = arith.constant 0 : i32
    %c0_i32_2 = arith.constant 0 : i32
    return %c0_i32, %c0_i32_0, %c0_i32_1 : i32, i32, i32
  }
  func.func @transform_6(%arg0: i32) -> (i32, i32, i32) {
    %c0_i32 = arith.constant 0 : i32
    %c0_i32_0 = arith.constant 0 : i32
    %c0_i32_1 = arith.constant 0 : i32
    %c0_i32_2 = arith.constant 0 : i32
    return %c0_i32, %c0_i32_0, %c0_i32_1 : i32, i32, i32
  }
  func.func @transform_7(%arg0: i32) -> (i32, i32, i32) {
    %c0_i32 = arith.constant 0 : i32
    %c0_i32_0 = arith.constant 0 : i32
    %c0_i32_1 = arith.constant 0 : i32
    %c0_i32_2 = arith.constant 0 : i32
    return %c0_i32, %c0_i32_0, %c0_i32_1 : i32, i32, i32
  }
  func.func @transform_8(%arg0: i32) -> (i32, i32, i32) {
    %c0_i32 = arith.constant 0 : i32
    %c0_i32_0 = arith.constant 0 : i32
    %c0_i32_1 = arith.constant 0 : i32
    %c0_i32_2 = arith.constant 0 : i32
    return %c0_i32, %c0_i32_0, %c0_i32_1 : i32, i32, i32
  }
  func.func @transform_9(%arg0: i32) -> (i32, i32, i32) {
    %c0_i32 = arith.constant 0 : i32
    %c0_i32_0 = arith.constant 0 : i32
    %c0_i32_1 = arith.constant 0 : i32
    %c0_i32_2 = arith.constant 0 : i32
    return %c0_i32, %c0_i32_0, %c0_i32_1 : i32, i32, i32
  }
  func.func @transform_10(%arg0: i32) -> (i32, i32, i32) {
    %c0_i32 = arith.constant 0 : i32
    %c0_i32_0 = arith.constant 0 : i32
    %c0_i32_1 = arith.constant 0 : i32
    %c0_i32_2 = arith.constant 0 : i32
    return %c0_i32, %c0_i32_0, %c0_i32_1 : i32, i32, i32
  }
  func.func @transform_11(%arg0: i32) -> (i32, i32, i32) {
    %c0_i32 = arith.constant 0 : i32
    %c0_i32_0 = arith.constant 0 : i32
    %c0_i32_1 = arith.constant 0 : i32
    %c0_i32_2 = arith.constant 0 : i32
    return %c0_i32, %c0_i32_0, %c0_i32_1 : i32, i32, i32
  }
  func.func @transform_12(%arg0: i32) -> (i32, i32) {
    %c0_i32 = arith.constant 0 : i32
    %c0_i32_0 = arith.constant 0 : i32
    %c0_i32_1 = arith.constant 0 : i32
    return %c0_i32, %c0_i32_0 : i32, i32
  }
  func.func @transform_13(%arg0: i32) -> (i32, i32) {
    %c0_i32 = arith.constant 0 : i32
    %c0_i32_0 = arith.constant 0 : i32
    %c0_i32_1 = arith.constant 0 : i32
    return %c0_i32, %c0_i32_0 : i32, i32
  }
  func.func @transform_14(%arg0: i32) -> (i32, i32) {
    %c0_i32 = arith.constant 0 : i32
    %c0_i32_0 = arith.constant 0 : i32
    %c0_i32_1 = arith.constant 0 : i32
    return %c0_i32, %c0_i32_0 : i32, i32
  }
  func.func @transform_15(%arg0: i32) -> (i32, i32) {
    %c0_i32 = arith.constant 0 : i32
    %c0_i32_0 = arith.constant 0 : i32
    %c0_i32_1 = arith.constant 0 : i32
    return %c0_i32, %c0_i32_0 : i32, i32
  }
  func.func @transform_16(%arg0: i32) -> (i32, i32, i32) {
    %c0_i32 = arith.constant 0 : i32
    %c0_i32_0 = arith.constant 0 : i32
    %c0_i32_1 = arith.constant 0 : i32
    return %arg0, %c0_i32, %c0_i32_0 : i32, i32, i32
  }
  func.func @transform_17(%arg0: i32) -> (i32, i32, i32) {
    %c0_i32 = arith.constant 0 : i32
    %c0_i32_0 = arith.constant 0 : i32
    %c0_i32_1 = arith.constant 0 : i32
    return %arg0, %c0_i32, %c0_i32_0 : i32, i32, i32
  }
}

module attributes {stable_mosaic.version = 11 : i64} {
  func.func @_flow_kernel(%arg0: i32, %arg1: memref<1x6x128xf32, #tpu.memory_space<vmem>>, %arg2: memref<1x64x128xbf16, #tpu.memory_space<vmem>>, %arg3: memref<6x6xf32, #tpu.memory_space<vmem>>, %arg4: memref<16x6xbf16, #tpu.memory_space<vmem>>, %arg5: memref<16x1xf32, #tpu.memory_space<vmem>>, %arg6: memref<3x32x48xbf16, #tpu.memory_space<vmem>>, %arg7: memref<3x32x64xbf16, #tpu.memory_space<vmem>>, %arg8: memref<3x32x1xf32, #tpu.memory_space<vmem>>, %arg9: memref<3x16x16xbf16, #tpu.memory_space<vmem>>, %arg10: memref<3x16x1xf32, #tpu.memory_space<vmem>>, %arg11: memref<3x16x16xbf16, #tpu.memory_space<vmem>>, %arg12: memref<3x16x1xf32, #tpu.memory_space<vmem>>, %arg13: memref<6x16xbf16, #tpu.memory_space<vmem>>, %arg14: memref<6x1xf32, #tpu.memory_space<vmem>>, %arg15: memref<6x16xbf16, #tpu.memory_space<vmem>>, %arg16: memref<6x1xf32, #tpu.memory_space<vmem>>, %arg17: memref<1x6x128xf32, #tpu.memory_space<vmem>>, %arg18: memref<1x1x1xf32, #tpu.memory_space<vmem>>, %arg19: memref<16x384xbf16, #tpu.memory_space<vmem>>) attributes {dimension_semantics = [#tpu.dimension_semantics<parallel>], iteration_bounds = array<i64: 2>, scalar_prefetch = 0 : i64, scratch_operands = 1 : i64, tpu.core_type = #tpu.core_type<tc>, window_params = [{transform_indices = @transform_0, window_bounds = array<i64: 1, 6, 128>}, {transform_indices = @transform_1, window_bounds = array<i64: 1, 64, 128>}, {pipeline_mode = #tpu.pipeline_mode<synchronous>, transform_indices = @transform_2, window_bounds = array<i64: 6, 6>}, {pipeline_mode = #tpu.pipeline_mode<synchronous>, transform_indices = @transform_3, window_bounds = array<i64: 16, 6>}, {pipeline_mode = #tpu.pipeline_mode<synchronous>, transform_indices = @transform_4, window_bounds = array<i64: 16, 1>}, {pipeline_mode = #tpu.pipeline_mode<synchronous>, transform_indices = @transform_5, window_bounds = array<i64: 3, 32, 48>}, {pipeline_mode = #tpu.pipeline_mode<synchronous>, transform_indices = @transform_6, window_bounds = array<i64: 3, 32, 64>}, {pipeline_mode = #tpu.pipeline_mode<synchronous>, transform_indices = @transform_7, window_bounds = array<i64: 3, 32, 1>}, {pipeline_mode = #tpu.pipeline_mode<synchronous>, transform_indices = @transform_8, window_bounds = array<i64: 3, 16, 16>}, {pipeline_mode = #tpu.pipeline_mode<synchronous>, transform_indices = @transform_9, window_bounds = array<i64: 3, 16, 1>}, {pipeline_mode = #tpu.pipeline_mode<synchronous>, transform_indices = @transform_10, window_bounds = array<i64: 3, 16, 16>}, {pipeline_mode = #tpu.pipeline_mode<synchronous>, transform_indices = @transform_11, window_bounds = array<i64: 3, 16, 1>}, {pipeline_mode = #tpu.pipeline_mode<synchronous>, transform_indices = @transform_12, window_bounds = array<i64: 6, 16>}, {pipeline_mode = #tpu.pipeline_mode<synchronous>, transform_indices = @transform_13, window_bounds = array<i64: 6, 1>}, {pipeline_mode = #tpu.pipeline_mode<synchronous>, transform_indices = @transform_14, window_bounds = array<i64: 6, 16>}, {pipeline_mode = #tpu.pipeline_mode<synchronous>, transform_indices = @transform_15, window_bounds = array<i64: 6, 1>}, {transform_indices = @transform_16, window_bounds = array<i64: 1, 6, 128>}, {transform_indices = @transform_17, window_bounds = array<i64: 1, 1, 1>}]} {
    %c0 = arith.constant 0 : index
    %c0_0 = arith.constant 0 : index
    %0 = vector.load %arg3[%c0, %c0_0] : memref<6x6xf32, #tpu.memory_space<vmem>>, vector<6x6xf32>
    %c0_1 = arith.constant 0 : index
    %c0_2 = arith.constant 0 : index
    %c0_3 = arith.constant 0 : index
    %1 = vector.load %arg1[%c0_1, %c0_2, %c0_3] : memref<1x6x128xf32, #tpu.memory_space<vmem>>, vector<1x6x128xf32>
    %2 = vector.shape_cast %1 : vector<1x6x128xf32> to vector<6x128xf32>
    %cst = arith.constant dense<0.000000e+00> : vector<6x128xf32>
    %3 = tpu.matmul %0, %2, %cst {dimension_numbers = #tpu.dot_dimension_numbers<[1], [0], [0], [1], [0, 0, 1, 1], [], []>} : vector<6x6xf32>, vector<6x128xf32>, vector<6x128xf32> -> vector<6x128xf32>
    %4 = arith.truncf %3 : vector<6x128xf32> to vector<6x128xbf16>
    %c0_4 = arith.constant 0 : index
    %c0_5 = arith.constant 0 : index
    %c0_6 = arith.constant 0 : index
    %5 = vector.load %arg2[%c0_4, %c0_5, %c0_6] : memref<1x64x128xbf16, #tpu.memory_space<vmem>>, vector<1x64x128xbf16>
    %6 = vector.shape_cast %5 : vector<1x64x128xbf16> to vector<64x128xbf16>
    %c0_7 = arith.constant 0 : index
    %c0_8 = arith.constant 0 : index
    %7 = vector.load %arg4[%c0_7, %c0_8] : memref<16x6xbf16, #tpu.memory_space<vmem>>, vector<16x6xbf16>
    %cst_9 = arith.constant dense<0.000000e+00> : vector<16x128xf32>
    %8 = tpu.matmul %7, %4, %cst_9 {dimension_numbers = #tpu.dot_dimension_numbers<[1], [0], [0], [1], [0, 0, 1, 1], [], []>} : vector<16x6xbf16>, vector<6x128xbf16>, vector<16x128xf32> -> vector<16x128xf32>
    %c0_10 = arith.constant 0 : index
    %c0_11 = arith.constant 0 : index
    %9 = vector.load %arg5[%c0_10, %c0_11] : memref<16x1xf32, #tpu.memory_space<vmem>>, vector<16x1xf32>
    %10 = vector.broadcast %9 : vector<16x1xf32> to vector<16x128xf32>
    %11 = arith.addf %8, %10 : vector<16x128xf32>
    %cst_12 = arith.constant 0.000000e+00 : f32
    %12 = vector.broadcast %cst_12 : f32 to vector<16x128xf32>
    %cst_13 = arith.constant 0.000000e+00 : bf16
    %13 = vector.broadcast %cst_13 : bf16 to vector<16x384xbf16>
    %c0_14 = arith.constant 0 : index
    %c0_15 = arith.constant 0 : index
    %14 = vector.load %arg19[%c0_14, %c0_15] : memref<16x384xbf16, #tpu.memory_space<vmem>>, vector<16x384xbf16>
    tpu.vector_store %arg19[%c0_14, %c0_15], %13 {strides = array<i32>} : memref<16x384xbf16, #tpu.memory_space<vmem>>, vector<16x384xbf16>,
    %15 = arith.truncf %11 : vector<16x128xf32> to vector<16x128xbf16>
    %c0_16 = arith.constant 0 : index
    %c128 = arith.constant 128 : index
    %16 = vector.load %arg19[%c0_16, %c128] : memref<16x384xbf16, #tpu.memory_space<vmem>>, vector<16x128xbf16>
    tpu.vector_store %arg19[%c0_16, %c128], %15 {strides = array<i32>} : memref<16x384xbf16, #tpu.memory_space<vmem>>, vector<16x128xbf16>,
    %c0_17 = arith.constant 0 : index
    %c127 = arith.constant 127 : index
    %17 = vector.load %arg19[%c0_17, %c127] : memref<16x384xbf16, #tpu.memory_space<vmem>>, vector<16x128xbf16>
    %c0_18 = arith.constant 0 : index
    %c128_19 = arith.constant 128 : index
    %18 = vector.load %arg19[%c0_18, %c128_19] : memref<16x384xbf16, #tpu.memory_space<vmem>>, vector<16x128xbf16>
    %c0_20 = arith.constant 0 : index
    %c129 = arith.constant 129 : index
    %19 = vector.load %arg19[%c0_20, %c129] : memref<16x384xbf16, #tpu.memory_space<vmem>>, vector<16x128xbf16>
    %20 = tpu.concatenate %17, %18, %19 in 0 : vector<16x128xbf16>, vector<16x128xbf16>, vector<16x128xbf16> -> vector<48x128xbf16>
    %c0_21 = arith.constant 0 : index
    %c0_22 = arith.constant 0 : index
    %c0_23 = arith.constant 0 : index
    %21 = vector.load %arg6[%c0_21, %c0_22, %c0_23] : memref<3x32x48xbf16, #tpu.memory_space<vmem>>, vector<1x32x48xbf16>
    %22 = vector.shape_cast %21 : vector<1x32x48xbf16> to vector<32x48xbf16>
    %cst_24 = arith.constant dense<0.000000e+00> : vector<32x128xf32>
    %23 = tpu.matmul %22, %20, %cst_24 {dimension_numbers = #tpu.dot_dimension_numbers<[1], [0], [0], [1], [0, 0, 1, 1], [], []>} : vector<32x48xbf16>, vector<48x128xbf16>, vector<32x128xf32> -> vector<32x128xf32>
    %c0_25 = arith.constant 0 : index
    %c0_26 = arith.constant 0 : index
    %c0_27 = arith.constant 0 : index
    %24 = vector.load %arg7[%c0_25, %c0_26, %c0_27] : memref<3x32x64xbf16, #tpu.memory_space<vmem>>, vector<1x32x64xbf16>
    %25 = vector.shape_cast %24 : vector<1x32x64xbf16> to vector<32x64xbf16>
    %cst_28 = arith.constant dense<0.000000e+00> : vector<32x128xf32>
    %26 = tpu.matmul %25, %6, %cst_28 {dimension_numbers = #tpu.dot_dimension_numbers<[1], [0], [0], [1], [0, 0, 1, 1], [], []>} : vector<32x64xbf16>, vector<64x128xbf16>, vector<32x128xf32> -> vector<32x128xf32>
    %27 = arith.addf %23, %26 : vector<32x128xf32>
    %c0_29 = arith.constant 0 : index
    %c0_30 = arith.constant 0 : index
    %c0_31 = arith.constant 0 : index
    %28 = vector.load %arg8[%c0_29, %c0_30, %c0_31] : memref<3x32x1xf32, #tpu.memory_space<vmem>>, vector<1x32x1xf32>
    %29 = vector.shape_cast %28 : vector<1x32x1xf32> to vector<32x1xf32>
    %30 = vector.broadcast %29 : vector<32x1xf32> to vector<32x128xf32>
    %31 = arith.addf %27, %30 : vector<32x128xf32>
    %32 = vector.extract_strided_slice %31 {offsets = [0, 0], sizes = [16, 128], strides = [1, 1]} : vector<32x128xf32> to vector<16x128xf32>
    %33 = math.tanh %32 : vector<16x128xf32>
    %34 = vector.extract_strided_slice %31 {offsets = [16, 0], sizes = [16, 128], strides = [1, 1]} : vector<32x128xf32> to vector<16x128xf32>
    %35 = arith.negf %34 : vector<16x128xf32>
    %36 = math.exp %35 : vector<16x128xf32>
    %cst_32 = arith.constant 1.000000e+00 : f32
    %37 = vector.broadcast %cst_32 : f32 to vector<16x128xf32>
    %38 = arith.addf %37, %36 : vector<16x128xf32>
    %39 = arith.divf %37, %38 : vector<16x128xf32>
    %40 = arith.mulf %33, %39 : vector<16x128xf32>
    %41 = arith.truncf %40 : vector<16x128xf32> to vector<16x128xbf16>
    %c0_33 = arith.constant 0 : index
    %c0_34 = arith.constant 0 : index
    %c0_35 = arith.constant 0 : index
    %42 = vector.load %arg9[%c0_33, %c0_34, %c0_35] : memref<3x16x16xbf16, #tpu.memory_space<vmem>>, vector<1x16x16xbf16>
    %43 = vector.shape_cast %42 : vector<1x16x16xbf16> to vector<16x16xbf16>
    %cst_36 = arith.constant dense<0.000000e+00> : vector<16x128xf32>
    %44 = tpu.matmul %43, %41, %cst_36 {dimension_numbers = #tpu.dot_dimension_numbers<[1], [0], [0], [1], [0, 0, 1, 1], [], []>} : vector<16x16xbf16>, vector<16x128xbf16>, vector<16x128xf32> -> vector<16x128xf32>
    %45 = arith.addf %11, %44 : vector<16x128xf32>
    %c0_37 = arith.constant 0 : index
    %c0_38 = arith.constant 0 : index
    %c0_39 = arith.constant 0 : index
    %46 = vector.load %arg10[%c0_37, %c0_38, %c0_39] : memref<3x16x1xf32, #tpu.memory_space<vmem>>, vector<1x16x1xf32>
    %47 = vector.shape_cast %46 : vector<1x16x1xf32> to vector<16x1xf32>
    %48 = vector.broadcast %47 : vector<16x1xf32> to vector<16x128xf32>
    %49 = arith.addf %45, %48 : vector<16x128xf32>
    %c0_40 = arith.constant 0 : index
    %c0_41 = arith.constant 0 : index
    %c0_42 = arith.constant 0 : index
    %50 = vector.load %arg11[%c0_40, %c0_41, %c0_42] : memref<3x16x16xbf16, #tpu.memory_space<vmem>>, vector<1x16x16xbf16>
    %51 = vector.shape_cast %50 : vector<1x16x16xbf16> to vector<16x16xbf16>
    %cst_43 = arith.constant dense<0.000000e+00> : vector<16x128xf32>
    %52 = tpu.matmul %51, %41, %cst_43 {dimension_numbers = #tpu.dot_dimension_numbers<[1], [0], [0], [1], [0, 0, 1, 1], [], []>} : vector<16x16xbf16>, vector<16x128xbf16>, vector<16x128xf32> -> vector<16x128xf32>
    %53 = arith.addf %12, %52 : vector<16x128xf32>
    %c0_44 = arith.constant 0 : index
    %c0_45 = arith.constant 0 : index
    %c0_46 = arith.constant 0 : index
    %54 = vector.load %arg12[%c0_44, %c0_45, %c0_46] : memref<3x16x1xf32, #tpu.memory_space<vmem>>, vector<1x16x1xf32>
    %55 = vector.shape_cast %54 : vector<1x16x1xf32> to vector<16x1xf32>
    %56 = vector.broadcast %55 : vector<16x1xf32> to vector<16x128xf32>
    %57 = arith.addf %53, %56 : vector<16x128xf32>
    %58 = arith.truncf %49 : vector<16x128xf32> to vector<16x128xbf16>
    %c0_47 = arith.constant 0 : index
    %c128_48 = arith.constant 128 : index
    %59 = vector.load %arg19[%c0_47, %c128_48] : memref<16x384xbf16, #tpu.memory_space<vmem>>, vector<16x128xbf16>
    tpu.vector_store %arg19[%c0_47, %c128_48], %58 {strides = array<i32>} : memref<16x384xbf16, #tpu.memory_space<vmem>>, vector<16x128xbf16>,
    %c0_49 = arith.constant 0 : index
    %c126 = arith.constant 126 : index
    %60 = vector.load %arg19[%c0_49, %c126] : memref<16x384xbf16, #tpu.memory_space<vmem>>, vector<16x128xbf16>
    %c0_50 = arith.constant 0 : index
    %c128_51 = arith.constant 128 : index
    %61 = vector.load %arg19[%c0_50, %c128_51] : memref<16x384xbf16, #tpu.memory_space<vmem>>, vector<16x128xbf16>
    %c0_52 = arith.constant 0 : index
    %c130 = arith.constant 130 : index
    %62 = vector.load %arg19[%c0_52, %c130] : memref<16x384xbf16, #tpu.memory_space<vmem>>, vector<16x128xbf16>
    %63 = tpu.concatenate %60, %61, %62 in 0 : vector<16x128xbf16>, vector<16x128xbf16>, vector<16x128xbf16> -> vector<48x128xbf16>
    %c1 = arith.constant 1 : index
    %c0_53 = arith.constant 0 : index
    %c0_54 = arith.constant 0 : index
    %64 = vector.load %arg6[%c1, %c0_53, %c0_54] : memref<3x32x48xbf16, #tpu.memory_space<vmem>>, vector<1x32x48xbf16>
    %65 = vector.shape_cast %64 : vector<1x32x48xbf16> to vector<32x48xbf16>
    %cst_55 = arith.constant dense<0.000000e+00> : vector<32x128xf32>
    %66 = tpu.matmul %65, %63, %cst_55 {dimension_numbers = #tpu.dot_dimension_numbers<[1], [0], [0], [1], [0, 0, 1, 1], [], []>} : vector<32x48xbf16>, vector<48x128xbf16>, vector<32x128xf32> -> vector<32x128xf32>
    %c1_56 = arith.constant 1 : index
    %c0_57 = arith.constant 0 : index
    %c0_58 = arith.constant 0 : index
    %67 = vector.load %arg7[%c1_56, %c0_57, %c0_58] : memref<3x32x64xbf16, #tpu.memory_space<vmem>>, vector<1x32x64xbf16>
    %68 = vector.shape_cast %67 : vector<1x32x64xbf16> to vector<32x64xbf16>
    %cst_59 = arith.constant dense<0.000000e+00> : vector<32x128xf32>
    %69 = tpu.matmul %68, %6, %cst_59 {dimension_numbers = #tpu.dot_dimension_numbers<[1], [0], [0], [1], [0, 0, 1, 1], [], []>} : vector<32x64xbf16>, vector<64x128xbf16>, vector<32x128xf32> -> vector<32x128xf32>
    %70 = arith.addf %66, %69 : vector<32x128xf32>
    %c1_60 = arith.constant 1 : index
    %c0_61 = arith.constant 0 : index
    %c0_62 = arith.constant 0 : index
    %71 = vector.load %arg8[%c1_60, %c0_61, %c0_62] : memref<3x32x1xf32, #tpu.memory_space<vmem>>, vector<1x32x1xf32>
    %72 = vector.shape_cast %71 : vector<1x32x1xf32> to vector<32x1xf32>
    %73 = vector.broadcast %72 : vector<32x1xf32> to vector<32x128xf32>
    %74 = arith.addf %70, %73 : vector<32x128xf32>
    %75 = vector.extract_strided_slice %74 {offsets = [0, 0], sizes = [16, 128], strides = [1, 1]} : vector<32x128xf32> to vector<16x128xf32>
    %76 = math.tanh %75 : vector<16x128xf32>
    %77 = vector.extract_strided_slice %74 {offsets = [16, 0], sizes = [16, 128], strides = [1, 1]} : vector<32x128xf32> to vector<16x128xf32>
    %78 = arith.negf %77 : vector<16x128xf32>
    %79 = math.exp %78 : vector<16x128xf32>
    %cst_63 = arith.constant 1.000000e+00 : f32
    %80 = vector.broadcast %cst_63 : f32 to vector<16x128xf32>
    %81 = arith.addf %80, %79 : vector<16x128xf32>
    %82 = arith.divf %80, %81 : vector<16x128xf32>
    %83 = arith.mulf %76, %82 : vector<16x128xf32>
    %84 = arith.truncf %83 : vector<16x128xf32> to vector<16x128xbf16>
    %c1_64 = arith.constant 1 : index
    %c0_65 = arith.constant 0 : index
    %c0_66 = arith.constant 0 : index
    %85 = vector.load %arg9[%c1_64, %c0_65, %c0_66] : memref<3x16x16xbf16, #tpu.memory_space<vmem>>, vector<1x16x16xbf16>
    %86 = vector.shape_cast %85 : vector<1x16x16xbf16> to vector<16x16xbf16>
    %cst_67 = arith.constant dense<0.000000e+00> : vector<16x128xf32>
    %87 = tpu.matmul %86, %84, %cst_67 {dimension_numbers = #tpu.dot_dimension_numbers<[1], [0], [0], [1], [0, 0, 1, 1], [], []>} : vector<16x16xbf16>, vector<16x128xbf16>, vector<16x128xf32> -> vector<16x128xf32>
    %88 = arith.addf %49, %87 : vector<16x128xf32>
    %c1_68 = arith.constant 1 : index
    %c0_69 = arith.constant 0 : index
    %c0_70 = arith.constant 0 : index
    %89 = vector.load %arg10[%c1_68, %c0_69, %c0_70] : memref<3x16x1xf32, #tpu.memory_space<vmem>>, vector<1x16x1xf32>
    %90 = vector.shape_cast %89 : vector<1x16x1xf32> to vector<16x1xf32>
    %91 = vector.broadcast %90 : vector<16x1xf32> to vector<16x128xf32>
    %92 = arith.addf %88, %91 : vector<16x128xf32>
    %c1_71 = arith.constant 1 : index
    %c0_72 = arith.constant 0 : index
    %c0_73 = arith.constant 0 : index
    %93 = vector.load %arg11[%c1_71, %c0_72, %c0_73] : memref<3x16x16xbf16, #tpu.memory_space<vmem>>, vector<1x16x16xbf16>
    %94 = vector.shape_cast %93 : vector<1x16x16xbf16> to vector<16x16xbf16>
    %cst_74 = arith.constant dense<0.000000e+00> : vector<16x128xf32>
    %95 = tpu.matmul %94, %84, %cst_74 {dimension_numbers = #tpu.dot_dimension_numbers<[1], [0], [0], [1], [0, 0, 1, 1], [], []>} : vector<16x16xbf16>, vector<16x128xbf16>, vector<16x128xf32> -> vector<16x128xf32>
    %96 = arith.addf %57, %95 : vector<16x128xf32>
    %c1_75 = arith.constant 1 : index
    %c0_76 = arith.constant 0 : index
    %c0_77 = arith.constant 0 : index
    %97 = vector.load %arg12[%c1_75, %c0_76, %c0_77] : memref<3x16x1xf32, #tpu.memory_space<vmem>>, vector<1x16x1xf32>
    %98 = vector.shape_cast %97 : vector<1x16x1xf32> to vector<16x1xf32>
    %99 = vector.broadcast %98 : vector<16x1xf32> to vector<16x128xf32>
    %100 = arith.addf %96, %99 : vector<16x128xf32>
    %101 = arith.truncf %92 : vector<16x128xf32> to vector<16x128xbf16>
    %c0_78 = arith.constant 0 : index
    %c128_79 = arith.constant 128 : index
    %102 = vector.load %arg19[%c0_78, %c128_79] : memref<16x384xbf16, #tpu.memory_space<vmem>>, vector<16x128xbf16>
    tpu.vector_store %arg19[%c0_78, %c128_79], %101 {strides = array<i32>} : memref<16x384xbf16, #tpu.memory_space<vmem>>, vector<16x128xbf16>,
    %c0_80 = arith.constant 0 : index
    %c124 = arith.constant 124 : index
    %103 = vector.load %arg19[%c0_80, %c124] : memref<16x384xbf16, #tpu.memory_space<vmem>>, vector<16x128xbf16>
    %c0_81 = arith.constant 0 : index
    %c128_82 = arith.constant 128 : index
    %104 = vector.load %arg19[%c0_81, %c128_82] : memref<16x384xbf16, #tpu.memory_space<vmem>>, vector<16x128xbf16>
    %c0_83 = arith.constant 0 : index
    %c132 = arith.constant 132 : index
    %105 = vector.load %arg19[%c0_83, %c132] : memref<16x384xbf16, #tpu.memory_space<vmem>>, vector<16x128xbf16>
    %106 = tpu.concatenate %103, %104, %105 in 0 : vector<16x128xbf16>, vector<16x128xbf16>, vector<16x128xbf16> -> vector<48x128xbf16>
    %c2 = arith.constant 2 : index
    %c0_84 = arith.constant 0 : index
    %c0_85 = arith.constant 0 : index
    %107 = vector.load %arg6[%c2, %c0_84, %c0_85] : memref<3x32x48xbf16, #tpu.memory_space<vmem>>, vector<1x32x48xbf16>
    %108 = vector.shape_cast %107 : vector<1x32x48xbf16> to vector<32x48xbf16>
    %cst_86 = arith.constant dense<0.000000e+00> : vector<32x128xf32>
    %109 = tpu.matmul %108, %106, %cst_86 {dimension_numbers = #tpu.dot_dimension_numbers<[1], [0], [0], [1], [0, 0, 1, 1], [], []>} : vector<32x48xbf16>, vector<48x128xbf16>, vector<32x128xf32> -> vector<32x128xf32>
    %c2_87 = arith.constant 2 : index
    %c0_88 = arith.constant 0 : index
    %c0_89 = arith.constant 0 : index
    %110 = vector.load %arg7[%c2_87, %c0_88, %c0_89] : memref<3x32x64xbf16, #tpu.memory_space<vmem>>, vector<1x32x64xbf16>
    %111 = vector.shape_cast %110 : vector<1x32x64xbf16> to vector<32x64xbf16>
    %cst_90 = arith.constant dense<0.000000e+00> : vector<32x128xf32>
    %112 = tpu.matmul %111, %6, %cst_90 {dimension_numbers = #tpu.dot_dimension_numbers<[1], [0], [0], [1], [0, 0, 1, 1], [], []>} : vector<32x64xbf16>, vector<64x128xbf16>, vector<32x128xf32> -> vector<32x128xf32>
    %113 = arith.addf %109, %112 : vector<32x128xf32>
    %c2_91 = arith.constant 2 : index
    %c0_92 = arith.constant 0 : index
    %c0_93 = arith.constant 0 : index
    %114 = vector.load %arg8[%c2_91, %c0_92, %c0_93] : memref<3x32x1xf32, #tpu.memory_space<vmem>>, vector<1x32x1xf32>
    %115 = vector.shape_cast %114 : vector<1x32x1xf32> to vector<32x1xf32>
    %116 = vector.broadcast %115 : vector<32x1xf32> to vector<32x128xf32>
    %117 = arith.addf %113, %116 : vector<32x128xf32>
    %118 = vector.extract_strided_slice %117 {offsets = [0, 0], sizes = [16, 128], strides = [1, 1]} : vector<32x128xf32> to vector<16x128xf32>
    %119 = math.tanh %118 : vector<16x128xf32>
    %120 = vector.extract_strided_slice %117 {offsets = [16, 0], sizes = [16, 128], strides = [1, 1]} : vector<32x128xf32> to vector<16x128xf32>
    %121 = arith.negf %120 : vector<16x128xf32>
    %122 = math.exp %121 : vector<16x128xf32>
    %cst_94 = arith.constant 1.000000e+00 : f32
    %123 = vector.broadcast %cst_94 : f32 to vector<16x128xf32>
    %124 = arith.addf %123, %122 : vector<16x128xf32>
    %125 = arith.divf %123, %124 : vector<16x128xf32>
    %126 = arith.mulf %119, %125 : vector<16x128xf32>
    %127 = arith.truncf %126 : vector<16x128xf32> to vector<16x128xbf16>
    %c2_95 = arith.constant 2 : index
    %c0_96 = arith.constant 0 : index
    %c0_97 = arith.constant 0 : index
    %128 = vector.load %arg11[%c2_95, %c0_96, %c0_97] : memref<3x16x16xbf16, #tpu.memory_space<vmem>>, vector<1x16x16xbf16>
    %129 = vector.shape_cast %128 : vector<1x16x16xbf16> to vector<16x16xbf16>
    %cst_98 = arith.constant dense<0.000000e+00> : vector<16x128xf32>
    %130 = tpu.matmul %129, %127, %cst_98 {dimension_numbers = #tpu.dot_dimension_numbers<[1], [0], [0], [1], [0, 0, 1, 1], [], []>} : vector<16x16xbf16>, vector<16x128xbf16>, vector<16x128xf32> -> vector<16x128xf32>
    %131 = arith.addf %100, %130 : vector<16x128xf32>
    %c2_99 = arith.constant 2 : index
    %c0_100 = arith.constant 0 : index
    %c0_101 = arith.constant 0 : index
    %132 = vector.load %arg12[%c2_99, %c0_100, %c0_101] : memref<3x16x1xf32, #tpu.memory_space<vmem>>, vector<1x16x1xf32>
    %133 = vector.shape_cast %132 : vector<1x16x1xf32> to vector<16x1xf32>
    %134 = vector.broadcast %133 : vector<16x1xf32> to vector<16x128xf32>
    %135 = arith.addf %131, %134 : vector<16x128xf32>
    %136 = arith.truncf %135 : vector<16x128xf32> to vector<16x128xbf16>
    %c0_102 = arith.constant 0 : index
    %c0_103 = arith.constant 0 : index
    %137 = vector.load %arg13[%c0_102, %c0_103] : memref<6x16xbf16, #tpu.memory_space<vmem>>, vector<6x16xbf16>
    %cst_104 = arith.constant dense<0.000000e+00> : vector<6x128xf32>
    %138 = tpu.matmul %137, %136, %cst_104 {dimension_numbers = #tpu.dot_dimension_numbers<[1], [0], [0], [1], [0, 0, 1, 1], [], []>} : vector<6x16xbf16>, vector<16x128xbf16>, vector<6x128xf32> -> vector<6x128xf32>
    %c0_105 = arith.constant 0 : index
    %c0_106 = arith.constant 0 : index
    %139 = vector.load %arg14[%c0_105, %c0_106] : memref<6x1xf32, #tpu.memory_space<vmem>>, vector<6x1xf32>
    %140 = vector.broadcast %139 : vector<6x1xf32> to vector<6x128xf32>
    %141 = arith.addf %138, %140 : vector<6x128xf32>
    %c0_107 = arith.constant 0 : index
    %c0_108 = arith.constant 0 : index
    %142 = vector.load %arg15[%c0_107, %c0_108] : memref<6x16xbf16, #tpu.memory_space<vmem>>, vector<6x16xbf16>
    %cst_109 = arith.constant dense<0.000000e+00> : vector<6x128xf32>
    %143 = tpu.matmul %142, %136, %cst_109 {dimension_numbers = #tpu.dot_dimension_numbers<[1], [0], [0], [1], [0, 0, 1, 1], [], []>} : vector<6x16xbf16>, vector<16x128xbf16>, vector<6x128xf32> -> vector<6x128xf32>
    %c0_110 = arith.constant 0 : index
    %c0_111 = arith.constant 0 : index
    %144 = vector.load %arg16[%c0_110, %c0_111] : memref<6x1xf32, #tpu.memory_space<vmem>>, vector<6x1xf32>
    %145 = vector.broadcast %144 : vector<6x1xf32> to vector<6x128xf32>
    %146 = arith.addf %143, %145 : vector<6x128xf32>
    %147 = math.exp %146 : vector<6x128xf32>
    %148 = arith.mulf %147, %3 : vector<6x128xf32>
    %149 = arith.addf %148, %141 : vector<6x128xf32>
    %c0_112 = arith.constant 0 : index
    %c0_113 = arith.constant 0 : index
    %c0_114 = arith.constant 0 : index
    %150 = vector.load %arg17[%c0_112, %c0_113, %c0_114] : memref<1x6x128xf32, #tpu.memory_space<vmem>>, vector<1x6x128xf32>
    %151 = vector.shape_cast %150 : vector<1x6x128xf32> to vector<6x128xf32>
    %152 = vector.shape_cast %149 : vector<6x128xf32> to vector<1x6x128xf32>
    tpu.vector_store %arg17[%c0_112, %c0_113, %c0_114], %152 {strides = array<i32>} : memref<1x6x128xf32, #tpu.memory_space<vmem>>, vector<1x6x128xf32>,
    %153 = vector.shape_cast %146 : vector<6x128xf32> to vector<1x6x128xf32>
    %cst_115 = arith.constant dense<0.000000e+00> : vector<1xf32>
    %154 = vector.multi_reduction <add>, %153, %cst_115 [1, 2] : vector<1x6x128xf32> to vector<1xf32>
    %155 = vector.shape_cast %154 : vector<1xf32> to vector<1x1x1xf32>
    %156 = vector.extract %155[0, 0, 0] : f32 from vector<1x1x1xf32>
    %157 = vector.broadcast %156 : f32 to vector<1x1x1xf32>
    %c0_116 = arith.constant 0 : index
    %c0_117 = arith.constant 0 : index
    %c0_118 = arith.constant 0 : index
    %158 = vector.load %arg18[%c0_116, %c0_117, %c0_118] : memref<1x1x1xf32, #tpu.memory_space<vmem>>, vector<1x1x1xf32>
    tpu.vector_store %arg18[%c0_116, %c0_117, %c0_118], %157 {strides = array<i32>} : memref<1x1x1xf32, #tpu.memory_space<vmem>>, vector<1x1x1xf32>,
    return
  }
  func.func @transform_0(%arg0: i32) -> (i32, i32, i32) {
    %c0_i32 = arith.constant 0 : i32
    %c0_i32_0 = arith.constant 0 : i32
    %c0_i32_1 = arith.constant 0 : i32
    return %arg0, %c0_i32, %c0_i32_0 : i32, i32, i32
  }
  func.func @transform_1(%arg0: i32) -> (i32, i32, i32) {
    %c0_i32 = arith.constant 0 : i32
    %c0_i32_0 = arith.constant 0 : i32
    %c0_i32_1 = arith.constant 0 : i32
    return %arg0, %c0_i32, %c0_i32_0 : i32, i32, i32
  }
  func.func @transform_2(%arg0: i32) -> (i32, i32) {
    %c0_i32 = arith.constant 0 : i32
    %c0_i32_0 = arith.constant 0 : i32
    %c0_i32_1 = arith.constant 0 : i32
    return %c0_i32, %c0_i32_0 : i32, i32
  }
  func.func @transform_3(%arg0: i32) -> (i32, i32) {
    %c0_i32 = arith.constant 0 : i32
    %c0_i32_0 = arith.constant 0 : i32
    %c0_i32_1 = arith.constant 0 : i32
    return %c0_i32, %c0_i32_0 : i32, i32
  }
  func.func @transform_4(%arg0: i32) -> (i32, i32) {
    %c0_i32 = arith.constant 0 : i32
    %c0_i32_0 = arith.constant 0 : i32
    %c0_i32_1 = arith.constant 0 : i32
    return %c0_i32, %c0_i32_0 : i32, i32
  }
  func.func @transform_5(%arg0: i32) -> (i32, i32, i32) {
    %c0_i32 = arith.constant 0 : i32
    %c0_i32_0 = arith.constant 0 : i32
    %c0_i32_1 = arith.constant 0 : i32
    %c0_i32_2 = arith.constant 0 : i32
    return %c0_i32, %c0_i32_0, %c0_i32_1 : i32, i32, i32
  }
  func.func @transform_6(%arg0: i32) -> (i32, i32, i32) {
    %c0_i32 = arith.constant 0 : i32
    %c0_i32_0 = arith.constant 0 : i32
    %c0_i32_1 = arith.constant 0 : i32
    %c0_i32_2 = arith.constant 0 : i32
    return %c0_i32, %c0_i32_0, %c0_i32_1 : i32, i32, i32
  }
  func.func @transform_7(%arg0: i32) -> (i32, i32, i32) {
    %c0_i32 = arith.constant 0 : i32
    %c0_i32_0 = arith.constant 0 : i32
    %c0_i32_1 = arith.constant 0 : i32
    %c0_i32_2 = arith.constant 0 : i32
    return %c0_i32, %c0_i32_0, %c0_i32_1 : i32, i32, i32
  }
  func.func @transform_8(%arg0: i32) -> (i32, i32, i32) {
    %c0_i32 = arith.constant 0 : i32
    %c0_i32_0 = arith.constant 0 : i32
    %c0_i32_1 = arith.constant 0 : i32
    %c0_i32_2 = arith.constant 0 : i32
    return %c0_i32, %c0_i32_0, %c0_i32_1 : i32, i32, i32
  }
  func.func @transform_9(%arg0: i32) -> (i32, i32, i32) {
    %c0_i32 = arith.constant 0 : i32
    %c0_i32_0 = arith.constant 0 : i32
    %c0_i32_1 = arith.constant 0 : i32
    %c0_i32_2 = arith.constant 0 : i32
    return %c0_i32, %c0_i32_0, %c0_i32_1 : i32, i32, i32
  }
  func.func @transform_10(%arg0: i32) -> (i32, i32, i32) {
    %c0_i32 = arith.constant 0 : i32
    %c0_i32_0 = arith.constant 0 : i32
    %c0_i32_1 = arith.constant 0 : i32
    %c0_i32_2 = arith.constant 0 : i32
    return %c0_i32, %c0_i32_0, %c0_i32_1 : i32, i32, i32
  }
  func.func @transform_11(%arg0: i32) -> (i32, i32, i32) {
    %c0_i32 = arith.constant 0 : i32
    %c0_i32_0 = arith.constant 0 : i32
    %c0_i32_1 = arith.constant 0 : i32
    %c0_i32_2 = arith.constant 0 : i32
    return %c0_i32, %c0_i32_0, %c0_i32_1 : i32, i32, i32
  }
  func.func @transform_12(%arg0: i32) -> (i32, i32) {
    %c0_i32 = arith.constant 0 : i32
    %c0_i32_0 = arith.constant 0 : i32
    %c0_i32_1 = arith.constant 0 : i32
    return %c0_i32, %c0_i32_0 : i32, i32
  }
  func.func @transform_13(%arg0: i32) -> (i32, i32) {
    %c0_i32 = arith.constant 0 : i32
    %c0_i32_0 = arith.constant 0 : i32
    %c0_i32_1 = arith.constant 0 : i32
    return %c0_i32, %c0_i32_0 : i32, i32
  }
  func.func @transform_14(%arg0: i32) -> (i32, i32) {
    %c0_i32 = arith.constant 0 : i32
    %c0_i32_0 = arith.constant 0 : i32
    %c0_i32_1 = arith.constant 0 : i32
    return %c0_i32, %c0_i32_0 : i32, i32
  }
  func.func @transform_15(%arg0: i32) -> (i32, i32) {
    %c0_i32 = arith.constant 0 : i32
    %c0_i32_0 = arith.constant 0 : i32
    %c0_i32_1 = arith.constant 0 : i32
    return %c0_i32, %c0_i32_0 : i32, i32
  }
  func.func @transform_16(%arg0: i32) -> (i32, i32, i32) {
    %c0_i32 = arith.constant 0 : i32
    %c0_i32_0 = arith.constant 0 : i32
    %c0_i32_1 = arith.constant 0 : i32
    return %arg0, %c0_i32, %c0_i32_0 : i32, i32, i32
  }
  func.func @transform_17(%arg0: i32) -> (i32, i32, i32) {
    %c0_i32 = arith.constant 0 : i32
    %c0_i32_0 = arith.constant 0 : i32
    %c0_i32_1 = arith.constant 0 : i32
    return %arg0, %c0_i32, %c0_i32_0 : i32, i32, i32
  }
}

</mosaic_0001>

<bundles_post_ra>
// kernel: _lambda_.5
= control target key start
LH: loop header
LB: loop body
LE: loop exit
PB: predicated region body
PF: predicated region fallthrough
CT: control target
= control target key end

     0   :  { %8 = vsyncpa [#allocation3], 0  ;;  %s1073_s0 = inlined_call_operand.hbm [shape: bf16[2,16,257], index: 0, kind: input, shape index: {}]   ;;  %s1074_s1 = inlined_call_operand.hbm [shape: bf16[32,16], index: 1, kind: input, shape index: {}]   ;;  %s1075_s2 = inlined_call_operand.hbm [shape: f32[32,1], index: 2, kind: input, shape index: {}]   ;;  %s1076_s3 = inlined_call_operand.hbm [shape: f32[2,32,257], index: 3, kind: output, shape index: {}]  }
   0x1   :  { %10 = vsyncpa [#allocation3 + $0x1], 0 }
   0x2   :  { %11 = vsyncpa [#allocation6], 0 }
   0x3   :  { %12 = vsyncpa [#allocation4], 0 }
   0x4   :  { %14 = vsyncpa [#allocation4 + $0x1], 0  ;;  %s815_s12 = smov 0   ;;  %s817_s13 = smov 0  }
   0x5   :  { %s819_s14 = smov 0   ;;  %s821_s15 = smov 0  }
   0x6 LB: > { %s836_s16 = sadd.s32 4294967295, %s780_s15   ;;  %s505_s17 = sadd.s32 4294967294, %s780_s15   ;;  %s780_s15 = sphi %s821_s15, %s1096_s15   ;;  %s776_s14 = sphi %s819_s14, %s1095_s14   ;;  %s772_s13 = sphi %s817_s13, %s1094_s13   ;;  %s768_s12 = sphi %s815_s12, %s1093_s12  }
   0x7   : > { %p40_p0 = scmp.ne.s32.totalorder %s772_s13, %s768_s12  ;;  %p1077_p1 = scmp.eq.s32.totalorder %s836_s16, 0 }
   0x8   : > { %p112_p3 = scmp.eq.s32.totalorder %s505_s17, 1  ;;  %p506_p5 = scmp.ge.s32.totalorder %s780_s15, 1 }
   0x9   : > { %p845_p4 = por %p1077_p1, %p40_p0  ;;  %p119_p7 = scmp.lt.s32.totalorder %s780_s15, 3 }
   0xa   : > { %p850_p6 = por %p112_p3, %p40_p0  ;;  %s782_s21 = smov [#allocation5]  }
   0xb   : > { %s1080_s18 = scalar_select %p845_p4, 1, 0 }
   0xc   : > { %s1081_s19 = scalar_select %p850_p6, 1, 0 }
   0xd   : > { %p855_p8 = pnand %p506_p5, %p119_p7  ;;  %s131_s22 = sshll.u32 %s782_s21, 4  ;;  %s859_s22 = int_to_ptr.vmem [resolvable:$true] %s131_s22 }
   0xe   : > { %s783_s24 = smov [#allocation7]   ;;  %s624_s28 = scalar_lea.hbm %s1074_s1, 256 }
   0xf   : > { %p552_p9 = pneg %p855_p8  ;;  %s144_s25 = sshll.u32 %s783_s24, 4  ;;  %s870_s25 = int_to_ptr.vmem [resolvable:$true] %s144_s25 }
  0x10   : > { %p625_p12 = scmp.ne.s32.totalorder %s1074_s1, %s624_s28  ;;  %p631_p5 = scmp.lt.u32.totalorder %s624_s28, %s1074_s1 }
  0x11   : > { %p866_p11 = pnand %p552_p9, %p1077_p1 }
  0x13   : > { %p626_p13 = pneg %p866_p11 }
  0x15   : > { %p627_p0 = pnand %p626_p13, %p625_p12 }
  0x17   : > { %p628_p3 = pneg %p627_p0 }
  0x19   : > { %p633_p7 = pnand %p631_p5, %p628_p3 }
  0x1b   : > { %636 = shalt.err (!%p633_p7)
}
  0x1c   : > { %s637_s6 = scalar_lea.vmem %s859_s22, 256  ;;  %p645_p2 = scmp.lt.s32.totalorder %s859_s22, %s859_s22 }
  0x1d   : > { %p638_p9 = scmp.ne.s32.totalorder %s859_s22, %s637_s6  ;;  %p646_p12 = scmp.lt.s32.totalorder %s637_s6, %s637_s6 }
  0x1f   : > { %p640_p10 = pnand %p638_p9, %p626_p13  ;;  %p647_p0 = por %p646_p12, %p645_p2 }
  0x21   : > { %p641_p1 = pneg %p640_p10 }
  0x23   : > { %p648_p6 = pnand %p647_p0, %p641_p1 }
  0x25   : > { %651 = shalt.err (!%p648_p6)
}
  0x26   : > { %s784_s7 = smov 64   ;;  %s785_s8 = smov 4  }
  0x27   : > { %555 = dma.hbm_to_vmem [thread:$0]  (!%p866_p11), %s1074_s1, 256, %s859_s22, [#allocation6], %s784_s7, %s784_s7, %s785_s8  }
  0x28   : > { %s652_s21 = scalar_lea.hbm %s1075_s2, 512 }
  0x29   : > { %p653_p2 = scmp.ne.s32.totalorder %s1075_s2, %s652_s21  ;;  %p659_p10 = scmp.lt.u32.totalorder %s652_s21, %s1075_s2 }
  0x2b   : > { %p655_p1 = pnand %p653_p2, %p626_p13 }
  0x2d   : > { %p656_p6 = pneg %p655_p1 }
  0x2f   : > { %p661_p3 = pnand %p659_p10, %p656_p6 }
  0x31   : > { %664 = shalt.err (!%p661_p3)
}
  0x32   : > { %s665_s22 = scalar_lea.vmem %s870_s25, 512  ;;  %p673_p12 = scmp.lt.s32.totalorder %s870_s25, %s870_s25 }
  0x33   : > { %p666_p5 = scmp.ne.s32.totalorder %s870_s25, %s665_s22  ;;  %p674_p0 = scmp.lt.s32.totalorder %s665_s22, %s665_s22 }
  0x35   : > { %p668_p7 = pnand %p666_p5, %p626_p13  ;;  %p675_p2 = por %p674_p0, %p673_p12 }
  0x37   : > { %p669_p9 = pneg %p668_p7 }
  0x39   : > { %p676_p1 = pnand %p675_p2, %p669_p9 }
  0x3b   : > { %679 = shalt.err (!%p676_p1)
}
  0x3c   : > { %s786_s29 = smov 128   ;;  %s787_s30 = smov 8  }
  0x3d   : > { %558 = dma.hbm_to_vmem [thread:$0]  (!%p866_p11), %s1075_s2, 512, %s870_s25, [#allocation6], %s786_s29, %s786_s29, %s787_s30  }
  0x3e   : > { %s925_s6 = sadd.s32 1, %s780_s15   ;;  %s27_s8 = sadd.s32 1, %s776_s14 }
  0x3f   : > { %s24_s7 = ssub.s32 %s780_s15, %s925_s6  ;;  %p34_p6 = scmp.ne.s32.totalorder %s776_s14, %s772_s13 }
  0x40   : > { %p25_p13 = scmp.eq.s32.totalorder %s24_s7, 0  ;;  %p35_p10 = scmp.eq.s32.totalorder %s780_s15, 0 }
  0x41   : > { %p1084_p5 = scmp.eq.s32.totalorder %s836_s16, 1  ;;  %p569_p9 = scmp.lt.s32.totalorder %s780_s15, 2 }
  0x42   : > { %s934_s9 = scalar_select %p25_p13, %s776_s14, %s27_s8  }
  0x43   : > { %p36_p3 = por %p35_p10, %p34_p6  ;;  %p938_p7 = por %p1084_p5, %p34_p6 }
  0x44   : > { %s158_s23 = sand.u32 1, %s776_s14   ;;  %s536_s25 = smul.u32 384, %s780_s15 }
  0x45   : > { %s1085_s10 = scalar_select %p938_p7, 1, 0 }
  0x46   : > { %s535_s11 = smul.u32 24, %s158_s23  ;;  %p945_p11 = pnand %p569_p9, %p36_p3 }
  0x47   : > { %s952_s26 = scalar_lea.hbm %s1073_s0, %s536_s25  ;;  %s956_s22 = scalar_lea.sflag [#allocation3], %s158_s23 }
  0x48   : > { %s162_s27 = scalar_lea.vmem [#allocation2], %s535_s11  ;;  %s680_s29 = scalar_lea.hbm %s952_s26, 384 }
  0x49   : > { %s169_s28 = sshll.u32 %s162_s27, 4  ;;  %p681_p12 = scmp.ne.s32.totalorder %s952_s26, %s680_s29  ;;  %s954_s28 = int_to_ptr.vmem [resolvable:$true] %s169_s28 }
  0x4a   : > { %p682_p0 = pneg %p945_p11  ;;  %s685_s5 = scalar_lea.hbm %s1073_s0, 768 }
  0x4b   : > { %p686_p13 = scmp.lt.u32.totalorder %s952_s26, %s1073_s0  ;;  %p687_p6 = scmp.lt.u32.totalorder %s685_s5, %s680_s29 }
  0x4c   : > { %p683_p2 = pnand %p682_p0, %p681_p12  ;;  %p689_p3 = scmp.lt.u32.totalorder %s680_s29, %s952_s26 }
  0x4d   : > { %p688_p10 = por %p687_p6, %p686_p13 }
  0x4e   : > { %p684_p1 = pneg %p683_p2 }
  0x4f   : > { %p690_p5 = por %p689_p3, %p688_p10 }
  0x51   : > { %p691_p9 = pnand %p690_p5, %p684_p1 }
  0x53   : > { %694 = shalt.err (!%p691_p9)
}
  0x54   : > { %s695_s23 = scalar_lea.vmem %s954_s28, 384  ;;  %s788_s11 = smov [#allocation2]  }
  0x55   : > { %p696_p12 = scmp.ne.s32.totalorder %s954_s28, %s695_s23  ;;  %s700_s25 = sshll.u32 %s788_s11, 4  ;;  %s701_s25 = int_to_ptr.vmem [resolvable:$false] %s700_s25 }
  0x56   : > { %s702_s21 = scalar_lea.vmem %s701_s25, 768  ;;  %p703_p4 = scmp.lt.s32.totalorder %s954_s28, %s701_s25 }
  0x57   : > { %p698_p2 = pnand %p696_p12, %p682_p0  ;;  %p704_p13 = scmp.lt.s32.totalorder %s702_s21, %s695_s23 }
  0x59   : > { %p699_p7 = pneg %p698_p2  ;;  %p705_p6 = por %p704_p13, %p703_p4 }
  0x5b   : > { %p706_p10 = pnand %p705_p6, %p699_p7 }
  0x5d   : > { %709 = shalt.err (!%p706_p10)
}
  0x5e   : > { %s789_s24 = smov 192   ;;  %s790_s27 = smov 12  }
  0x5f   : > { %562 = dma.hbm_to_vmem [thread:$0]  (!%p945_p11), %s952_s26, 384, %s954_s28, %s956_s22, %s789_s24, %s789_s24, %s790_s27  }
  0x60   : > { %181 = sbr.rel (%p855_p8) target bundleno = 353 (0x161), region = 32  ;;  %s987_s29 = sand.u32 (!%p855_p8), 1, %s772_s13  }
  0x61   : > { %s537_s30 = smul.u32 (!%p855_p8), 24, %s987_s29  ;;  %s184_s4 = scalar_lea.sflag (!%p855_p8), [#allocation3], %s987_s29 }
  0x62   : > { %p1087_p4 = scmp.ne.s32.totalorder (!%p855_p8), %s1080_s18, 0 }
  0x63   : > { %s187_s5 = scalar_lea.vmem (!%p855_p8), [#allocation2], %s537_s30 }
  0x67   : > { %755 = dma.done.wait (%p1087_p4), %s184_s4, 384  }
  0x68   : > { %757 = vsyncadd (%p1087_p4), %s184_s4, 4294966912  ;;  %p1088_p7 = scmp.eq.s32.totalorder %s836_s16, 0 }
  0x6a   : > { %759 = dma.done.wait (%p1088_p7), [#allocation6], 768   ;;  %p1089_p11 = pmov %p1088_p7 }
  0x6b   : > { %v791_v0 = vmov 0   ;;  %v618_v1 = vld [vmem:[%s187_s5 + $0x4] ss:$12 sps:$4 sm:$0xff]   ;;  %v620_v2 = vld [vmem:[%s187_s5] ss:$12 sps:$4 sm:$0xff]   ;;  %vm277_vm0 = vcmask 130048  }
  0x6c   : > { %761 = vsyncadd (%p1089_p11), [#allocation6], 4294966528  ;;  %316 = vmatprep.mubr.bf16.mxu0 %v791_v0  ;;  %616 = vset.pattern.permute.xlu0 %v791_v0  ;;  %v621_v3 = vld [vmem:[#allocation5] sm:$0xff]   ;;  %v227_v5 = vld [vmem:[#allocation7] sm:$0xff]  ;;  %s538_s18 = smul.u32 96, %s987_s29  ;;  %vm388_vm1 = vcmask 7168  }
  0x6d   : > { %617 = vset.pattern.permute.xlu1 %v791_v0  ;;  %284 = vmatprep.subr.bf16.mxu0 %v618_v1  ;;  %v622_v4 = vld [vmem:[%s187_s5 + $0x8] ss:$12 sps:$4 sm:$0xff]   ;;  %v623_v6 = vld [vmem:[#allocation5 + $0x8] sm:$0xff]   ;;  %s539_s17 = smul.u32 1536, %s836_s16  ;;  %s400_s7 = scalar_lea.sflag [#allocation4], %s987_s29 }
  0x6e   : > { %285 = vmatpush1.bf16.msra.mxu0 %v620_v2  ;;  %531 = vmatprep.mubr.msk.bf16.mxu1 %vm277_vm0, %v621_v3  ;;  %v229_v7 = vld [vmem:[#allocation7 + $0x10] sm:$0xff]  ;;  %v228_v8 = vld [vmem:[#allocation7 + $0x8] sm:$0xff]  ;;  %v230_v9 = vld [vmem:[#allocation7 + $0x18] sm:$0xff]  ;;  %s1004_s20 = scalar_lea.vmem [#allocation8], %s538_s18  ;;  %p1090_p0 = scmp.ne.s32.totalorder %s1085_s10, 0 }
  0x6f   : > { %529 = vmatprep.subr.bf16.mxu1 %v622_v4  ;;  %233 = vperm.xlu0 %616, %v227_v5   ;;  %s413_s26 = sshll.u32 %s1004_s20, 4  ;;  %s1024_s16 = scalar_lea.hbm %s1076_s3, %s539_s17  ;;  %s1026_s26 = int_to_ptr.vmem [resolvable:$true] %s413_s26 }
  0x70   : > { %530 = vmatpush3.bf16.msra.mxu1 %v622_v4  ;;  %243 = vperm.xlu1 %617, %v229_v7   ;;  %s710_s8 = scalar_lea.vmem %s1026_s26, 1536  ;;  %s792_s23 = smov [#allocation8]  }
  0x71   : > { %519 = vmatmul.mubr.msk.bf16.vlgmr.msra.gmra.mrb[0].mxu0 %vm277_vm0, %v621_v3  ;;  %p711_p8 = scmp.ne.s32.totalorder %s1026_s26, %s710_s8  ;;  %s714_s11 = sshll.u32 %s792_s23, 4  ;;  %s715_s11 = int_to_ptr.vmem [resolvable:$false] %s714_s11 }
  0x72   : > { %326 = vmatprep.mubr.bf16.mxu0 %v791_v0  ;;  %s716_s25 = scalar_lea.vmem %s715_s11, 3072  ;;  %p717_p5 = scmp.lt.s32.totalorder %s1026_s26, %s715_s11 }
  0x73   : > { %532 = vmatmul.mubr.msk.bf16.vlgmr.msra.gmra.mrb[0].mxu1 %vm277_vm0, %v623_v6  ;;  %238 = vperm.xlu0 %616, %v228_v8   ;;  %p712_p1 = pnand %p711_p8, %p1090_p0  ;;  %p718_p9 = scmp.lt.s32.totalorder %s716_s25, %s710_s8 }
  0x74   : > { %248 = vperm.xlu1 %617, %v230_v9  }
  0x75   : > { %p713_p3 = pneg %p712_p1  ;;  %p719_p12 = por %p718_p9, %p717_p5 }
  0x77   : > { %p720_p2 = pnand %p719_p12, %p713_p3 }
  0x79   : > { %520 = vmatmul.mubr.msk.bf16.gmra.mrb[4].mxu0 %vm277_vm0, %v623_v6 }
  0xee   : > { %v234_v10 = vpop.permute.xlu0 %233 }
  0xef   : > { %v244_v11 = vpop.permute.xlu1 %243 }
  0xf2   : > { %v239_v13 = vpop.permute.xlu0 %238 }
  0xf3   : > { %v249_v18 = vpop.permute.xlu1 %248 }
 0x144   : > { %v318_v12 = vpop.f32.mrb[0].mxu0 }
 0x145   : > { %v319_v14 = vadd.f32 %v318_v12, %v234_v10  ;;  %v320_v15 = vpop.f32.mrb[1].mxu0 }
 0x146   : > { %v321_v16 = vadd.f32 %v320_v15, %v234_v10  ;;  %v322_v17 = vpop.f32.mrb[2].mxu0  ;;  %v533_v21 = vpop.f32.mrb[0].mxu1 }
 0x147   : > { %386 = vst [vmem:[%s1004_s20] sm:$0xff] %v319_v14  ;;  %v323_v19 = vadd.f32 %v322_v17, %v239_v13  ;;  %v324_v20 = vpop.f32.mrb[3].mxu0  ;;  %v380_v23 = vadd.f32 %v533_v21, %v244_v11  ;;  %v371_v24 = vpop.f32.mrb[1].mxu1 }
 0x148   : > { %387 = vst [vmem:[%s1004_s20 + $0x8] sm:$0xff] %v321_v16  ;;  %v325_v22 = vadd.f32 %v324_v20, %v239_v13  ;;  %v372_v25 = vadd.f32 %v371_v24, %v234_v10  ;;  %v534_v26 = vpop.f32.mrb[2].mxu1 }
 0x149   : > { %390 = vst [vmem:[%s1004_s20 + $0x18] sm:$0xff] %v323_v19  ;;  %395 = vst.msk [vmem:[%s1004_s20 + $0x40] sm:$0xff] %vm388_vm1, %v380_v23  ;;  %v383_v27 = vadd.f32 %v534_v26, %v249_v18  ;;  %v374_v28 = vpop.f32.mrb[3].mxu1 }
 0x14a   : > { %391 = vst [vmem:[%s1004_s20 + $0x20] sm:$0xff] %v325_v22  ;;  %389 = vst.msk [vmem:[%s1004_s20 + $0x10] sm:$0xff] %vm388_vm1, %v372_v25  ;;  %v375_v29 = vadd.f32 %v374_v28, %v239_v13 }
 0x14b   : > { %398 = vst.msk [vmem:[%s1004_s20 + $0x58] sm:$0xff] %vm388_vm1, %v383_v27 }
 0x14c   : > { %v328_v30 = vpop.f32.mrb[4].mxu0  ;;  %392 = vst.msk [vmem:[%s1004_s20 + $0x28] sm:$0xff] %vm388_vm1, %v375_v29 }
 0x14d   : > { %v329_v31 = vadd.f32 %v328_v30, %v244_v11  ;;  %v330_v32 = vpop.f32.mrb[5].mxu0 }
 0x14e   : > { %v331_v33 = vadd.f32 %v330_v32, %v244_v11  ;;  %v332_v34 = vpop.f32.mrb[6].mxu0 }
 0x14f   : > { %393 = vst [vmem:[%s1004_s20 + $0x30] sm:$0xff] %v329_v31  ;;  %v333_v35 = vadd.f32 %v332_v34, %v249_v18  ;;  %v334_v36 = vpop.f32.mrb[7].mxu0 }
 0x150   : > { %394 = vst [vmem:[%s1004_s20 + $0x38] sm:$0xff] %v331_v33  ;;  %v335_v37 = vadd.f32 %v334_v36, %v249_v18 }
 0x151   : > { %396 = vst [vmem:[%s1004_s20 + $0x48] sm:$0xff] %v333_v35 }
 0x152   : > { %397 = vst [vmem:[%s1004_s20 + $0x50] sm:$0xff] %v335_v37 }
 0x153   : > { %723 = shalt.err (!%p720_p2)
}
 0x154   : > { %s724_s21 = scalar_lea.hbm %s1024_s16, 1536  ;;  %s728_s30 = scalar_lea.hbm %s1076_s3, 3072 }
 0x155   : > { %p725_p13 = scmp.ne.s32.totalorder %s1024_s16, %s724_s21  ;;  %p729_p4 = scmp.lt.u32.totalorder %s1024_s16, %s1076_s3 }
 0x156   : > { %p730_p7 = scmp.lt.u32.totalorder %s728_s30, %s724_s21  ;;  %p732_p8 = scmp.lt.u32.totalorder %s724_s21, %s1024_s16 }
 0x157   : > { %p726_p6 = pnand %p725_p13, %p1090_p0 }
 0x158   : > { %p731_p11 = por %p730_p7, %p729_p4 }
 0x159   : > { %p727_p10 = pneg %p726_p6 }
 0x15a   : > { %p733_p1 = por %p732_p8, %p731_p11 }
 0x15c   : > { %p734_p3 = pnand %p733_p1, %p727_p10 }
 0x15e   : > { %737 = shalt.err (!%p734_p3)
}
 0x15f   : > { %s793_s18 = smov 384   ;;  %s794_s20 = smov 24  }
 0x160   : > { %550 = dma.vmem_to_hbm [thread:$0]  (%p1090_p0), %s1026_s26, 1536, %s1024_s16, %s400_s7, %s793_s18, %s793_s18, %s794_s20  }
 0x161 PF: > { %s428_s17 = sand.u32 1, %s768_s12   ;;  %p1091_p5 = scmp.ne.s32.totalorder %s1081_s19, 0 }
 0x162   : > { %p1092_p9 = scmp.ge.s32.totalorder %s780_s15, 2  ;;  %s429_s28 = scalar_lea.sflag [#allocation4], %s428_s17 }
 0x164   : > { %p564_p12 = pnand %p1092_p9, %p1091_p5 }
 0x166   : > { %763 = dma.done.wait (!%p564_p12), %s429_s28, 1536  }
 0x167   : > { %765 = vsyncadd (!%p564_p12), %s429_s28, 4294965760  ;;  %p17_p2 = scmp.ge.s32.totalorder %s925_s6, 4   ;;  %s1093_s12 = smov %s772_s13 }
 0x168   : > { %s1094_s13 = smov %s776_s14  ;;  %s1095_s14 = smov %s934_s9 }
 0x169   : > { %s1096_s15 = smov %s925_s6  ;;  %19 = sbr.rel (!%p17_p2) target bundleno = 6 (0x6), region = 85 }
 0x170   :  { %434 = vsyncpa [#allocation3], 1 }
 0x171   :  { %436 = vsyncpa [#allocation3 + $0x1], 1 }
 0x172   :  { %437 = vsyncpa [#allocation6], 1 }
 0x173   :  { %438 = vsyncpa [#allocation4], 1 }
 0x174   :  { %440 = vsyncpa [#allocation4 + $0x1], 1 }

// kernel: custom-call.14
= control target key start
LH: loop header
LB: loop body
LE: loop exit
PB: predicated region body
PF: predicated region fallthrough
CT: control target
= control target key end

     0   :  { %5 = vsyncpa [#allocation1], 0  ;;  %s603_s0 = inlined_call_operand.hbm [shape: f32[8,8], index: 0, kind: input, shape index: {}]   ;;  %s604_s1 = inlined_call_operand.vmem [shape: f32[8,8], index: 1, kind: output, shape index: {0}]   ;;  %s605_s2 = inlined_call_operand.hbm [shape: s32[8], index: 2, kind: output, shape index: {1}]   ;;  %s606_s3 = inlined_call_operand.hbm [shape: s32[8], index: 3, kind: output, shape index: {2}]  }
   0x1   :  { %6 = vsyncpa [#allocation2], 0 }
   0x2   :  { %7 = vsyncpa [#allocation8], 0  ;;  %s505_s12 = smov [#allocation0]   ;;  %s389_s16 = scalar_lea.hbm %s603_s0, 128 }
   0x3   :  { %s11_s13 = sshll.u32 %s505_s12, 4  ;;  %p390_p0 = scmp.ne.s32.totalorder %s603_s0, %s389_s16  ;;  %s12_s13 = int_to_ptr.vmem [resolvable:$true] %s11_s13 }
   0x4   :  { %p393_p1 = scmp.lt.u32.totalorder %s389_s16, %s603_s0 }
   0x6   :  { %p395_p2 = pnand %p393_p1, %p390_p0 }
   0x8   :  { %398 = shalt.err (!%p395_p2)
}
   0x9   :  { %s399_s21 = scalar_lea.vmem %s12_s13, 128  ;;  %p404_p4 = scmp.lt.s32.totalorder %s12_s13, %s12_s13 }
   0xa   :  { %p400_p3 = scmp.ne.s32.totalorder %s12_s13, %s399_s21  ;;  %p405_p5 = scmp.lt.s32.totalorder %s399_s21, %s399_s21 }
   0xc   :  { %p406_p6 = por %p405_p5, %p404_p4 }
   0xe   :  { %p407_p7 = pnand %p406_p6, %p400_p3 }
  0x10   :  { %410 = shalt.err (!%p407_p7)
}
  0x11   :  { %14 = dma.hbm_to_vmem [thread:$0]  %s603_s0, 128, %s12_s13, [#allocation1]  }
  0x12   :  { %487 = dma.done.wait [#allocation1], 128  }
  0x13   :  { %488 = vsyncadd [#allocation1], 4294967168  ;;  %v19_v0 = vlaneseq  ;;  %v506_v1 = vmov 0   ;;  %v16_v3 = vld [vmem:[#allocation0] sm:$0xff]  ;;  %s545_s24 = smov 0  }
  0x14   :  { %18 = vst [vmem:[#allocation4] sm:$0x1] %v506_v1  ;;  %17 = vst [vmem:[#allocation3] sm:$0xff] %v16_v3 }
  0x15   :  { %v542_v2 = vshrl.u32 %v19_v0, 7 }
  0x17   :  { %23 = vst [vmem:[#allocation9] sm:$0xff] %v542_v2 }
  0x18 LB: > { %v551_v6 = vstv %s495_s24  ;;  %s80_s0 = ssub.s32 128, %s495_s24  ;;  %v86_v36 = vand.u32 127, %v19_v0  ;;  %s92_s25 = scalar_lea.vmem [#allocation3], %s495_s24  ;;  %s495_s24 = sphi %s545_s24, %s29_s24  }
  0x19   : > { %vm38_vm0 = vcmp.ge.s32.totalorder %v542_v2, %v551_v6  ;;  %s98_s27 = scalar_lea.vmem [#allocation9], %s495_s24  ;;  %vm118_vm13 = vcmp.gt.s32.totalorder %v542_v2, %v551_v6  ;;  %s29_s24 = sadd.s32 1, %s495_s24  }
  0x1a   : > { %vm110_vm10 = vcmp.gt.s32.totalorder %v86_v36, %v551_v6  ;;  %vm87_vm11 = vcmp.eq.s32.totalorder %v86_v36, %v551_v6  ;;  %p26_p8 = scmp.ge.s32.totalorder %s29_s24, 8  }
  0x1b   : > { %v34_v4 = vld [vmem:[#allocation3] sm:$0xff]  ;;  %v89_v38 = vld [vmem:[#allocation4] ss:$0 sm:$0xff]  ;;  %v94_v39 = vld [vmem:[%s92_s25] ss:$0 sm:$0xff]  ;;  %s497_s5 = smov (%p26_p8), %s604_s1   ;;  %s501_s6 = smov (%p26_p8), [#allocation3]  }
  0x1c   : > { %v35_v5 = vand.u32 2147483647, %v34_v4  ;;  %vm122_vm15 = vmand %vm118_vm13, %vm87_vm11 }
  0x1e   : > { %vm311_vm1 = vcmp.gt.f32.partialorder %v35_v5, -inf  ;;  %v100_v40 = vld [vmem:[%s98_s27] ss:$0 sm:$0xff] }
  0x1f   : > { %vm42_vm2 = vmand %vm38_vm0, %vm311_vm1 }
  0x20   : > { %v43_v7 = vsel %vm42_vm2, %v542_v2, %v551_v6  ;;  %v44_v8 = vsel %vm42_vm2, %v35_v5, -inf }
  0x21   : > { %v45_v9 = vrot.slane %v44_v8, 1  ;;  %v46_v10 = vrot.slane %v43_v7, 1 }
  0x23   : > { %vm47_vm3 = vcmp.ge.f32.partialorder %v45_v9, %v44_v8  ;;  %v50_v11 = vrot.slane %v45_v9, 1  ;;  %v51_v12 = vrot.slane %v46_v10, 1 }
  0x24   : > { %v48_v13 = vsel %vm47_vm3, %v45_v9, %v44_v8  ;;  %v49_v14 = vsel %vm47_vm3, %v46_v10, %v43_v7 }
  0x25   : > { %vm52_vm4 = vcmp.ge.f32.partialorder %v50_v11, %v48_v13  ;;  %v55_v15 = vrot.slane %v50_v11, 1  ;;  %v56_v16 = vrot.slane %v51_v12, 1 }
  0x26   : > { %v53_v17 = vsel %vm52_vm4, %v50_v11, %v48_v13  ;;  %v54_v18 = vsel %vm52_vm4, %v51_v12, %v49_v14 }
  0x27   : > { %vm57_vm5 = vcmp.ge.f32.partialorder %v55_v15, %v53_v17  ;;  %v60_v19 = vrot.slane %v55_v15, 1  ;;  %v61_v20 = vrot.slane %v56_v16, 1 }
  0x28   : > { %v58_v21 = vsel %vm57_vm5, %v55_v15, %v53_v17  ;;  %v59_v22 = vsel %vm57_vm5, %v56_v16, %v54_v18 }
  0x29   : > { %vm62_vm6 = vcmp.ge.f32.partialorder %v60_v19, %v58_v21  ;;  %v65_v23 = vrot.slane %v60_v19, 1  ;;  %v66_v24 = vrot.slane %v61_v20, 1 }
  0x2a   : > { %v63_v25 = vsel %vm62_vm6, %v60_v19, %v58_v21  ;;  %v64_v26 = vsel %vm62_vm6, %v61_v20, %v59_v22 }
  0x2b   : > { %vm67_vm7 = vcmp.ge.f32.partialorder %v65_v23, %v63_v25  ;;  %v70_v27 = vrot.slane %v65_v23, 1  ;;  %v71_v28 = vrot.slane %v66_v24, 1 }
  0x2c   : > { %v68_v29 = vsel %vm67_vm7, %v65_v23, %v63_v25  ;;  %v69_v30 = vsel %vm67_vm7, %v66_v24, %v64_v26 }
  0x2d   : > { %vm72_vm8 = vcmp.ge.f32.partialorder %v70_v27, %v68_v29  ;;  %v75_v31 = vrot.slane %v70_v27, 1  ;;  %v76_v32 = vrot.slane %v71_v28, 1 }
  0x2e   : > { %v73_v33 = vsel %vm72_vm8, %v70_v27, %v68_v29  ;;  %v74_v34 = vsel %vm72_vm8, %v71_v28, %v69_v30 }
  0x2f   : > { %vm77_vm9 = vcmp.ge.f32.partialorder %v75_v31, %v73_v33 }
  0x30   : > { %v79_v35 = vsel %vm77_vm9, %v76_v32, %v74_v34 }
  0x31   : > { %81 = vrot.lane.b32.xlu0 %v79_v35, %s80_s0 }
  0xa3   : > { %v82_v37 = vpop.permute.xlu0 %81 }
  0xa4   : > { %316 = vpush %v82_v37 }
  0xd5   : > { %s317_s26 = spop %316 }
  0xd6   : > { %v88_v41 = vstv %s317_s26  ;;  %s93_s28 = scalar_lea.vmem [#allocation3], %s317_s26  ;;  %s99_s29 = scalar_lea.vmem [#allocation9], %s317_s26 }
  0xd7   : > { %v95_v42 = vld [vmem:[%s93_s28] ss:$0 sm:$0xff]  ;;  %v90_v44 = vsel %vm87_vm11, %v88_v41, %v89_v38 }
  0xd8   : > { %v101_v43 = vld [vmem:[%s99_s29] ss:$0 sm:$0xff]  ;;  %96 = vst [vmem:[%s93_s28] sm:$0x1] %v94_v39  ;;  %vm104_vm12 = vcmp.ne.f32.partialorder %v95_v42, 0.0  ;;  %91 = vst [vmem:[#allocation4] sm:$0x1] %v90_v44 }
  0xd9   : > { %102 = vst [vmem:[%s99_s29] sm:$0x1] %v100_v40  ;;  %97 = vst [vmem:[%s92_s25] sm:$0x1] %v95_v42  ;;  %v111_v51 = vsel %vm110_vm10, %v95_v42, 0.0 }
  0xda   : > { %103 = vst [vmem:[%s98_s27] sm:$0x1] %v101_v43  ;;  %vm105_vm14 = vmand %vm87_vm11, %vm104_vm12 }
  0xdb   : > { %v106_v45 = vsel %vm105_vm14, %v95_v42, 1.0 }
  0xdc   : > { %v119_v46 = vsel %vm118_vm13, %v106_v45, 1.0 }
  0xdd   : > { %387 = vrcp.f32 %v119_v46 }
  0xdf   :  { %v181_v56 = vld [vmem:[#allocation4] sm:$0x1] (%p26_p8) }
  0xe0   : > { %v115_v48 = vld [vmem:[#allocation3] sm:$0xff]  ;;  %183 = vst [vmem:[#allocation5] sm:$0x1] (%p26_p8), %v181_v56 }
  0xe1   :  { %v129_v55 = vld [vmem:[#allocation9] sm:$0xff] (%p26_p8) }
  0xe7   : > { %v388_v47 = vpop.eup %387 }
  0xe8   : > { %v121_v49 = vmul.f32 %v388_v47, %v115_v48 }
  0xea   : > { %v123_v50 = vsel %vm122_vm15, %v121_v49, 0.0 }
  0xeb   : > { %124 = vadd.xlane.f32.xlu0 %v123_v50 }
 0x118   :  { %145 = vxpose.xlu0.b32.start.end [1/1] (short) (narrow) (%p26_p8), %v129_v55, 8 }
 0x177   :  { %28 = sbr.rel (!%p26_p8) target bundleno = 24 (0x18), region = 83 }
 0x178   : > { %v125_v52 = vpop.xlane.xlu0 %124 }
 0x179   : > { %v126_v53 = vmul.f32 %v125_v52, %v111_v51 }
 0x17b   : > { %v127_v54 = vsub.f32 %v121_v49, %v126_v53 }
 0x17d   : > { %128 = vst [vmem:[#allocation3] sm:$0xff] %v127_v54 }
 0x198   :  { %v161_v57 = vpop.trf.xlu0 }
 0x199   :  { %177 = vst [vmem:[#allocation6] sm:$0x1] %v161_v57 }
 0x1a0   :  { %v187_v58 = vld [vmem:[#allocation6] sm:$0x1] }
 0x1a1   :  { %189 = vst [vmem:[#allocation7] sm:$0x1] %v187_v58 }
 0x1a2 LB: > { %v237_v59 = vld [vmem:[%s503_s6] sm:$0xff]  ;;  %s239_s6 = scalar_lea.vmem %s503_s6, 8   ;;  %s503_s6 = sphi %s501_s6, %s239_s6   ;;  %s499_s5 = sphi %s497_s5, %s240_s5  }
 0x1a3   : > { %238 = vst [vmem:[%s499_s5] sm:$0xff] %v237_v59  ;;  %s240_s5 = scalar_lea.vmem %s499_s5, 8   ;;  %p234_p9 = scmp.gt.s32.totalorder %s239_s6, [#allocation3] }
 0x1a4   :  { %s507_s7 = smov (%p234_p9), [#allocation5]   ;;  %s508_s9 = smov (%p234_p9), [#allocation7]  }
 0x1a5   :  { %236 = sbr.rel (!%p234_p9) target bundleno = 418 (0x1a2), region = 105  ;;  %s257_s8 = sshll.u32 (%p234_p9), %s507_s7, 4  ;;  %s258_s8 = int_to_ptr.vmem [resolvable:$true] %s257_s8 }
 0x1a6   :  { %s266_s10 = sshll.u32 (%p234_p9), %s508_s9, 4  ;;  %s411_s1 = scalar_lea.vmem (%p234_p9), %s258_s8, 16  ;;  %s267_s10 = int_to_ptr.vmem [resolvable:$true] %s266_s10 }
 0x1a7   :  { %p412_p10 = scmp.ne.s32.totalorder (%p234_p9), %s258_s8, %s411_s1  ;;  %s415_s11 = scalar_lea.vmem (%p234_p9), %s258_s8, 32 }
 0x1a8   :  { %p416_p11 = scmp.lt.s32.totalorder (%p234_p9), %s258_s8, %s258_s8  ;;  %p417_p12 = scmp.lt.s32.totalorder (%p234_p9), %s415_s11, %s411_s1 }
 0x1aa   :  { %p418_p13 = por (%p234_p9), %p417_p12, %p416_p11 }
 0x1ac   :  { %p419_p0 = pnand %p418_p13, %p412_p10 }
 0x1ae   :  { %422 = shalt.err (!%p419_p0)
}
 0x1af   :  { %s423_s14 = scalar_lea.hbm %s605_s2, 16 }
 0x1b0   :  { %p424_p1 = scmp.ne.s32.totalorder %s605_s2, %s423_s14  ;;  %p427_p2 = scmp.lt.u32.totalorder %s423_s14, %s605_s2 }
 0x1b2   :  { %p429_p3 = pnand %p427_p2, %p424_p1 }
 0x1b4   :  { %432 = shalt.err (!%p429_p3)
}
 0x1b5   :  { %260 = dma.vmem_to_hbm [thread:$0]  %s258_s8, 16, %s605_s2, [#allocation2]  }
 0x1b6   :  { %s433_s21 = scalar_lea.vmem %s267_s10, 16  ;;  %s437_s22 = scalar_lea.vmem %s267_s10, 32 }
 0x1b7   :  { %p434_p4 = scmp.ne.s32.totalorder %s267_s10, %s433_s21  ;;  %p438_p5 = scmp.lt.s32.totalorder %s267_s10, %s267_s10 }
 0x1b8   :  { %p439_p6 = scmp.lt.s32.totalorder %s437_s22, %s433_s21 }
 0x1ba   :  { %p440_p7 = por %p439_p6, %p438_p5 }
 0x1bc   :  { %p441_p8 = pnand %p440_p7, %p434_p4 }
 0x1be   :  { %444 = shalt.err (!%p441_p8)
}
 0x1bf   :  { %s445_s0 = scalar_lea.hbm %s606_s3, 16 }
 0x1c0   :  { %p446_p9 = scmp.ne.s32.totalorder %s606_s3, %s445_s0  ;;  %p449_p10 = scmp.lt.u32.totalorder %s445_s0, %s606_s3 }
 0x1c2   :  { %p451_p11 = pnand %p449_p10, %p446_p9 }
 0x1c4   :  { %454 = shalt.err (!%p451_p11)
}
 0x1c5   :  { %269 = dma.vmem_to_hbm [thread:$0]  %s267_s10, 16, %s606_s3, [#allocation8]  }
 0x1c6   :  { %489 = dma.done.wait [#allocation2], 16  }
 0x1c7   :  { %490 = vsyncadd [#allocation2], 4294967280 }
 0x1c8   :  { %491 = dma.done.wait [#allocation8], 16  }
 0x1c9   :  { %492 = vsyncadd [#allocation8], 4294967280 }
 0x1ca   :  { %276 = vsyncpa [#allocation1], 1 }
 0x1cb   :  { %277 = vsyncpa [#allocation2], 1 }
 0x1cc   :  { %278 = vsyncpa [#allocation8], 1 }

// kernel: custom-call.18
= control target key start
LH: loop header
LB: loop body
LE: loop exit
PB: predicated region body
PF: predicated region fallthrough
CT: control target
= control target key end

     0   :  { %5 = vsyncpa [#allocation1], 0  ;;  %s604_s0 = inlined_call_operand.hbm [shape: f32[6,6], index: 0, kind: input, shape index: {}]   ;;  %s605_s1 = inlined_call_operand.vmem [shape: f32[6,6], index: 1, kind: output, shape index: {0}]   ;;  %s606_s2 = inlined_call_operand.hbm [shape: s32[6], index: 2, kind: output, shape index: {1}]   ;;  %s607_s3 = inlined_call_operand.hbm [shape: s32[6], index: 3, kind: output, shape index: {2}]  }
   0x1   :  { %6 = vsyncpa [#allocation2], 0 }
   0x2   :  { %7 = vsyncpa [#allocation8], 0  ;;  %s505_s12 = smov [#allocation0]   ;;  %s389_s16 = scalar_lea.hbm %s604_s0, 128 }
   0x3   :  { %s11_s13 = sshll.u32 %s505_s12, 4  ;;  %p390_p0 = scmp.ne.s32.totalorder %s604_s0, %s389_s16  ;;  %s12_s13 = int_to_ptr.vmem [resolvable:$true] %s11_s13 }
   0x4   :  { %p393_p1 = scmp.lt.u32.totalorder %s389_s16, %s604_s0 }
   0x6   :  { %p395_p2 = pnand %p393_p1, %p390_p0 }
   0x8   :  { %398 = shalt.err (!%p395_p2)
}
   0x9   :  { %s399_s21 = scalar_lea.vmem %s12_s13, 128  ;;  %p404_p4 = scmp.lt.s32.totalorder %s12_s13, %s12_s13 }
   0xa   :  { %p400_p3 = scmp.ne.s32.totalorder %s12_s13, %s399_s21  ;;  %p405_p5 = scmp.lt.s32.totalorder %s399_s21, %s399_s21 }
   0xc   :  { %p406_p6 = por %p405_p5, %p404_p4 }
   0xe   :  { %p407_p7 = pnand %p406_p6, %p400_p3 }
  0x10   :  { %410 = shalt.err (!%p407_p7)
}
  0x11   :  { %14 = dma.hbm_to_vmem [thread:$0]  %s604_s0, 128, %s12_s13, [#allocation1]  }
  0x12   :  { %487 = dma.done.wait [#allocation1], 128  }
  0x13   :  { %488 = vsyncadd [#allocation1], 4294967168  ;;  %v19_v0 = vlaneseq  ;;  %v506_v1 = vmov 0   ;;  %v16_v3 = vld [vmem:[#allocation0] sm:$0xff]  ;;  %s545_s24 = smov 0  }
  0x14   :  { %18 = vst [vmem:[#allocation4] sm:$0x1] %v506_v1  ;;  %17 = vst [vmem:[#allocation3] sm:$0xff] %v16_v3 }
  0x15   :  { %v542_v2 = vshrl.u32 %v19_v0, 7 }
  0x17   :  { %23 = vst [vmem:[#allocation9] sm:$0xff] %v542_v2 }
  0x18 LB: > { %vm39_vm0 = vcmp.lt.s32.totalorder %v542_v2, 6  ;;  %v552_v6 = vstv %s495_s24  ;;  %s80_s0 = ssub.s32 128, %s495_s24  ;;  %v86_v36 = vand.u32 127, %v19_v0  ;;  %s92_s25 = scalar_lea.vmem [#allocation3], %s495_s24  ;;  %s495_s24 = sphi %s545_s24, %s29_s24  }
  0x19   : > { %vm38_vm1 = vcmp.ge.s32.totalorder %v542_v2, %v552_v6  ;;  %s98_s27 = scalar_lea.vmem [#allocation9], %s495_s24  ;;  %vm118_vm15 = vcmp.gt.s32.totalorder %v542_v2, %v552_v6  ;;  %s29_s24 = sadd.s32 1, %s495_s24  }
  0x1a   : > { %vm40_vm3 = vmand %vm38_vm1, %vm39_vm0  ;;  %vm110_vm12 = vcmp.gt.s32.totalorder %v86_v36, %v552_v6  ;;  %vm87_vm13 = vcmp.eq.s32.totalorder %v86_v36, %v552_v6  ;;  %p26_p8 = scmp.ge.s32.totalorder %s29_s24, 6  }
  0x1b   : > { %v34_v4 = vld [vmem:[#allocation3] sm:$0xff]  ;;  %v89_v38 = vld [vmem:[#allocation4] ss:$0 sm:$0xff]  ;;  %v94_v39 = vld [vmem:[%s92_s25] ss:$0 sm:$0xff]  ;;  %s497_s5 = smov (%p26_p8), %s605_s1   ;;  %s501_s6 = smov (%p26_p8), [#allocation3]  }
  0x1c   : > { %v35_v5 = vand.u32 2147483647, %v34_v4  ;;  %vm122_vm1 = vmand %vm118_vm15, %vm87_vm13 }
  0x1e   : > { %vm311_vm2 = vcmp.gt.f32.partialorder %v35_v5, -inf  ;;  %v100_v40 = vld [vmem:[%s98_s27] ss:$0 sm:$0xff] }
  0x1f   : > { %vm42_vm4 = vmand %vm40_vm3, %vm311_vm2 }
  0x20   : > { %v43_v7 = vsel %vm42_vm4, %v542_v2, %v552_v6  ;;  %v44_v8 = vsel %vm42_vm4, %v35_v5, -inf }
  0x21   : > { %v45_v9 = vrot.slane %v44_v8, 1  ;;  %v46_v10 = vrot.slane %v43_v7, 1 }
  0x23   : > { %vm47_vm5 = vcmp.ge.f32.partialorder %v45_v9, %v44_v8  ;;  %v50_v11 = vrot.slane %v45_v9, 1  ;;  %v51_v12 = vrot.slane %v46_v10, 1 }
  0x24   : > { %v48_v13 = vsel %vm47_vm5, %v45_v9, %v44_v8  ;;  %v49_v14 = vsel %vm47_vm5, %v46_v10, %v43_v7 }
  0x25   : > { %vm52_vm6 = vcmp.ge.f32.partialorder %v50_v11, %v48_v13  ;;  %v55_v15 = vrot.slane %v50_v11, 1  ;;  %v56_v16 = vrot.slane %v51_v12, 1 }
  0x26   : > { %v53_v17 = vsel %vm52_vm6, %v50_v11, %v48_v13  ;;  %v54_v18 = vsel %vm52_vm6, %v51_v12, %v49_v14 }
  0x27   : > { %vm57_vm7 = vcmp.ge.f32.partialorder %v55_v15, %v53_v17  ;;  %v60_v19 = vrot.slane %v55_v15, 1  ;;  %v61_v20 = vrot.slane %v56_v16, 1 }
  0x28   : > { %v58_v21 = vsel %vm57_vm7, %v55_v15, %v53_v17  ;;  %v59_v22 = vsel %vm57_vm7, %v56_v16, %v54_v18 }
  0x29   : > { %vm62_vm8 = vcmp.ge.f32.partialorder %v60_v19, %v58_v21  ;;  %v65_v23 = vrot.slane %v60_v19, 1  ;;  %v66_v24 = vrot.slane %v61_v20, 1 }
  0x2a   : > { %v63_v25 = vsel %vm62_vm8, %v60_v19, %v58_v21  ;;  %v64_v26 = vsel %vm62_vm8, %v61_v20, %v59_v22 }
  0x2b   : > { %vm67_vm9 = vcmp.ge.f32.partialorder %v65_v23, %v63_v25  ;;  %v70_v27 = vrot.slane %v65_v23, 1  ;;  %v71_v28 = vrot.slane %v66_v24, 1 }
  0x2c   : > { %v68_v29 = vsel %vm67_vm9, %v65_v23, %v63_v25  ;;  %v69_v30 = vsel %vm67_vm9, %v66_v24, %v64_v26 }
  0x2d   : > { %vm72_vm10 = vcmp.ge.f32.partialorder %v70_v27, %v68_v29  ;;  %v75_v31 = vrot.slane %v70_v27, 1  ;;  %v76_v32 = vrot.slane %v71_v28, 1 }
  0x2e   : > { %v73_v33 = vsel %vm72_vm10, %v70_v27, %v68_v29  ;;  %v74_v34 = vsel %vm72_vm10, %v71_v28, %v69_v30 }
  0x2f   : > { %vm77_vm11 = vcmp.ge.f32.partialorder %v75_v31, %v73_v33 }
  0x30   : > { %v79_v35 = vsel %vm77_vm11, %v76_v32, %v74_v34 }
  0x31   : > { %81 = vrot.lane.b32.xlu0 %v79_v35, %s80_s0 }
  0xa3   : > { %v82_v37 = vpop.permute.xlu0 %81 }
  0xa4   : > { %316 = vpush %v82_v37 }
  0xd5   : > { %s317_s26 = spop %316 }
  0xd6   : > { %v88_v41 = vstv %s317_s26  ;;  %s93_s28 = scalar_lea.vmem [#allocation3], %s317_s26  ;;  %s99_s29 = scalar_lea.vmem [#allocation9], %s317_s26 }
  0xd7   : > { %v95_v42 = vld [vmem:[%s93_s28] ss:$0 sm:$0xff]  ;;  %v90_v44 = vsel %vm87_vm13, %v88_v41, %v89_v38 }
  0xd8   : > { %v101_v43 = vld [vmem:[%s99_s29] ss:$0 sm:$0xff]  ;;  %96 = vst [vmem:[%s93_s28] sm:$0x1] %v94_v39  ;;  %vm104_vm14 = vcmp.ne.f32.partialorder %v95_v42, 0.0  ;;  %91 = vst [vmem:[#allocation4] sm:$0x1] %v90_v44 }
  0xd9   : > { %102 = vst [vmem:[%s99_s29] sm:$0x1] %v100_v40  ;;  %97 = vst [vmem:[%s92_s25] sm:$0x1] %v95_v42  ;;  %v111_v51 = vsel %vm110_vm12, %v95_v42, 0.0 }
  0xda   : > { %103 = vst [vmem:[%s98_s27] sm:$0x1] %v101_v43  ;;  %vm105_vm0 = vmand %vm87_vm13, %vm104_vm14 }
  0xdb   : > { %v106_v45 = vsel %vm105_vm0, %v95_v42, 1.0 }
  0xdc   : > { %v119_v46 = vsel %vm118_vm15, %v106_v45, 1.0 }
  0xdd   : > { %387 = vrcp.f32 %v119_v46 }
  0xdf   :  { %v181_v56 = vld [vmem:[#allocation4] sm:$0x1] (%p26_p8) }
  0xe0   : > { %v115_v48 = vld [vmem:[#allocation3] sm:$0xff]  ;;  %183 = vst [vmem:[#allocation5] sm:$0x1] (%p26_p8), %v181_v56 }
  0xe1   :  { %v129_v55 = vld [vmem:[#allocation9] sm:$0xff] (%p26_p8) }
  0xe7   : > { %v388_v47 = vpop.eup %387 }
  0xe8   : > { %v121_v49 = vmul.f32 %v388_v47, %v115_v48 }
  0xea   : > { %v123_v50 = vsel %vm122_vm1, %v121_v49, 0.0 }
  0xeb   : > { %124 = vadd.xlane.f32.xlu0 %v123_v50 }
 0x118   :  { %145 = vxpose.xlu0.b32.start.end [1/1] (short) (narrow) (%p26_p8), %v129_v55, 8 }
 0x177   :  { %28 = sbr.rel (!%p26_p8) target bundleno = 24 (0x18), region = 83 }
 0x178   : > { %v125_v52 = vpop.xlane.xlu0 %124 }
 0x179   : > { %v126_v53 = vmul.f32 %v125_v52, %v111_v51 }
 0x17b   : > { %v127_v54 = vsub.f32 %v121_v49, %v126_v53 }
 0x17d   : > { %128 = vst [vmem:[#allocation3] sm:$0xff] %v127_v54 }
 0x198   :  { %v161_v57 = vpop.trf.xlu0 }
 0x199   :  { %177 = vst [vmem:[#allocation6] sm:$0x1] %v161_v57 }
 0x1a0   :  { %v187_v58 = vld [vmem:[#allocation6] sm:$0x1] }
 0x1a1   :  { %189 = vst [vmem:[#allocation7] sm:$0x1] %v187_v58 }
 0x1a2 LB: > { %v237_v59 = vld [vmem:[%s503_s6] sm:$0xff]  ;;  %s239_s6 = scalar_lea.vmem %s503_s6, 8   ;;  %s503_s6 = sphi %s501_s6, %s239_s6   ;;  %s499_s5 = sphi %s497_s5, %s240_s5  }
 0x1a3   : > { %238 = vst [vmem:[%s499_s5] sm:$0xff] %v237_v59  ;;  %s240_s5 = scalar_lea.vmem %s499_s5, 8   ;;  %p234_p9 = scmp.gt.s32.totalorder %s239_s6, [#allocation3] }
 0x1a4   :  { %s507_s7 = smov (%p234_p9), [#allocation5]   ;;  %s508_s9 = smov (%p234_p9), [#allocation7]  }
 0x1a5   :  { %236 = sbr.rel (!%p234_p9) target bundleno = 418 (0x1a2), region = 105  ;;  %s257_s8 = sshll.u32 (%p234_p9), %s507_s7, 4  ;;  %s258_s8 = int_to_ptr.vmem [resolvable:$true] %s257_s8 }
 0x1a6   :  { %s266_s10 = sshll.u32 (%p234_p9), %s508_s9, 4  ;;  %s411_s1 = scalar_lea.vmem (%p234_p9), %s258_s8, 16  ;;  %s267_s10 = int_to_ptr.vmem [resolvable:$true] %s266_s10 }
 0x1a7   :  { %p412_p10 = scmp.ne.s32.totalorder (%p234_p9), %s258_s8, %s411_s1  ;;  %s415_s11 = scalar_lea.vmem (%p234_p9), %s258_s8, 32 }
 0x1a8   :  { %p416_p11 = scmp.lt.s32.totalorder (%p234_p9), %s258_s8, %s258_s8  ;;  %p417_p12 = scmp.lt.s32.totalorder (%p234_p9), %s415_s11, %s411_s1 }
 0x1aa   :  { %p418_p13 = por (%p234_p9), %p417_p12, %p416_p11 }
 0x1ac   :  { %p419_p0 = pnand %p418_p13, %p412_p10 }
 0x1ae   :  { %422 = shalt.err (!%p419_p0)
}
 0x1af   :  { %s423_s14 = scalar_lea.hbm %s606_s2, 16 }
 0x1b0   :  { %p424_p1 = scmp.ne.s32.totalorder %s606_s2, %s423_s14  ;;  %p427_p2 = scmp.lt.u32.totalorder %s423_s14, %s606_s2 }
 0x1b2   :  { %p429_p3 = pnand %p427_p2, %p424_p1 }
 0x1b4   :  { %432 = shalt.err (!%p429_p3)
}
 0x1b5   :  { %260 = dma.vmem_to_hbm [thread:$0]  %s258_s8, 16, %s606_s2, [#allocation2]  }
 0x1b6   :  { %s433_s21 = scalar_lea.vmem %s267_s10, 16  ;;  %s437_s22 = scalar_lea.vmem %s267_s10, 32 }
 0x1b7   :  { %p434_p4 = scmp.ne.s32.totalorder %s267_s10, %s433_s21  ;;  %p438_p5 = scmp.lt.s32.totalorder %s267_s10, %s267_s10 }
 0x1b8   :  { %p439_p6 = scmp.lt.s32.totalorder %s437_s22, %s433_s21 }
 0x1ba   :  { %p440_p7 = por %p439_p6, %p438_p5 }
 0x1bc   :  { %p441_p8 = pnand %p440_p7, %p434_p4 }
 0x1be   :  { %444 = shalt.err (!%p441_p8)
}
 0x1bf   :  { %s445_s0 = scalar_lea.hbm %s607_s3, 16 }
 0x1c0   :  { %p446_p9 = scmp.ne.s32.totalorder %s607_s3, %s445_s0  ;;  %p449_p10 = scmp.lt.u32.totalorder %s445_s0, %s607_s3 }
 0x1c2   :  { %p451_p11 = pnand %p449_p10, %p446_p9 }
 0x1c4   :  { %454 = shalt.err (!%p451_p11)
}
 0x1c5   :  { %269 = dma.vmem_to_hbm [thread:$0]  %s267_s10, 16, %s607_s3, [#allocation8]  }
 0x1c6   :  { %489 = dma.done.wait [#allocation2], 16  }
 0x1c7   :  { %490 = vsyncadd [#allocation2], 4294967280 }
 0x1c8   :  { %491 = dma.done.wait [#allocation8], 16  }
 0x1c9   :  { %492 = vsyncadd [#allocation8], 4294967280 }
 0x1ca   :  { %276 = vsyncpa [#allocation1], 1 }
 0x1cb   :  { %277 = vsyncpa [#allocation2], 1 }
 0x1cc   :  { %278 = vsyncpa [#allocation8], 1 }

// kernel: _lambda_.6
= control target key start
LH: loop header
LB: loop body
LE: loop exit
PB: predicated region body
PF: predicated region fallthrough
CT: control target
= control target key end

     0   :  { %s4371_s0 = inlined_call_operand.hbm [shape: f32[2,8,128], index: 0, kind: input, shape index: {}]   ;;  %s4372_s1 = inlined_call_operand.hbm [shape: bf16[2,64,128], index: 1, kind: input, shape index: {}]   ;;  %s4373_s2 = inlined_call_operand.hbm [shape: f32[8,8], index: 2, kind: input, shape index: {}]   ;;  %s4374_s3 = inlined_call_operand.hbm [shape: bf16[16,8], index: 3, kind: input, shape index: {}]   ;;  %s4375_s4 = inlined_call_operand.hbm [shape: f32[16,1], index: 4, kind: input, shape index: {}]   ;;  %s4376_s5 = inlined_call_operand.hbm [shape: bf16[3,32,48], index: 5, kind: input, shape index: {}]   ;;  %s4377_s6 = inlined_call_operand.hbm [shape: bf16[3,32,64], index: 6, kind: input, shape index: {}]   ;;  %s4378_s7 = inlined_call_operand.hbm [shape: f32[3,32,1], index: 7, kind: input, shape index: {}]   ;;  %s4379_s8 = inlined_call_operand.hbm [shape: bf16[3,16,16], index: 8, kind: input, shape index: {}]   ;;  %s4380_s9 = inlined_call_operand.hbm [shape: f32[3,16,1], index: 9, kind: input, shape index: {}]   ;;  %s4381_s10 = inlined_call_operand.hbm [shape: bf16[3,16,16], index: 10, kind: input, shape index: {}]   ;;  %s4382_s11 = inlined_call_operand.hbm [shape: f32[3,16,1], index: 11, kind: input, shape index: {}]   ;;  %s4383_s12 = inlined_call_operand.hbm [shape: bf16[8,16], index: 12, kind: input, shape index: {}]   ;;  %s4384_s13 = inlined_call_operand.hbm [shape: f32[8,1], index: 13, kind: input, shape index: {}]   ;;  %s4385_s14 = inlined_call_operand.hbm [shape: bf16[8,16], index: 14, kind: input, shape index: {}]   ;;  %s4386_s15 = inlined_call_operand.hbm [shape: f32[8,1], index: 15, kind: input, shape index: {}]   ;;  %s4387_s16 = inlined_call_operand.hbm [shape: f32[2,8,128], index: 16, kind: output, shape index: {0}]   ;;  %s4388_s17 = inlined_call_operand.hbm [shape: f32[2,1,1], index: 17, kind: output, shape index: {1}]  }
   0x1   :  { %4405 = sst [smem:[#allocation48_spill]] %s4371_s0 }
   0x2   :  { %4406 = sst [smem:[#allocation49_spill]] %s4372_s1 }
   0x3   :  { %4407 = sst [smem:[#allocation50_spill]] %s4373_s2 }
   0x4   :  { %4408 = sst [smem:[#allocation51_spill]] %s4374_s3 }
   0x5   :  { %4409 = sst [smem:[#allocation52_spill]] %s4375_s4 }
   0x6   :  { %4410 = sst [smem:[#allocation53_spill]] %s4376_s5 }
   0x7   :  { %4411 = sst [smem:[#allocation54_spill]] %s4377_s6 }
   0x8   :  { %4412 = sst [smem:[#allocation55_spill]] %s4378_s7 }
   0x9   :  { %4413 = sst [smem:[#allocation56_spill]] %s4379_s8 }
   0xa   :  { %4414 = sst [smem:[#allocation57_spill]] %s4380_s9 }
   0xb   :  { %4415 = sst [smem:[#allocation58_spill]] %s4381_s10 }
   0xc   :  { %4416 = sst [smem:[#allocation59_spill]] %s4387_s16 }
   0xd   :  { %4417 = sst [smem:[#allocation60_spill]] %s4388_s17 }
   0xe   :  { %23 = vsyncpa [#allocation4], 0 }
   0xf   :  { %25 = vsyncpa [#allocation4 + $0x1], 0 }
  0x10   :  { %26 = vsyncpa [#allocation7], 0 }
  0x11   :  { %28 = vsyncpa [#allocation7 + $0x1], 0 }
  0x12   :  { %29 = vsyncpa [#allocation10], 0 }
  0x13   :  { %30 = vsyncpa [#allocation13], 0 }
  0x14   :  { %31 = vsyncpa [#allocation16], 0 }
  0x15   :  { %32 = vsyncpa [#allocation19], 0 }
  0x16   :  { %33 = vsyncpa [#allocation22], 0 }
  0x17   :  { %34 = vsyncpa [#allocation25], 0 }
  0x18   :  { %35 = vsyncpa [#allocation28], 0 }
  0x19   :  { %36 = vsyncpa [#allocation5], 0 }
  0x1a   :  { %38 = vsyncpa [#allocation5 + $0x1], 0 }
  0x1b   :  { %39 = vsyncpa [#allocation31], 0 }
  0x1c   :  { %41 = vsyncpa [#allocation31 + $0x1], 0  ;;  %s3649_s24 = smov 0   ;;  %s3651_s25 = smov 0  }
  0x1d   :  { %s3653_s26 = smov 0   ;;  %s3655_s27 = smov 0  }
  0x1e LB: > { %4418 = sst [smem:[#allocation44_spill]] %s3513_s24  ;;  %s3527_s28 = smov [#allocation8]   ;;  %s3525_s27 = sphi %s3655_s27, %s4478_s27   ;;  %s3521_s26 = sphi %s3653_s26, %s4477_s26   ;;  %s3517_s25 = sphi %s3651_s25, %s4476_s25   ;;  %s3513_s24 = sphi %s3649_s24, %s4474_s24  }
  0x1f   : > { %4419 = sst [smem:[#allocation45_spill]] %s3517_s25  ;;  %s463_s29 = sshll.u32 %s3527_s28, 4  ;;  %s464_s29 = int_to_ptr.vmem [resolvable:$true] %s463_s29 }
  0x20   : > { %s3670_s0 = sadd.s32 4294967295, %s3525_s27   ;;  %p2388_p0 = scmp.ge.s32.totalorder %s3525_s27, 1 }
  0x21   : > { %4420 = sst [smem:[#allocation46_spill]] %s3670_s0  ;;  %p4394_p1 = scmp.eq.s32.totalorder %s3670_s0, 0 }
  0x22   : > { %p450_p2 = scmp.lt.s32.totalorder %s3525_s27, 3  ;;  %s3528_s18 = smov [#allocation9]  }
  0x23   : > { %s473_s19 = sshll.u32 %s3528_s18, 4  ;;  %s3529_s20 = smov [#allocation12]   ;;  %s3682_s19 = int_to_ptr.vmem [resolvable:$true] %s473_s19 }
  0x24   : > { %p3675_p3 = pnand %p2388_p0, %p450_p2  ;;  %s499_s21 = sshll.u32 %s3529_s20, 4  ;;  %s3690_s21 = int_to_ptr.vmem [resolvable:$true] %s499_s21 }
  0x25   : > { %s4424_s2 = sld [smem:[#allocation50_spill]] }
  0x26   : > { %s4421_s30 = scalar_select %p3675_p3, 1, 0 }
  0x27   : > { %p2730_p5 = pneg %p3675_p3 }
  0x28   : > { %4422 = sst [smem:[#allocation47_spill]] %s4421_s30 }
  0x29   : > { %p3686_p6 = pnand %p2730_p5, %p4394_p1 }
  0x2b   : > { %s2939_s28 = scalar_lea.hbm %s4424_s2, 128  ;;  %p3700_p8 = pneg %p3686_p6 }
  0x2c   : > { %p2940_p7 = scmp.ne.s32.totalorder %s4424_s2, %s2939_s28  ;;  %p2946_p11 = scmp.lt.u32.totalorder %s2939_s28, %s4424_s2 }
  0x2e   : > { %p2942_p9 = pnand %p3700_p8, %p2940_p7 }
  0x30   : > { %p2943_p10 = pneg %p2942_p9 }
  0x32   : > { %p2948_p12 = pnand %p2946_p11, %p2943_p10 }
  0x34   : > { %2951 = shalt.err (!%p2948_p12)
}
  0x35   : > { %s2952_s22 = scalar_lea.vmem %s464_s29, 128  ;;  %p2960_p5 = scmp.lt.s32.totalorder %s464_s29, %s464_s29 }
  0x36   : > { %p2953_p13 = scmp.ne.s32.totalorder %s464_s29, %s2952_s22  ;;  %p2961_p4 = scmp.lt.s32.totalorder %s2952_s22, %s2952_s22 }
  0x38   : > { %p2955_p0 = pnand %p2953_p13, %p3700_p8  ;;  %p2962_p1 = por %p2961_p4, %p2960_p5 }
  0x3a   : > { %p2956_p2 = pneg %p2955_p0 }
  0x3c   : > { %p2963_p3 = pnand %p2962_p1, %p2956_p2 }
  0x3e   : > { %2966 = shalt.err (!%p2963_p3)
}
  0x3f   : > { %2733 = dma.hbm_to_vmem [thread:$0]  (!%p3686_p6), %s4424_s2, 128, %s464_s29, [#allocation7]  }
  0x40   : > { %s4426_s3 = sld [smem:[#allocation51_spill]] }
  0x46   : > { %s2967_s28 = scalar_lea.hbm %s4426_s3, 128 }
  0x47   : > { %p2968_p7 = scmp.ne.s32.totalorder %s4426_s3, %s2967_s28  ;;  %p2974_p1 = scmp.lt.u32.totalorder %s2967_s28, %s4426_s3 }
  0x49   : > { %p2970_p9 = pnand %p2968_p7, %p3700_p8 }
  0x4b   : > { %p2971_p4 = pneg %p2970_p9 }
  0x4d   : > { %p2976_p3 = pnand %p2974_p1, %p2971_p4 }
  0x4f   : > { %2979 = shalt.err (!%p2976_p3)
}
  0x50   : > { %s2980_s29 = scalar_lea.vmem %s3682_s19, 128  ;;  %p2988_p13 = scmp.lt.s32.totalorder %s3682_s19, %s3682_s19 }
  0x51   : > { %p2981_p10 = scmp.ne.s32.totalorder %s3682_s19, %s2980_s29  ;;  %p2989_p0 = scmp.lt.s32.totalorder %s2980_s29, %s2980_s29 }
  0x53   : > { %p2983_p11 = pnand %p2981_p10, %p3700_p8  ;;  %p2990_p2 = por %p2989_p0, %p2988_p13 }
  0x55   : > { %p2984_p12 = pneg %p2983_p11 }
  0x57   : > { %p2991_p5 = pnand %p2990_p2, %p2984_p12 }
  0x59   : > { %2994 = shalt.err (!%p2991_p5)
}
  0x5a   : > { %s4400_s0 = smov 64   ;;  %s4402_s24 = smov 4  }
  0x5b   : > { %2736 = dma.hbm_to_vmem [thread:$0]  (!%p3686_p6), %s4426_s3, 128, %s3682_s19, [#allocation10], %s4400_s0, %s4400_s0, %s4402_s24  }
  0x5c   : > { %s4427_s5 = sld [smem:[#allocation53_spill]] }
  0x62   : > { %s2995_s28 = scalar_lea.hbm %s4427_s5, 768 }
  0x63   : > { %p2996_p7 = scmp.ne.s32.totalorder %s4427_s5, %s2995_s28  ;;  %p3002_p1 = scmp.lt.u32.totalorder %s2995_s28, %s4427_s5 }
  0x65   : > { %p2998_p9 = pnand %p2996_p7, %p3700_p8 }
  0x67   : > { %p2999_p4 = pneg %p2998_p9 }
  0x69   : > { %p3004_p3 = pnand %p3002_p1, %p2999_p4 }
  0x6b   : > { %3007 = shalt.err (!%p3004_p3)
}
  0x6c   : > { %s3008_s19 = scalar_lea.vmem %s3690_s21, 768  ;;  %p3016_p13 = scmp.lt.s32.totalorder %s3690_s21, %s3690_s21 }
  0x6d   : > { %p3009_p10 = scmp.ne.s32.totalorder %s3690_s21, %s3008_s19  ;;  %p3017_p0 = scmp.lt.s32.totalorder %s3008_s19, %s3008_s19 }
  0x6f   : > { %p3011_p11 = pnand %p3009_p10, %p3700_p8  ;;  %p3018_p2 = por %p3017_p0, %p3016_p13 }
  0x71   : > { %p3012_p12 = pneg %p3011_p11 }
  0x73   : > { %p3019_p5 = pnand %p3018_p2, %p3012_p12 }
  0x75   : > { %3022 = shalt.err (!%p3019_p5)
}
  0x76   : > { %2742 = dma.hbm_to_vmem [thread:$0]  (!%p3686_p6), %s4427_s5, 768, %s3690_s21, [#allocation13], %s4400_s0, %s4400_s0, %s4402_s24  }
  0x77   : > { %s3532_s17 = smov [#allocation15]   ;;  %s3533_s23 = smov [#allocation18]  }
  0x78   : > { %s525_s30 = sshll.u32 %s3532_s17, 4  ;;  %s551_s28 = sshll.u32 %s3533_s23, 4  ;;  %s526_s30 = int_to_ptr.vmem [resolvable:$true] %s525_s30  ;;  %s552_s28 = int_to_ptr.vmem [resolvable:$true] %s551_s28 }
  0x79   : > { %s4428_s7 = sld [smem:[#allocation55_spill]] }
  0x7f   : > { %s3023_s29 = scalar_lea.hbm %s4428_s7, 1536 }
  0x80   : > { %p3024_p7 = scmp.ne.s32.totalorder %s4428_s7, %s3023_s29  ;;  %p3030_p1 = scmp.lt.u32.totalorder %s3023_s29, %s4428_s7 }
  0x82   : > { %p3026_p9 = pnand %p3024_p7, %p3700_p8 }
  0x84   : > { %p3027_p4 = pneg %p3026_p9 }
  0x86   : > { %p3032_p3 = pnand %p3030_p1, %p3027_p4 }
  0x88   : > { %3035 = shalt.err (!%p3032_p3)
}
  0x89   : > { %s3036_s21 = scalar_lea.vmem %s526_s30, 1536  ;;  %p3044_p13 = scmp.lt.s32.totalorder %s526_s30, %s526_s30 }
  0x8a   : > { %p3037_p10 = scmp.ne.s32.totalorder %s526_s30, %s3036_s21  ;;  %p3045_p0 = scmp.lt.s32.totalorder %s3036_s21, %s3036_s21 }
  0x8c   : > { %p3039_p11 = pnand %p3037_p10, %p3700_p8  ;;  %p3046_p2 = por %p3045_p0, %p3044_p13 }
  0x8e   : > { %p3040_p12 = pneg %p3039_p11 }
  0x90   : > { %p3047_p5 = pnand %p3046_p2, %p3040_p12 }
  0x92   : > { %3050 = shalt.err (!%p3047_p5)
}
  0x93   : > { %s3534_s3 = smov 128   ;;  %s3535_s16 = smov 8  }
  0x94   : > { %2748 = dma.hbm_to_vmem [thread:$0]  (!%p3686_p6), %s4428_s7, 1536, %s526_s30, [#allocation16], %s3534_s3, %s3534_s3, %s3535_s16  }
  0x95   : > { %s4429_s9 = sld [smem:[#allocation57_spill]] }
  0x9b   : > { %s3051_s22 = scalar_lea.hbm %s4429_s9, 768 }
  0x9c   : > { %p3052_p7 = scmp.ne.s32.totalorder %s4429_s9, %s3051_s22  ;;  %p3058_p1 = scmp.lt.u32.totalorder %s3051_s22, %s4429_s9 }
  0x9e   : > { %p3054_p9 = pnand %p3052_p7, %p3700_p8 }
  0xa0   : > { %p3055_p4 = pneg %p3054_p9 }
  0xa2   : > { %p3060_p3 = pnand %p3058_p1, %p3055_p4 }
  0xa4   : > { %3063 = shalt.err (!%p3060_p3)
}
  0xa5   : > { %s3064_s25 = scalar_lea.vmem %s552_s28, 768  ;;  %p3072_p13 = scmp.lt.s32.totalorder %s552_s28, %s552_s28 }
  0xa6   : > { %p3065_p10 = scmp.ne.s32.totalorder %s552_s28, %s3064_s25  ;;  %p3073_p0 = scmp.lt.s32.totalorder %s3064_s25, %s3064_s25 }
  0xa8   : > { %p3067_p11 = pnand %p3065_p10, %p3700_p8  ;;  %p3074_p2 = por %p3073_p0, %p3072_p13 }
  0xaa   : > { %p3068_p12 = pneg %p3067_p11 }
  0xac   : > { %p3075_p5 = pnand %p3074_p2, %p3068_p12 }
  0xae   : > { %3078 = shalt.err (!%p3075_p5)
}
  0xaf   : > { %2754 = dma.hbm_to_vmem [thread:$0]  (!%p3686_p6), %s4429_s9, 768, %s552_s28, [#allocation19], %s3534_s3, %s3534_s3, %s3535_s16  }
  0xb0   : > { %s3536_s23 = smov [#allocation21]   ;;  %s3537_s22 = smov [#allocation24]  }
  0xb1   : > { %s577_s20 = sshll.u32 %s3536_s23, 4  ;;  %s602_s29 = sshll.u32 %s3537_s22, 4  ;;  %s578_s20 = int_to_ptr.vmem [resolvable:$true] %s577_s20  ;;  %s603_s29 = int_to_ptr.vmem [resolvable:$true] %s602_s29 }
  0xb2   : > { %s3079_s21 = scalar_lea.hbm %s4382_s11, 768 }
  0xb3   : > { %p3080_p7 = scmp.ne.s32.totalorder %s4382_s11, %s3079_s21  ;;  %p3086_p1 = scmp.lt.u32.totalorder %s3079_s21, %s4382_s11 }
  0xb5   : > { %p3082_p9 = pnand %p3080_p7, %p3700_p8 }
  0xb7   : > { %p3083_p4 = pneg %p3082_p9 }
  0xb9   : > { %p3088_p3 = pnand %p3086_p1, %p3083_p4 }
  0xbb   : > { %3091 = shalt.err (!%p3088_p3)
}
  0xbc   : > { %s3092_s28 = scalar_lea.vmem %s578_s20, 768  ;;  %p3100_p13 = scmp.lt.s32.totalorder %s578_s20, %s578_s20 }
  0xbd   : > { %p3093_p10 = scmp.ne.s32.totalorder %s578_s20, %s3092_s28  ;;  %p3101_p0 = scmp.lt.s32.totalorder %s3092_s28, %s3092_s28 }
  0xbf   : > { %p3095_p11 = pnand %p3093_p10, %p3700_p8  ;;  %p3102_p2 = por %p3101_p0, %p3100_p13 }
  0xc1   : > { %p3096_p12 = pneg %p3095_p11 }
  0xc3   : > { %p3103_p5 = pnand %p3102_p2, %p3096_p12 }
  0xc5   : > { %3106 = shalt.err (!%p3103_p5)
}
  0xc6   : > { %2760 = dma.hbm_to_vmem [thread:$0]  (!%p3686_p6), %s4382_s11, 768, %s578_s20, [#allocation22], %s3534_s3, %s3534_s3, %s3535_s16  }
  0xc7   : > { %s3107_s22 = scalar_lea.hbm %s4384_s13, 128 }
  0xc8   : > { %p3108_p7 = scmp.ne.s32.totalorder %s4384_s13, %s3107_s22  ;;  %p3114_p1 = scmp.lt.u32.totalorder %s3107_s22, %s4384_s13 }
  0xca   : > { %p3110_p9 = pnand %p3108_p7, %p3700_p8 }
  0xcc   : > { %p3111_p4 = pneg %p3110_p9 }
  0xce   : > { %p3116_p3 = pnand %p3114_p1, %p3111_p4 }
  0xd0   : > { %3119 = shalt.err (!%p3116_p3)
}
  0xd1   : > { %s3120_s30 = scalar_lea.vmem %s603_s29, 128  ;;  %p3128_p13 = scmp.lt.s32.totalorder %s603_s29, %s603_s29 }
  0xd2   : > { %p3121_p10 = scmp.ne.s32.totalorder %s603_s29, %s3120_s30  ;;  %p3129_p0 = scmp.lt.s32.totalorder %s3120_s30, %s3120_s30 }
  0xd4   : > { %p3123_p11 = pnand %p3121_p10, %p3700_p8  ;;  %p3130_p2 = por %p3129_p0, %p3128_p13 }
  0xd6   : > { %p3124_p12 = pneg %p3123_p11 }
  0xd8   : > { %p3131_p5 = pnand %p3130_p2, %p3124_p12 }
  0xda   : > { %3134 = shalt.err (!%p3131_p5)
}
  0xdb   : > { %2766 = dma.hbm_to_vmem [thread:$0]  (!%p3686_p6), %s4384_s13, 128, %s603_s29, [#allocation25]  }
  0xdc   : > { %s3538_s0 = smov [#allocation11]   ;;  %s3539_s17 = smov [#allocation14]  }
  0xdd   : > { %s486_s24 = sshll.u32 %s3538_s0, 4  ;;  %s512_s23 = sshll.u32 %s3539_s17, 4  ;;  %s487_s24 = int_to_ptr.vmem [resolvable:$true] %s486_s24  ;;  %s513_s23 = int_to_ptr.vmem [resolvable:$true] %s512_s23 }
  0xde   : > { %s4430_s4 = sld [smem:[#allocation52_spill]] }
  0xe4   : > { %s3135_s2 = scalar_lea.hbm %s4430_s4, 256 }
  0xe5   : > { %p3136_p7 = scmp.ne.s32.totalorder %s4430_s4, %s3135_s2  ;;  %p3142_p1 = scmp.lt.u32.totalorder %s3135_s2, %s4430_s4 }
  0xe7   : > { %p3138_p9 = pnand %p3136_p7, %p3700_p8 }
  0xe9   : > { %p3139_p4 = pneg %p3138_p9 }
  0xeb   : > { %p3144_p3 = pnand %p3142_p1, %p3139_p4 }
  0xed   : > { %3147 = shalt.err (!%p3144_p3)
}
  0xee   : > { %s3148_s29 = scalar_lea.vmem %s487_s24, 256  ;;  %p3156_p13 = scmp.lt.s32.totalorder %s487_s24, %s487_s24 }
  0xef   : > { %p3149_p10 = scmp.ne.s32.totalorder %s487_s24, %s3148_s29  ;;  %p3157_p0 = scmp.lt.s32.totalorder %s3148_s29, %s3148_s29 }
  0xf1   : > { %p3151_p11 = pnand %p3149_p10, %p3700_p8  ;;  %p3158_p2 = por %p3157_p0, %p3156_p13 }
  0xf3   : > { %p3152_p12 = pneg %p3151_p11 }
  0xf5   : > { %p3159_p5 = pnand %p3158_p2, %p3152_p12 }
  0xf7   : > { %3162 = shalt.err (!%p3159_p5)
}
  0xf8   : > { %2739 = dma.hbm_to_vmem [thread:$0]  (!%p3686_p6), %s4430_s4, 256, %s487_s24, [#allocation10], %s3534_s3, %s3534_s3, %s3535_s16  }
  0xf9   : > { %s4431_s6 = sld [smem:[#allocation54_spill]] }
  0xff   : > { %s3163_s19 = scalar_lea.hbm %s4431_s6, 768 }
 0x100   : > { %p3164_p7 = scmp.ne.s32.totalorder %s4431_s6, %s3163_s19  ;;  %p3170_p1 = scmp.lt.u32.totalorder %s3163_s19, %s4431_s6 }
 0x102   : > { %p3166_p9 = pnand %p3164_p7, %p3700_p8 }
 0x104   : > { %p3167_p4 = pneg %p3166_p9 }
 0x106   : > { %p3172_p3 = pnand %p3170_p1, %p3167_p4 }
 0x108   : > { %3175 = shalt.err (!%p3172_p3)
}
 0x109   : > { %s3176_s20 = scalar_lea.vmem %s513_s23, 768  ;;  %p3184_p13 = scmp.lt.s32.totalorder %s513_s23, %s513_s23 }
 0x10a   : > { %p3177_p10 = scmp.ne.s32.totalorder %s513_s23, %s3176_s20  ;;  %p3185_p0 = scmp.lt.s32.totalorder %s3176_s20, %s3176_s20 }
 0x10c   : > { %p3179_p11 = pnand %p3177_p10, %p3700_p8  ;;  %p3186_p2 = por %p3185_p0, %p3184_p13 }
 0x10e   : > { %p3180_p12 = pneg %p3179_p11 }
 0x110   : > { %p3187_p5 = pnand %p3186_p2, %p3180_p12 }
 0x112   : > { %3190 = shalt.err (!%p3187_p5)
}
 0x113   : > { %s4432_s3 = smov 4   ;;  %s4433_s16 = smov 64  }
 0x114   : > { %2745 = dma.hbm_to_vmem [thread:$0]  (!%p3686_p6), %s4431_s6, 768, %s513_s23, [#allocation13], %s4433_s16, %s4433_s16, %s4432_s3  }
 0x115   : > { %s3540_s28 = smov [#allocation17]   ;;  %s3541_s17 = smov [#allocation20]  }
 0x116   : > { %s538_s0 = sshll.u32 %s3540_s28, 4  ;;  %s564_s22 = sshll.u32 %s3541_s17, 4  ;;  %s539_s0 = int_to_ptr.vmem [resolvable:$true] %s538_s0  ;;  %s565_s22 = int_to_ptr.vmem [resolvable:$true] %s564_s22 }
 0x117   : > { %s4434_s8 = sld [smem:[#allocation56_spill]] }
 0x11d   : > { %s3191_s21 = scalar_lea.hbm %s4434_s8, 384 }
 0x11e   : > { %p3192_p7 = scmp.ne.s32.totalorder %s4434_s8, %s3191_s21  ;;  %p3198_p1 = scmp.lt.u32.totalorder %s3191_s21, %s4434_s8 }
 0x120   : > { %p3194_p9 = pnand %p3192_p7, %p3700_p8 }
 0x122   : > { %p3195_p4 = pneg %p3194_p9 }
 0x124   : > { %p3200_p3 = pnand %p3198_p1, %p3195_p4 }
 0x126   : > { %3203 = shalt.err (!%p3200_p3)
}
 0x127   : > { %s3204_s23 = scalar_lea.vmem %s539_s0, 384  ;;  %p3212_p13 = scmp.lt.s32.totalorder %s539_s0, %s539_s0 }
 0x128   : > { %p3205_p10 = scmp.ne.s32.totalorder %s539_s0, %s3204_s23  ;;  %p3213_p0 = scmp.lt.s32.totalorder %s3204_s23, %s3204_s23 }
 0x12a   : > { %p3207_p11 = pnand %p3205_p10, %p3700_p8  ;;  %p3214_p2 = por %p3213_p0, %p3212_p13 }
 0x12c   : > { %p3208_p12 = pneg %p3207_p11 }
 0x12e   : > { %p3215_p5 = pnand %p3214_p2, %p3208_p12 }
 0x130   : > { %3218 = shalt.err (!%p3215_p5)
}
 0x131   : > { %2751 = dma.hbm_to_vmem [thread:$0]  (!%p3686_p6), %s4434_s8, 384, %s539_s0, [#allocation16], %s4433_s16, %s4433_s16, %s4432_s3  }
 0x132   : > { %s4435_s10 = sld [smem:[#allocation58_spill]] }
 0x138   : > { %s3219_s2 = scalar_lea.hbm %s4435_s10, 384 }
 0x139   : > { %p3220_p7 = scmp.ne.s32.totalorder %s4435_s10, %s3219_s2  ;;  %p3226_p1 = scmp.lt.u32.totalorder %s3219_s2, %s4435_s10 }
 0x13b   : > { %p3222_p9 = pnand %p3220_p7, %p3700_p8 }
 0x13d   : > { %p3223_p4 = pneg %p3222_p9 }
 0x13f   : > { %p3228_p3 = pnand %p3226_p1, %p3223_p4 }
 0x141   : > { %3231 = shalt.err (!%p3228_p3)
}
 0x142   : > { %s3232_s24 = scalar_lea.vmem %s565_s22, 384  ;;  %p3240_p13 = scmp.lt.s32.totalorder %s565_s22, %s565_s22 }
 0x143   : > { %p3233_p10 = scmp.ne.s32.totalorder %s565_s22, %s3232_s24  ;;  %p3241_p0 = scmp.lt.s32.totalorder %s3232_s24, %s3232_s24 }
 0x145   : > { %p3235_p11 = pnand %p3233_p10, %p3700_p8  ;;  %p3242_p2 = por %p3241_p0, %p3240_p13 }
 0x147   : > { %p3236_p12 = pneg %p3235_p11 }
 0x149   : > { %p3243_p5 = pnand %p3242_p2, %p3236_p12 }
 0x14b   : > { %3246 = shalt.err (!%p3243_p5)
}
 0x14c   : > { %2757 = dma.hbm_to_vmem [thread:$0]  (!%p3686_p6), %s4435_s10, 384, %s565_s22, [#allocation19], %s4433_s16, %s4433_s16, %s4432_s3  }
 0x14d   : > { %s3542_s29 = smov [#allocation23]   ;;  %s3543_s17 = smov [#allocation26]  }
 0x14e   : > { %s591_s28 = sshll.u32 %s3542_s29, 4  ;;  %s613_s19 = sshll.u32 %s3543_s17, 4  ;;  %s592_s28 = int_to_ptr.vmem [resolvable:$true] %s591_s28  ;;  %s614_s19 = int_to_ptr.vmem [resolvable:$true] %s613_s19 }
 0x14f   : > { %s3247_s25 = scalar_lea.hbm %s4383_s12, 64 }
 0x150   : > { %p3248_p7 = scmp.ne.s32.totalorder %s4383_s12, %s3247_s25  ;;  %p3254_p1 = scmp.lt.u32.totalorder %s3247_s25, %s4383_s12 }
 0x152   : > { %p3250_p9 = pnand %p3248_p7, %p3700_p8 }
 0x154   : > { %p3251_p4 = pneg %p3250_p9 }
 0x156   : > { %p3256_p3 = pnand %p3254_p1, %p3251_p4 }
 0x158   : > { %3259 = shalt.err (!%p3256_p3)
}
 0x159   : > { %s3260_s22 = scalar_lea.vmem %s592_s28, 64  ;;  %p3268_p13 = scmp.lt.s32.totalorder %s592_s28, %s592_s28 }
 0x15a   : > { %p3261_p10 = scmp.ne.s32.totalorder %s592_s28, %s3260_s22  ;;  %p3269_p0 = scmp.lt.s32.totalorder %s3260_s22, %s3260_s22 }
 0x15c   : > { %p3263_p11 = pnand %p3261_p10, %p3700_p8  ;;  %p3270_p2 = por %p3269_p0, %p3268_p13 }
 0x15e   : > { %p3264_p12 = pneg %p3263_p11 }
 0x160   : > { %p3271_p5 = pnand %p3270_p2, %p3264_p12 }
 0x162   : > { %3274 = shalt.err (!%p3271_p5)
}
 0x163   : > { %2763 = dma.hbm_to_vmem [thread:$0]  (!%p3686_p6), %s4383_s12, 64, %s592_s28, [#allocation22]  }
 0x164   : > { %s3275_s21 = scalar_lea.hbm %s4385_s14, 64 }
 0x165   : > { %p3276_p7 = scmp.ne.s32.totalorder %s4385_s14, %s3275_s21  ;;  %p3282_p1 = scmp.lt.u32.totalorder %s3275_s21, %s4385_s14 }
 0x167   : > { %p3278_p9 = pnand %p3276_p7, %p3700_p8 }
 0x169   : > { %p3279_p4 = pneg %p3278_p9 }
 0x16b   : > { %p3284_p3 = pnand %p3282_p1, %p3279_p4 }
 0x16d   : > { %3287 = shalt.err (!%p3284_p3)
}
 0x16e   : > { %s3288_s0 = scalar_lea.vmem %s614_s19, 64  ;;  %p3296_p13 = scmp.lt.s32.totalorder %s614_s19, %s614_s19 }
 0x16f   : > { %p3289_p10 = scmp.ne.s32.totalorder %s614_s19, %s3288_s0  ;;  %p3297_p0 = scmp.lt.s32.totalorder %s3288_s0, %s3288_s0 }
 0x171   : > { %p3291_p11 = pnand %p3289_p10, %p3700_p8  ;;  %p3298_p2 = por %p3297_p0, %p3296_p13 }
 0x173   : > { %p3292_p12 = pneg %p3291_p11 }
 0x175   : > { %p3299_p5 = pnand %p3298_p2, %p3292_p12 }
 0x177   : > { %3302 = shalt.err (!%p3299_p5)
}
 0x178   : > { %2769 = dma.hbm_to_vmem [thread:$0]  (!%p3686_p6), %s4385_s14, 64, %s614_s19, [#allocation25]  }
 0x179   : > { %s3544_s23 = smov [#allocation27]   ;;  %s3303_s21 = scalar_lea.hbm %s4386_s15, 128 }
 0x17a   : > { %s624_s29 = sshll.u32 %s3544_s23, 4  ;;  %p3304_p7 = scmp.ne.s32.totalorder %s4386_s15, %s3303_s21  ;;  %s625_s29 = int_to_ptr.vmem [resolvable:$true] %s624_s29 }
 0x17b   : > { %p3310_p1 = scmp.lt.u32.totalorder %s3303_s21, %s4386_s15 }
 0x17c   : > { %p3306_p9 = pnand %p3304_p7, %p3700_p8 }
 0x17e   : > { %p3307_p4 = pneg %p3306_p9 }
 0x180   : > { %p3312_p3 = pnand %p3310_p1, %p3307_p4 }
 0x182   : > { %3315 = shalt.err (!%p3312_p3)
}
 0x183   : > { %s3316_s19 = scalar_lea.vmem %s625_s29, 128  ;;  %p3324_p13 = scmp.lt.s32.totalorder %s625_s29, %s625_s29 }
 0x184   : > { %p3317_p10 = scmp.ne.s32.totalorder %s625_s29, %s3316_s19  ;;  %p3325_p0 = scmp.lt.s32.totalorder %s3316_s19, %s3316_s19 }
 0x186   : > { %p3319_p11 = pnand %p3317_p10, %p3700_p8  ;;  %p3326_p2 = por %p3325_p0, %p3324_p13 }
 0x188   : > { %p3320_p12 = pneg %p3319_p11 }
 0x18a   : > { %p3327_p5 = pnand %p3326_p2, %p3320_p12 }
 0x18c   : > { %3330 = shalt.err (!%p3327_p5)
}
 0x18d   : > { %s4436_s22 = sld [smem:[#allocation45_spill]]  ;;  %s4437_s18 = sld [smem:[#allocation44_spill]] }
 0x18e   : > { %s4438_s23 = sld [smem:[#allocation46_spill]]  ;;  %s2387_s17 = sadd.s32 4294967294, %s3525_s27  }
 0x18f   : > { %2772 = dma.hbm_to_vmem [thread:$0]  (!%p3686_p6), %s4386_s15, 128, %s625_s29, [#allocation28]  }
 0x190   : > { %s3989_s1 = sadd.s32 1, %s3525_s27   ;;  %s54_s21 = sadd.s32 1, %s3521_s26 }
 0x191   : > { %s51_s2 = ssub.s32 %s3525_s27, %s3989_s1  ;;  %p62_p9 = scmp.eq.s32.totalorder %s3525_s27, 0 }
 0x192   : > { %p52_p8 = scmp.eq.s32.totalorder %s51_s2, 0  ;;  %p417_p11 = scmp.eq.s32.totalorder %s2387_s17, 1 }
 0x193   : > { %p61_p7 = scmp.ne.s32.totalorder %s3521_s26, %s4436_s22  ;;  %p67_p4 = scmp.ne.s32.totalorder %s4436_s22, %s4437_s18 }
 0x194   : > { %s4000_s25 = scalar_select %p52_p8, %s3521_s26, %s54_s21  }
 0x195   : > { %p4002_p1 = por %p62_p9, %p61_p7  ;;  %p4440_p3 = scmp.eq.s32.totalorder %s4438_s23, 0 }
 0x196   : > { %p411_p10 = scmp.eq.s32.totalorder %s4438_s23, 1  ;;  %p2801_p12 = scmp.lt.s32.totalorder %s3525_s27, 2 }
 0x197   : > { %p4008_p6 = por %p4440_p3, %p67_p4  ;;  %s4015_s20 = sand.u32 1, %s3521_s26  }
 0x198   : > { %p4017_p13 = por %p411_p10, %p61_p7  ;;  %p4021_p0 = por %p417_p11, %p67_p4 }
 0x199   : > { %s2404_s0 = sshll.u32 %s4015_s20, 3  ;;  %s2405_s28 = sshll.u32 %s3525_s27, 7 }
 0x19a   : > { %s4442_s24 = scalar_select %p4017_p13, 1, 0 }
 0x19b   : > { %s4443_s19 = scalar_select %p4021_p0, 1, 0 }
 0x19c   : > { %s4444_s23 = sld [smem:[#allocation48_spill]]  ;;  %s639_s2 = scalar_lea.vmem [#allocation3], %s2404_s0 }
 0x19d   : > { %s646_s21 = sshll.u32 %s639_s2, 4  ;;  %p4036_p2 = pnand %p2801_p12, %p4002_p1  ;;  %s4032_s21 = int_to_ptr.vmem [resolvable:$true] %s646_s21 }
 0x19e   : > { %s2406_s5 = sshll.u32 %s4015_s20, 5  ;;  %s636_s22 = scalar_lea.sflag [#allocation4], %s4015_s20 }
 0x19f   : > { %p3333_p8 = pneg %p4036_p2 }
 0x1a2   : > { %s4030_s17 = scalar_lea.hbm %s4444_s23, %s2405_s28  ;;  %s3336_s30 = scalar_lea.hbm %s4444_s23, 256 }
 0x1a3   : > { %s3331_s28 = scalar_lea.hbm %s4030_s17, 128  ;;  %p3337_p4 = scmp.lt.u32.totalorder %s4030_s17, %s4444_s23 }
 0x1a4   : > { %p3332_p5 = scmp.ne.s32.totalorder %s4030_s17, %s3331_s28  ;;  %p3338_p1 = scmp.lt.u32.totalorder %s3336_s30, %s3331_s28 }
 0x1a5   : > { %p3340_p10 = scmp.lt.u32.totalorder %s3331_s28, %s4030_s17 }
 0x1a6   : > { %p3334_p7 = pnand %p3333_p8, %p3332_p5  ;;  %p3339_p3 = por %p3338_p1, %p3337_p4 }
 0x1a8   : > { %p3335_p9 = pneg %p3334_p7  ;;  %p3341_p11 = por %p3340_p10, %p3339_p3 }
 0x1aa   : > { %p3342_p12 = pnand %p3341_p11, %p3335_p9 }
 0x1ac   : > { %3345 = shalt.err (!%p3342_p12)
}
 0x1ad   : > { %s3346_s6 = scalar_lea.vmem %s4032_s21, 128  ;;  %s3545_s0 = smov [#allocation3]  }
 0x1ae   : > { %p3347_p5 = scmp.ne.s32.totalorder %s4032_s21, %s3346_s6  ;;  %s3351_s18 = sshll.u32 %s3545_s0, 4  ;;  %s3352_s18 = int_to_ptr.vmem [resolvable:$false] %s3351_s18 }
 0x1af   : > { %s3353_s7 = scalar_lea.vmem %s3352_s18, 256  ;;  %p3354_p13 = scmp.lt.s32.totalorder %s4032_s21, %s3352_s18 }
 0x1b0   : > { %p3349_p7 = pnand %p3347_p5, %p3333_p8  ;;  %p3355_p4 = scmp.lt.s32.totalorder %s3353_s7, %s3346_s6 }
 0x1b2   : > { %p3350_p0 = pneg %p3349_p7  ;;  %p3356_p1 = por %p3355_p4, %p3354_p13 }
 0x1b4   : > { %p3357_p3 = pnand %p3356_p1, %p3350_p0 }
 0x1b6   : > { %3360 = shalt.err (!%p3357_p3)
}
 0x1b7   : > { %2776 = dma.hbm_to_vmem [thread:$0]  (!%p4036_p2), %s4030_s17, 128, %s4032_s21, %s636_s22  }
 0x1b8   : > { %s657_s28 = scalar_lea.vmem [#allocation6], %s2406_s5  ;;  %s2481_s2 = sshll.u32 %s3525_s27, 9 }
 0x1b9   : > { %s664_s30 = sshll.u32 %s657_s28, 4  ;;  %s4446_s18 = sld [smem:[#allocation49_spill]]  ;;  %s4070_s30 = int_to_ptr.vmem [resolvable:$true] %s664_s30 }
 0x1ba   : > { %s4447_s8 = sand.u32 1, %s3525_s27  }
 0x1bb   : > { %s4080_s9 = scalar_lea.sflag [#allocation7], %s4447_s8 }
 0x1bf   : > { %s4076_s7 = scalar_lea.hbm %s4446_s18, %s2481_s2  ;;  %s3366_s17 = scalar_lea.hbm %s4446_s18, 1024 }
 0x1c0   : > { %s3361_s10 = scalar_lea.hbm %s4076_s7, 512  ;;  %p3367_p10 = scmp.lt.u32.totalorder %s4076_s7, %s4446_s18 }
 0x1c1   : > { %p3362_p13 = scmp.ne.s32.totalorder %s4076_s7, %s3361_s10  ;;  %p3368_p11 = scmp.lt.u32.totalorder %s3366_s17, %s3361_s10 }
 0x1c2   : > { %p3370_p5 = scmp.lt.u32.totalorder %s3361_s10, %s4076_s7 }
 0x1c3   : > { %p3364_p0 = pnand %p3362_p13, %p3333_p8  ;;  %p3369_p12 = por %p3368_p11, %p3367_p10 }
 0x1c5   : > { %p3365_p9 = pneg %p3364_p0  ;;  %p3371_p7 = por %p3370_p5, %p3369_p12 }
 0x1c7   : > { %p3372_p4 = pnand %p3371_p7, %p3365_p9 }
 0x1c9   : > { %3375 = shalt.err (!%p3372_p4)
}
 0x1ca   : > { %s3376_s8 = scalar_lea.vmem %s4070_s30, 512  ;;  %s3546_s28 = smov [#allocation6]  }
 0x1cb   : > { %p3377_p1 = scmp.ne.s32.totalorder %s4070_s30, %s3376_s8  ;;  %s3381_s2 = sshll.u32 %s3546_s28, 4  ;;  %s3382_s2 = int_to_ptr.vmem [resolvable:$false] %s3381_s2 }
 0x1cc   : > { %s3383_s0 = scalar_lea.vmem %s3382_s2, 1024  ;;  %p3384_p0 = scmp.lt.s32.totalorder %s4070_s30, %s3382_s2 }
 0x1cd   : > { %p3379_p3 = pnand %p3377_p1, %p3333_p8  ;;  %p3385_p10 = scmp.lt.s32.totalorder %s3383_s0, %s3376_s8 }
 0x1cf   : > { %p3380_p13 = pneg %p3379_p3  ;;  %p3386_p11 = por %p3385_p10, %p3384_p0 }
 0x1d1   : > { %p3387_p12 = pnand %p3386_p11, %p3380_p13 }
 0x1d3   : > { %3390 = shalt.err (!%p3387_p12)
}
 0x1d4   : > { %2779 = dma.hbm_to_vmem [thread:$0]  (!%p4036_p2), %s4076_s7, 512, %s4070_s30, %s4080_s9, %s4433_s16, %s4433_s16, %s4432_s3  }
 0x1d5   : > { %s4448_s10 = sld [smem:[#allocation47_spill]] }
 0x1db   : > { %p4449_p8 = scmp.ne.s32.totalorder %s4448_s10, 0 }
 0x1dc   : > { %s4450_s6 = sld [smem:[#allocation45_spill]] (!%p4449_p8) }
 0x1dd   : > { %676 = sbr.rel (%p4449_p8) target bundleno = 3531 (0xdcb), region = 84 }
 0x1e2   : > { %s4112_s5 = sand.u32 (!%p4449_p8), 1, %s4450_s6  }
 0x1e3   : > { %s2410_s20 = sshll.u32 (!%p4449_p8), %s4112_s5, 3  ;;  %s679_s17 = scalar_lea.sflag (!%p4449_p8), [#allocation4], %s4112_s5 }
 0x1e4   : > { %s4118_s4 = scalar_lea.vmem [#allocation3], %s2410_s20 }
 0x1e5   : > { %3464 = dma.done.wait (%p4008_p6), %s679_s17, 128  }
 0x1e6   : > { %3466 = vsyncadd (%p4008_p6), %s679_s17, 4294967168  ;;  %s4451_s9 = sld [smem:[#allocation46_spill]]  ;;  %s2411_s16 = sshll.u32 %s4112_s5, 5 }
 0x1e7   : > { %s4126_s7 = scalar_lea.vmem [#allocation6], %s2411_s16 }
 0x1ec   : > { %s687_s3 = sand.u32 1, %s4451_s9  }
 0x1ed   : > { %s688_s30 = scalar_lea.sflag [#allocation7], %s687_s3 }
 0x1ee   : > { %3468 = dma.done.wait (%p4008_p6), %s688_s30, 512  }
 0x1ef   : > { %3470 = vsyncadd (%p4008_p6), %s688_s30, 4294966784  ;;  %p4452_p2 = scmp.eq.s32.totalorder %s4451_s9, 0 }
 0x1f1   : > { %3472 = dma.done.wait (%p4452_p2), [#allocation7], 128   ;;  %p4453_p9 = pmov %p4452_p2 }
 0x1f2   : > { %p4454_p5 = pmov %p4452_p2 }
 0x1f3   : > { %3474 = vsyncadd (%p4453_p9), [#allocation7], 4294967168 }
 0x1f4   : > { %3476 = dma.done.wait (%p4454_p5), [#allocation10], 384   ;;  %p4455_p7 = pmov %p4452_p2 }
 0x1f5   : > { %p4456_p4 = pmov %p4452_p2 }
 0x1f6   : > { %3478 = vsyncadd (%p4455_p7), [#allocation10], 4294966912 }
 0x1f7   : > { %3480 = dma.done.wait (%p4456_p4), [#allocation13], 1536   ;;  %p4457_p1 = pmov %p4452_p2 }
 0x1f9   : > { %3482 = vsyncadd (%p4457_p1), [#allocation13], 4294965760  ;;  %p4458_p6 = pmov %p4457_p1 }
 0x1fa   : > { %p4459_p3 = pmov %p4457_p1 }
 0x1fb   : > { %3484 = dma.done.wait (%p4458_p6), [#allocation16], 1920  }
 0x1fc   : > { %3486 = vsyncadd (%p4459_p3), [#allocation16], 4294965376  ;;  %p4460_p13 = pmov %p4457_p1 }
 0x1fd   : > { %p4461_p0 = pmov %p4457_p1 }
 0x1fe   : > { %3488 = dma.done.wait (%p4460_p13), [#allocation19], 1152  }
 0x1ff   : > { %3490 = vsyncadd (%p4461_p0), [#allocation19], 4294966144  ;;  %p4462_p10 = pmov %p4461_p0 }
 0x200   : > { %p4463_p11 = pmov %p4461_p0 }
 0x201   : > { %3492 = dma.done.wait (%p4462_p10), [#allocation22], 832  }
 0x202   : > { %3494 = vsyncadd (%p4463_p11), [#allocation22], 4294966464  ;;  %p4464_p12 = pmov %p4461_p0 }
 0x203   : > { %p4465_p8 = pmov %p4461_p0 }
 0x204   : > { %3496 = dma.done.wait (%p4464_p12), [#allocation25], 192  }
 0x205   : > { %3498 = vsyncadd (%p4465_p8), [#allocation25], 4294967104  ;;  %p4466_p2 = pmov %p4461_p0 }
 0x206   : > { %p4467_p9 = pmov %p4461_p0 }
 0x207   : > { %3500 = dma.done.wait (%p4466_p2), [#allocation28], 128  }
 0x208   : > { %3502 = vsyncadd (%p4467_p9), [#allocation28], 4294967168  ;;  %v3547_v0 = vmov 0.0   ;;  %vm3548_vm0 = vmmov 0   ;;  %vm810_vm1 = vcmask 64512   ;;  %v809_v1 = vld [vmem:[%s4118_s4] sm:$0xff] }
 0x209   : > { %2533 = vmatprep.subr.mxu0 %v3547_v0  ;;  %2535 = vmatprep.mubr.msk.f32.mxu0 %vm3548_vm0, %v3547_v0  ;;  %v808_v2 = vld [vmem:[#allocation8] sm:$0xff]  ;;  %v895_v3 = vld [vmem:[#allocation11] sm:$0xff]  ;;  %v3549_v4 = vmov 0   ;;  %v896_v5 = vld [vmem:[#allocation11 + $0x8] sm:$0xff]  ;;  %vm915_vm2 = vcmask 1043456   ;;  %s3550_s29 = smov 126  }
 0x20a   : > { %2538 = vmatprep.subr.bf16.mxu1 %v3547_v0  ;;  %2540 = vmatprep.mubr.msk.bf16.mxu1 %vm3548_vm0, %v3547_v0  ;;  %v2879_v10 = vld [vmem:[#allocation9] sm:$0xff]   ;;  %v4185_v11 = vld [vmem:[%s4126_s7] sm:$0xff]   ;;  %v4195_v13 = vld [vmem:[%s4126_s7 + $0x10] sm:$0xff]   ;;  %vm1022_vm3 = vcmask 523264   ;;  %s3551_s21 = smov 1   ;;  %s3552_s22 = smov 127  }
 0x20b   : > { %2534 = vmatpush3.msra.mxu0 %v809_v1  ;;  %2877 = vset.pattern.permute.xlu0 %v3549_v4  ;;  %v4188_v12 = vld [vmem:[%s4126_s7 + $0x8] sm:$0xff]   ;;  %v4200_v15 = vld [vmem:[%s4126_s7 + $0x18] sm:$0xff]   ;;  %v2884_v18 = vld [vmem:[#allocation14] sm:$0xff]   ;;  %vm1105_vm4 = vcmask 392192   ;;  %vm978_vm5 = vcmask 1031168   ;;  %vm1099_vm6 = vcmask 7168  }
 0x20c   : > { %2536 = vmatmul.mubr.msk.f32.vlgmr.msra.gmra.mrb[0].mxu0 %vm810_vm1, %v808_v2  ;;  %2878 = vset.pattern.permute.xlu1 %v3549_v4  ;;  %v2885_v21 = vld [vmem:[#allocation14 + $0x8] sm:$0xff]   ;;  %v2886_v26 = vld [vmem:[#allocation12] sm:$0xff]   ;;  %v1163_v31 = vld [vmem:[#allocation15 + $0x10] sm:$0xff]  ;;  %vm1213_vm7 = vcmask 130048   ;;  %s3553_s8 = smov 124   ;;  %s3554_s28 = smov 2  }
 0x20d   : > { %899 = vperm.xlu0 %2877, %v895_v3   ;;  %2544 = vmatprep.subr.bf16.mxu0 %v4185_v11  ;;  %v1161_v35 = vld [vmem:[#allocation15] sm:$0xff]  ;;  %v1260_v36 = vld [vmem:[#allocation18] sm:$0xff]  ;;  %v1162_v38 = vld [vmem:[#allocation15 + $0x8] sm:$0xff]  ;;  %vm1352_vm8 = vcmask 1014784   ;;  %vm1450_vm9 = vcmask 15360   ;;  %s3555_s2 = smov 120  }
 0x20e   : > { %2545 = vmatpush3.bf16.msra.mxu0 %v4185_v11  ;;  %2552 = vmatprep.mubr.msk.bf16.mxu0 %vm1022_vm3, %v2884_v18  ;;  %v1164_v37 = vld [vmem:[#allocation15 + $0x18] sm:$0xff]  ;;  %v1261_v39 = vld [vmem:[#allocation18 + $0x8] sm:$0xff]  ;;  %v2887_v44 = vld [vmem:[#allocation12 + $0x8] sm:$0xff]   ;;  %s3556_s0 = smov 4   ;;  %vm1710_vm10 = vcmask 982016   ;;  %vm1808_vm11 = vcmask 31744  }
 0x20f   : > { %2546 = vmatprep.subr.bf16.mxu0 %v4188_v12  ;;  %s800_s10 = scalar_lea.vmem [#allocation29], %s2410_s20  ;;  %s2477_s6 = sshll.u32 %s4451_s9, 7 }
 0x210   : > { %s2120_s17 = sshll.u32 %s800_s10, 4  ;;  %s4468_s16 = sld [smem:[#allocation59_spill]]  ;;  %s2121_s17 = int_to_ptr.vmem [resolvable:$true] %s2120_s17 }
 0x211   : > { %904 = vperm.xlu0 %2877, %v896_v5   ;;  %s2103_s7 = scalar_lea.sflag [#allocation5], %s4112_s5  ;;  %p4469_p7 = scmp.ne.s32.totalorder %s4442_s24, 0 }
 0x212   : > { %2547 = vmatpush3.bf16.msra.mxu0 %v4188_v12 }
 0x213   : > { %2548 = vmatprep.subr.bf16.mxu0 %v4195_v13 }
 0x215   : > { %976 = vrot.lane.b32.xlu0 %v3549_v4, %s3550_s29 }
 0x216   : > { %2549 = vmatpush3.bf16.msra.mxu0 %v4195_v13  ;;  %s4302_s30 = scalar_lea.hbm %s4468_s16, %s2477_s6 }
 0x217   : > { %2550 = vmatprep.subr.bf16.mxu0 %v4200_v15 }
 0x21a   : > { %2551 = vmatpush3.bf16.msra.mxu0 %v4200_v15 }
 0x21d   : > { %2553 = vmatmul.mubr.msk.bf16.vlgmr.msra.gmra.mrb[4].mxu0 %vm1022_vm3, %v2885_v21  ;;  %v2890_v21 = vld [vmem:[#allocation14 + $0x10] sm:$0xff]  }
 0x21e   : > { %2562 = vmatprep.mubr.msk.bf16.mxu0 %vm1105_vm4, %v2886_v26  ;;  %v2891_v26 = vld [vmem:[#allocation14 + $0x18] sm:$0xff]  }
 0x28c   : > { %v900_v14 = vpop.permute.xlu0 %899 }
 0x290   : > { %v905_v19 = vpop.permute.xlu0 %904 }
 0x294   : > { %v977_v28 = vpop.permute.xlu0 %976 }
 0x2df   : > { %v4174_v6 = vpop.f32.mrb[0].mxu0 }
 0x2e0   : > { %v884_v7 = vpack.c.bf16 %v4174_v6, %v4174_v6  ;;  %v2537_v8 = vpop.f32.mrb[1].mxu0 }
 0x2e2   : > { %v917_v9 = vsel %vm915_vm2, %v884_v7, 0 }
 0x2e3   : > { %2539 = vmatpush3.bf16.msra.mxu1 %v917_v9  ;;  %v2888_v9 = vld [vmem:[#allocation17] sm:$0xff]  }
 0x2e4   : > { %2566 = vmatprep.subr.bf16.mxu1 %v3547_v0 }
 0x2e6   : > { %2541 = vmatmul.mubr.msk.bf16.vlgmr.msra.gmra.mrb[0].mxu1 %vm810_vm1, %v2879_v10  ;;  %v2889_v10 = vld [vmem:[#allocation20] sm:$0xff]  }
 0x2e7   : > { %2568 = vmatprep.mubr.msk.bf16.mxu1 %vm3548_vm0, %v3547_v0 }
 0x3b9   : > { %v953_v16 = vpop.f32.mrb[0].mxu1 }
 0x3ba   : > { %v2542_v17 = vpop.f32.mrb[1].mxu1  ;;  %v4204_v22 = vadd.f32 %v953_v16, %v900_v14 }
 0x3bb   : > { %v956_v20 = vpop.f32.mrb[2].mxu1 }
 0x3bc   : > { %v4206_v23 = vadd.f32 %v956_v20, %v905_v19  ;;  %v2543_v24 = vpop.f32.mrb[3].mxu1 }
 0x3be   : > { %v963_v25 = vpack.c.bf16 %v4206_v23, %v4204_v22 }
 0x3c0   : > { %1091 = vrot.lane.b32.xlu0 %v963_v25, %s3551_s21  ;;  %970 = vrot.lane.b32.xlu1 %v963_v25, %s3552_s22 }
 0x3c4   : > { %974 = vrot.lane.b32.xlu1 %v963_v25, %s3550_s29 }
 0x3c8   : > { %1089 = vrot.lane.b32.xlu1 %v3549_v4, %s3551_s21 }
 0x432   : > { %v971_v27 = vpop.permute.xlu1 %970  ;;  %v1092_v32 = vpop.permute.xlu0 %1091 }
 0x433   : > { %1093 = vrot.lane.b32.xlu1 %v971_v27, %s3551_s21 }
 0x436   : > { %v975_v29 = vpop.permute.xlu1 %974 }
 0x437   : > { %1095 = vrot.lane.b32.xlu0 %v975_v29, %s3551_s21  ;;  %v979_v30 = vsel %vm978_vm5, %v975_v29, %v977_v28 }
 0x438   : > { %1097 = vrot.lane.b32.xlu1 %v979_v30, %s3551_s21  ;;  %s3557_s21 = smov [#allocation29]  }
 0x439   : > { %s3395_s22 = sshll.u32 %s3557_s21, 4  ;;  %s3396_s22 = int_to_ptr.vmem [resolvable:$false] %s3395_s22 }
 0x43a   : > { %v1090_v33 = vpop.permute.xlu1 %1089  ;;  %p3398_p6 = scmp.lt.s32.totalorder %s2121_s17, %s3396_s22 }
 0x43b   : > { %1177 = vperm.xlu0 %2877, %v1163_v31   ;;  %v1100_v34 = vsel %vm1099_vm6, %v1090_v33, %v1092_v32  ;;  %v1514_v31 = vld [vmem:[#allocation15 + $0x30] sm:$0xff] }
 0x43c   : > { %2556 = vmatprep.subr.bf16.mxu0 %v1100_v34  ;;  %1182 = vperm.xlu1 %2878, %v1164_v37  }
 0x43d   : > { %2557 = vmatpush3.bf16.msra.mxu0 %v1100_v34 }
 0x43f   : > { %1167 = vperm.xlu0 %2877, %v1161_v35   ;;  %v1512_v35 = vld [vmem:[#allocation15 + $0x20] sm:$0xff] }
 0x440   : > { %1172 = vperm.xlu1 %2878, %v1162_v38  }
 0x443   : > { %1264 = vperm.xlu0 %2877, %v1260_v36   ;;  %v1515_v36 = vld [vmem:[#allocation15 + $0x38] sm:$0xff] }
 0x444   : > { %1269 = vperm.xlu1 %2878, %v1261_v39   ;;  %v1612_v39 = vld [vmem:[#allocation18 + $0x10] sm:$0xff] }
 0x4a5   : > { %v1094_v40 = vpop.permute.xlu1 %1093 }
 0x4a6   : > { %2558 = vmatprep.subr.bf16.mxu0 %v1094_v40 }
 0x4a7   : > { %2559 = vmatpush3.bf16.msra.mxu0 %v1094_v40  ;;  %v1513_v40 = vld [vmem:[#allocation15 + $0x28] sm:$0xff] }
 0x4a9   : > { %v1096_v41 = vpop.permute.xlu0 %1095 }
 0x4aa   : > { %v1098_v42 = vpop.permute.xlu1 %1097 }
 0x4ab   : > { %v1101_v43 = vsel %vm1099_vm6, %v1096_v41, %v1098_v42  ;;  %v1613_v41 = vld [vmem:[#allocation18 + $0x18] sm:$0xff] }
 0x4ac   : > { %2560 = vmatprep.subr.bf16.mxu0 %v1101_v43 }
 0x4ad   : > { %2561 = vmatpush3.bf16.msra.mxu0 %v1101_v43 }
 0x4ae   : > { %2600 = vmatprep.subr.bf16.mxu0 %v3547_v0 }
 0x4b0   : > { %2563 = vmatmul.mubr.msk.bf16.vlgmr.msra.gmra.mrb[4].mxu0 %vm1105_vm4, %v2887_v44 }
 0x4b1   : > { %2602 = vmatprep.mubr.msk.bf16.mxu0 %vm3548_vm0, %v3547_v0 }
 0x4ba   : > { %v1178_v45 = vpop.permute.xlu0 %1177 }
 0x4bb   : > { %v1183_v49 = vpop.permute.xlu1 %1182 }
 0x4be   : > { %v1168_v55 = vpop.permute.xlu0 %1167 }
 0x4bf   : > { %v1173_v57 = vpop.permute.xlu1 %1172 }
 0x4c2   : > { %v1265_v24 = vpop.permute.xlu0 %1264 }
 0x4c3   : > { %v1270_v25 = vpop.permute.xlu1 %1269 }
 0x583   : > { %v2564_v46 = vpop.f32.mrb[4].mxu0 }
 0x584   : > { %v1187_v47 = vadd.f32 %v2564_v46, %v1178_v45  ;;  %v1146_v48 = vpop.f32.mrb[5].mxu0 }
 0x585   : > { %v2565_v50 = vpop.f32.mrb[6].mxu0  ;;  %v1185_v56 = vadd.f32 %v1168_v55, %v1146_v48 }
 0x586   : > { %v2442_v51 = vmul.f32 -1.442695, %v1187_v47  ;;  %v1188_v52 = vadd.f32 %v2565_v50, %v1183_v49  ;;  %v1149_v53 = vpop.f32.mrb[7].mxu0  ;;  %v2893_v50 = vld [vmem:[#allocation12 + $0x18] sm:$0xff]  }
 0x587   : > { %v1186_v59 = vadd.f32 %v1173_v57, %v1149_v53 }
 0x588   : > { %2901 = vpow2.f32 %v2442_v51  ;;  %v2443_v54 = vmul.f32 -1.442695, %v1188_v52 }
 0x58a   : > { %2903 = vpow2.f32 %v2443_v54 }
 0x58b   : > { %2905 = vtanh.f32 %v1185_v56 }
 0x592   : > { %v2902_v58 = vpop.eup %2901 }
 0x593   : > { %v1197_v60 = vadd.f32 1.0, %v2902_v58 }
 0x594   : > { %v2904_v61 = vpop.eup %2903 }
 0x595   : > { %2907 = vrcp.f32 %v1197_v60  ;;  %v1198_v62 = vadd.f32 1.0, %v2904_v61  ;;  %v2906_v63 = vpop.eup %2905 }
 0x596   : > { %2909 = vtanh.f32 %v1186_v59 }
 0x597   : > { %2911 = vrcp.f32 %v1198_v62 }
 0x59f   : > { %v2908_v1 = vpop.eup %2907 }
 0x5a0   : > { %v2910_v2 = vpop.eup %2909  ;;  %v1203_v3 = vmul.f32 %v2908_v1, %v2906_v63 }
 0x5a1   : > { %v2912_v5 = vpop.eup %2911 }
 0x5a2   : > { %v1204_v7 = vmul.f32 %v2912_v5, %v2910_v2 }
 0x5a4   : > { %v1205_v8 = vpack.c.bf16 %v1204_v7, %v1203_v3 }
 0x5a6   : > { %2567 = vmatpush3.bf16.msra.mxu1 %v1205_v8 }
 0x5a7   : > { %2572 = vmatprep.subr.bf16.mxu1 %v3547_v0 }
 0x5a9   : > { %2569 = vmatmul.mubr.msk.bf16.vlgmr.msra.gmra.mrb[4].mxu1 %vm1213_vm7, %v2888_v9 }
 0x5aa   : > { %2573 = vmatpush3.bf16.msra.mxu1 %v1205_v8  ;;  %2574 = vmatprep.mubr.msk.bf16.mxu1 %vm3548_vm0, %v3547_v0 }
 0x5ab   : > { %2578 = vmatprep.subr.bf16.mxu1 %v4185_v11 }
 0x5b1   : > { %2575 = vmatmul.mubr.msk.bf16.vlgmr.msra.gmra.mrb[8].mxu1 %vm1213_vm7, %v2889_v10 }
 0x5b2   : > { %2579 = vmatpush3.bf16.msra.mxu1 %v4185_v11  ;;  %2586 = vmatprep.mubr.msk.bf16.mxu1 %vm1022_vm3, %v2890_v21 }
 0x5b3   : > { %2580 = vmatprep.subr.bf16.mxu1 %v4188_v12 }
 0x5b6   : > { %2581 = vmatpush3.bf16.msra.mxu1 %v4188_v12 }
 0x5b7   : > { %2582 = vmatprep.subr.bf16.mxu1 %v4195_v13 }
 0x5ba   : > { %2583 = vmatpush3.bf16.msra.mxu1 %v4195_v13 }
 0x5bb   : > { %2584 = vmatprep.subr.bf16.mxu1 %v4200_v15 }
 0x5be   : > { %2585 = vmatpush3.bf16.msra.mxu1 %v4200_v15 }
 0x5c1   : > { %2587 = vmatmul.mubr.msk.bf16.vlgmr.msra.gmra.mrb[12].mxu1 %vm1022_vm3, %v2891_v26 }
 0x67c   : > { %v1251_v14 = vpop.f32.mrb[4].mxu1 }
 0x67d   : > { %v1258_v16 = vadd.f32 %v1251_v14, %v4204_v22  ;;  %v2570_v17 = vpop.f32.mrb[5].mxu1 }
 0x67e   : > { %v1254_v18 = vpop.f32.mrb[6].mxu1 }
 0x67f   : > { %v1259_v19 = vadd.f32 %v1254_v18, %v4206_v23  ;;  %v2571_v20 = vpop.f32.mrb[7].mxu1  ;;  %v4236_v27 = vadd.f32 %v1265_v24, %v1258_v16  ;;  %v2892_v23 = vld [vmem:[#allocation12 + $0x10] sm:$0xff]  }
 0x680   : > { %2596 = vmatprep.mubr.msk.bf16.mxu1 %vm1105_vm4, %v2892_v23  ;;  %v2895_v20 = vld [vmem:[#allocation20 + $0x8] sm:$0xff]  }
 0x681   : > { %v4238_v28 = vadd.f32 %v1270_v25, %v1259_v19  ;;  %v2894_v19 = vld [vmem:[#allocation17 + $0x8] sm:$0xff]   ;;  %v2896_v23 = vld [vmem:[#allocation14 + $0x20] sm:$0xff]  }
 0x683   : > { %v1337_v22 = vpack.c.bf16 %v4238_v28, %v4236_v27 }
 0x684   : > { %v4251_v42 = vpop.f32.mrb[8].mxu1 }
 0x685   : > { %1348 = vrot.lane.b32.xlu1 %v1337_v22, %s3553_s8  ;;  %1344 = vrot.lane.b32.xlu0 %v1337_v22, %s3550_s29  ;;  %v2576_v43 = vpop.f32.mrb[9].mxu1  ;;  %s3391_s29 = scalar_lea.vmem %s2121_s17, 128 }
 0x686   : > { %v4253_v44 = vpop.f32.mrb[10].mxu1  ;;  %p3392_p5 = scmp.ne.s32.totalorder %s2121_s17, %s3391_s29 }
 0x687   : > { %v2577_v45 = vpop.f32.mrb[11].mxu1 }
 0x688   : > { %v1681_v45 = vld [vmem:[#allocation21 + $0x10] sm:$0xff]  ;;  %p3393_p4 = pnand %p3392_p5, %p4469_p7 }
 0x689   : > { %1350 = vrot.lane.b32.xlu0 %v3549_v4, %s3553_s8  ;;  %1440 = vrot.lane.b32.xlu1 %v3549_v4, %s3554_s28 }
 0x68a   : > { %p3394_p1 = pneg %p3393_p4 }
 0x68d   : > { %1442 = vrot.lane.b32.xlu0 %v1337_v22, %s3554_s28 }
 0x6f7   : > { %v1349_v29 = vpop.permute.xlu1 %1348  ;;  %v1345_v30 = vpop.permute.xlu0 %1344 }
 0x6f8   : > { %1446 = vrot.lane.b32.xlu0 %v1349_v29, %s3554_s28  ;;  %1444 = vrot.lane.b32.xlu1 %v1345_v30, %s3554_s28 }
 0x6fb   : > { %v1351_v32 = vpop.permute.xlu0 %1350  ;;  %v1441_v34 = vpop.permute.xlu1 %1440 }
 0x6fc   : > { %1528 = vperm.xlu0 %2877, %v1514_v31   ;;  %v1353_v33 = vsel %vm1352_vm8, %v1349_v29, %v1351_v32 }
 0x6fd   : > { %1448 = vrot.lane.b32.xlu1 %v1353_v33, %s3554_s28  ;;  %v1872_v33 = vld [vmem:[#allocation15 + $0x50] sm:$0xff] }
 0x6ff   : > { %v1443_v37 = vpop.permute.xlu0 %1442 }
 0x700   : > { %1518 = vperm.xlu0 %2877, %v1512_v35   ;;  %v1451_v38 = vsel %vm1450_vm9, %v1441_v34, %v1443_v37  ;;  %v1870_v37 = vld [vmem:[#allocation15 + $0x40] sm:$0xff] }
 0x701   : > { %1533 = vperm.xlu1 %2878, %v1515_v36   ;;  %2590 = vmatprep.subr.bf16.mxu1 %v1451_v38 }
 0x702   : > { %2591 = vmatpush3.bf16.msra.mxu1 %v1451_v38  ;;  %v1873_v38 = vld [vmem:[#allocation15 + $0x58] sm:$0xff] }
 0x704   : > { %1616 = vperm.xlu0 %2877, %v1612_v39  }
 0x705   : > { %1523 = vperm.xlu1 %2878, %v1513_v40   ;;  %v1276_v40 = vld [vmem:[#allocation21] sm:$0xff] }
 0x709   : > { %1621 = vperm.xlu1 %2878, %v1613_v41   ;;  %v1871_v41 = vld [vmem:[#allocation15 + $0x48] sm:$0xff] }
 0x76a   : > { %v1445_v46 = vpop.permute.xlu1 %1444  ;;  %v1447_v47 = vpop.permute.xlu0 %1446 }
 0x76b   : > { %2592 = vmatprep.subr.bf16.mxu1 %v1445_v46 }
 0x76c   : > { %2593 = vmatpush3.bf16.msra.mxu1 %v1445_v46 }
 0x76f   : > { %v1449_v48 = vpop.permute.xlu1 %1448 }
 0x770   : > { %v1452_v49 = vsel %vm1450_vm9, %v1447_v47, %v1449_v48  ;;  %v1277_v47 = vld [vmem:[#allocation21 + $0x8] sm:$0xff]  ;;  %v1970_v48 = vld [vmem:[#allocation21 + $0x20] sm:$0xff] }
 0x771   : > { %2594 = vmatprep.subr.bf16.mxu1 %v1452_v49 }
 0x772   : > { %2595 = vmatpush3.bf16.msra.mxu1 %v1452_v49 }
 0x773   : > { %2634 = vmatprep.subr.bf16.mxu1 %v3547_v0 }
 0x775   : > { %2597 = vmatmul.mubr.msk.bf16.vlgmr.msra.gmra.mrb[12].mxu1 %vm1105_vm4, %v2893_v50  ;;  %v1682_v50 = vld [vmem:[#allocation21 + $0x18] sm:$0xff] }
 0x776   : > { %2636 = vmatprep.mubr.msk.bf16.mxu1 %vm3548_vm0, %v3547_v0 }
 0x77b   : > { %v1529_v51 = vpop.permute.xlu0 %1528 }
 0x77f   : > { %v1519_v61 = vpop.permute.xlu0 %1518 }
 0x780   : > { %v1534_v55 = vpop.permute.xlu1 %1533 }
 0x783   : > { %v1617_v29 = vpop.permute.xlu0 %1616 }
 0x784   : > { %v1524_v63 = vpop.permute.xlu1 %1523 }
 0x788   : > { %v1622_v30 = vpop.permute.xlu1 %1621 }
 0x848   : > { %v2598_v52 = vpop.f32.mrb[12].mxu1 }
 0x849   : > { %v1538_v53 = vadd.f32 %v2598_v52, %v1529_v51  ;;  %v1496_v54 = vpop.f32.mrb[13].mxu1  ;;  %v2036_v52 = vld [vmem:[#allocation27] sm:$0xff] }
 0x84a   : > { %v2599_v56 = vpop.f32.mrb[14].mxu1  ;;  %v1536_v62 = vadd.f32 %v1519_v61, %v1496_v54  ;;  %v1986_v54 = vld [vmem:[#allocation24] sm:$0xff] }
 0x84b   : > { %v2456_v57 = vmul.f32 -1.442695, %v1538_v53  ;;  %v1539_v58 = vadd.f32 %v2599_v56, %v1534_v55  ;;  %v1499_v59 = vpop.f32.mrb[15].mxu1  ;;  %v1971_v53 = vld [vmem:[#allocation21 + $0x28] sm:$0xff] }
 0x84c   : > { %v1537_v2 = vadd.f32 %v1524_v63, %v1499_v59  ;;  %v2899_v59 = vld [vmem:[#allocation12 + $0x28] sm:$0xff]  }
 0x84d   : > { %2913 = vpow2.f32 %v2456_v57  ;;  %v2457_v60 = vmul.f32 -1.442695, %v1539_v58 }
 0x84f   : > { %2915 = vpow2.f32 %v2457_v60 }
 0x850   : > { %2917 = vtanh.f32 %v1536_v62 }
 0x857   : > { %v2914_v1 = vpop.eup %2913 }
 0x858   : > { %v1548_v3 = vadd.f32 1.0, %v2914_v1 }
 0x859   : > { %v2916_v5 = vpop.eup %2915 }
 0x85a   : > { %2919 = vrcp.f32 %v1548_v3  ;;  %v1549_v7 = vadd.f32 1.0, %v2916_v5  ;;  %v2918_v8 = vpop.eup %2917 }
 0x85b   : > { %2921 = vtanh.f32 %v1537_v2 }
 0x85c   : > { %2923 = vrcp.f32 %v1549_v7 }
 0x864   : > { %v2920_v9 = vpop.eup %2919 }
 0x865   : > { %v2922_v10 = vpop.eup %2921  ;;  %v1554_v14 = vmul.f32 %v2920_v9, %v2918_v8 }
 0x866   : > { %v2924_v16 = vpop.eup %2923 }
 0x867   : > { %v1555_v17 = vmul.f32 %v2924_v16, %v2922_v10 }
 0x869   : > { %v1556_v18 = vpack.c.bf16 %v1555_v17, %v1554_v14 }
 0x86b   : > { %2601 = vmatpush3.bf16.msra.mxu0 %v1556_v18 }
 0x86c   : > { %2606 = vmatprep.subr.bf16.mxu0 %v3547_v0 }
 0x86e   : > { %2603 = vmatmul.mubr.msk.bf16.vlgmr.msra.gmra.mrb[8].mxu0 %vm1213_vm7, %v2894_v19 }
 0x86f   : > { %2607 = vmatpush3.bf16.msra.mxu0 %v1556_v18  ;;  %2608 = vmatprep.mubr.msk.bf16.mxu0 %vm3548_vm0, %v3547_v0 }
 0x870   : > { %2612 = vmatprep.subr.bf16.mxu0 %v4185_v11 }
 0x876   : > { %2609 = vmatmul.mubr.msk.bf16.vlgmr.msra.gmra.mrb[12].mxu0 %vm1213_vm7, %v2895_v20 }
 0x877   : > { %2613 = vmatpush3.bf16.msra.mxu0 %v4185_v11  ;;  %2620 = vmatprep.mubr.msk.bf16.mxu0 %vm1022_vm3, %v2896_v23 }
 0x878   : > { %2614 = vmatprep.subr.bf16.mxu0 %v4188_v12 }
 0x87b   : > { %2615 = vmatpush3.bf16.msra.mxu0 %v4188_v12  ;;  %v2897_v12 = vld [vmem:[#allocation14 + $0x28] sm:$0xff]  }
 0x87c   : > { %2616 = vmatprep.subr.bf16.mxu0 %v4195_v13 }
 0x87f   : > { %2617 = vmatpush3.bf16.msra.mxu0 %v4195_v13 }
 0x880   : > { %2618 = vmatprep.subr.bf16.mxu0 %v4200_v15 }
 0x883   : > { %2619 = vmatpush3.bf16.msra.mxu0 %v4200_v15  ;;  %v2898_v15 = vld [vmem:[#allocation12 + $0x20] sm:$0xff]  }
 0x886   : > { %2621 = vmatmul.mubr.msk.bf16.vlgmr.msra.gmra.mrb[16].mxu0 %vm1022_vm3, %v2897_v12 }
 0x887   : > { %2630 = vmatprep.mubr.msk.bf16.mxu0 %vm1105_vm4, %v2898_v15 }
 0x941   : > { %v1602_v21 = vpop.f32.mrb[8].mxu0 }
 0x942   : > { %v1609_v24 = vadd.f32 %v1602_v21, %v4236_v27  ;;  %v2604_v25 = vpop.f32.mrb[9].mxu0 }
 0x943   : > { %v1605_v26 = vpop.f32.mrb[10].mxu0 }
 0x944   : > { %v1610_v22 = vadd.f32 %v1605_v26, %v4238_v28  ;;  %v2605_v11 = vpop.f32.mrb[11].mxu0  ;;  %v1624_v31 = vadd.f32 %v1617_v29, %v1609_v24 }
 0x946   : > { %v1625_v32 = vadd.f32 %v1622_v30, %v1610_v22 }
 0x948   : > { %v1695_v13 = vpack.c.bf16 %v1625_v32, %v1624_v31  ;;  %v2900_v32 = vld [vmem:[#allocation20 + $0x10] sm:$0xff]  }
 0x949   : > { %v1671_v43 = vpop.f32.mrb[12].mxu0 }
 0x94a   : > { %1706 = vrot.lane.b32.xlu1 %v1695_v13, %s3555_s2  ;;  %1702 = vrot.lane.b32.xlu0 %v1695_v13, %s3553_s8  ;;  %v2610_v46 = vpop.f32.mrb[13].mxu0  ;;  %s3397_s8 = scalar_lea.vmem %s3396_s22, 256 }
 0x94b   : > { %v1674_v49 = vpop.f32.mrb[14].mxu0  ;;  %v2035_v46 = vld [vmem:[#allocation26] sm:$0xf]  ;;  %p3399_p3 = scmp.lt.s32.totalorder %s3397_s8, %s3391_s29 }
 0x94c   : > { %v2611_v51 = vpop.f32.mrb[15].mxu0 }
 0x94d   : > { %p3400_p13 = por %p3399_p3, %p3398_p6 }
 0x94e   : > { %1708 = vrot.lane.b32.xlu0 %v3549_v4, %s3555_s2  ;;  %1798 = vrot.lane.b32.xlu1 %v3549_v4, %s3556_s0 }
 0x94f   : > { %p3401_p0 = pnand %p3400_p13, %p3394_p1 }
 0x952   : > { %1800 = vrot.lane.b32.xlu0 %v1695_v13, %s3556_s0 }
 0x9bc   : > { %v1707_v27 = vpop.permute.xlu1 %1706  ;;  %v1703_v28 = vpop.permute.xlu0 %1702 }
 0x9bd   : > { %1804 = vrot.lane.b32.xlu0 %v1707_v27, %s3556_s0  ;;  %1802 = vrot.lane.b32.xlu1 %v1703_v28, %s3556_s0 }
 0x9c0   : > { %v1709_v34 = vpop.permute.xlu0 %1708  ;;  %v1799_v36 = vpop.permute.xlu1 %1798 }
 0x9c1   : > { %1886 = vperm.xlu0 %2877, %v1872_v33   ;;  %v1711_v35 = vsel %vm1710_vm10, %v1707_v27, %v1709_v34 }
 0x9c2   : > { %1806 = vrot.lane.b32.xlu1 %v1711_v35, %s3556_s0 }
 0x9c4   : > { %v1801_v39 = vpop.permute.xlu0 %1800 }
 0x9c5   : > { %1876 = vperm.xlu0 %2877, %v1870_v37   ;;  %v1809_v4 = vsel %vm1808_vm11, %v1799_v36, %v1801_v39 }
 0x9c6   : > { %1891 = vperm.xlu1 %2878, %v1873_v38   ;;  %2624 = vmatprep.subr.bf16.mxu0 %v1809_v4 }
 0x9c7   : > { %2625 = vmatpush3.bf16.msra.mxu0 %v1809_v4 }
 0x9c9   : > { %1280 = vperm.xlu0 %2877, %v1276_v40  }
 0x9ca   : > { %1881 = vperm.xlu1 %2878, %v1871_v41  }
 0x9cd   : > { %1685 = vperm.xlu0 %2877, %v1681_v45   ;;  %v1985_v45 = vld [vmem:[#allocation23] sm:$0xf] }
 0x9ce   : > { %1285 = vperm.xlu1 %2878, %v1277_v47  }
 0x9d1   : > { %1974 = vperm.xlu0 %2877, %v1970_v48  }
 0x9d2   : > { %1690 = vperm.xlu1 %2878, %v1682_v50  }
 0x9d5   : > { %2039 = vperm.xlu0 %2877, %v2036_v52  }
 0x9d6   : > { %1979 = vperm.xlu1 %2878, %v1971_v53  }
 0x9d9   : > { %1989 = vperm.xlu0 %2877, %v1986_v54  }
 0xa2f   : > { %v1803_v55 = vpop.permute.xlu1 %1802  ;;  %v1805_v56 = vpop.permute.xlu0 %1804 }
 0xa30   : > { %2626 = vmatprep.subr.bf16.mxu0 %v1803_v55 }
 0xa31   : > { %2627 = vmatpush3.bf16.msra.mxu0 %v1803_v55 }
 0xa34   : > { %v1807_v57 = vpop.permute.xlu1 %1806 }
 0xa35   : > { %v1810_v58 = vsel %vm1808_vm11, %v1805_v56, %v1807_v57 }
 0xa36   : > { %2628 = vmatprep.subr.bf16.mxu0 %v1810_v58 }
 0xa37   : > { %2629 = vmatpush3.bf16.msra.mxu0 %v1810_v58 }
 0xa3a   : > { %2631 = vmatmul.mubr.msk.bf16.vlgmr.msra.gmra.mrb[16].mxu0 %vm1105_vm4, %v2899_v59 }
 0xa40   : > { %v1887_v60 = vpop.permute.xlu0 %1886 }
 0xa44   : > { %v1877_v61 = vpop.permute.xlu0 %1876 }
 0xa45   : > { %v1892_v62 = vpop.permute.xlu1 %1891 }
 0xa48   : > { %v1281_v63 = vpop.permute.xlu0 %1280 }
 0xa49   : > { %v1331_v1 = vadd.f32 %v4251_v42, %v1281_v63  ;;  %v1882_v2 = vpop.permute.xlu1 %1881 }
 0xa4b   : > { %v1678_v3 = vadd.f32 %v1671_v43, %v1331_v1 }
 0xa4c   : > { %v1686_v13 = vpop.permute.xlu0 %1685 }
 0xa4d   : > { %v1286_v5 = vpop.permute.xlu1 %1285  ;;  %v1693_v27 = vadd.f32 %v1686_v13, %v1678_v3 }
 0xa4e   : > { %v1334_v7 = vadd.f32 %v4253_v44, %v1286_v5 }
 0xa50   : > { %v1679_v8 = vadd.f32 %v1674_v49, %v1334_v7  ;;  %v1975_v39 = vpop.permute.xlu0 %1974 }
 0xa51   : > { %v1691_v15 = vpop.permute.xlu1 %1690 }
 0xa52   : > { %v1694_v33 = vadd.f32 %v1691_v15, %v1679_v8 }
 0xa54   : > { %v2040_v51 = vpop.permute.xlu0 %2039 }
 0xa55   : > { %v1980_v4 = vpop.permute.xlu1 %1979 }
 0xa58   : > { %v1990_v58 = vpop.permute.xlu0 %1989 }
 0xb0d   : > { %v2632_v9 = vpop.f32.mrb[16].mxu0 }
 0xb0e   : > { %v1896_v10 = vadd.f32 %v2632_v9, %v1887_v60  ;;  %v1854_v14 = vpop.f32.mrb[17].mxu0 }
 0xb0f   : > { %v2633_v16 = vpop.f32.mrb[18].mxu0  ;;  %v1894_v21 = vadd.f32 %v1877_v61, %v1854_v14 }
 0xb10   : > { %v2470_v17 = vmul.f32 -1.442695, %v1896_v10  ;;  %v1897_v18 = vadd.f32 %v2633_v16, %v1892_v62  ;;  %v1857_v19 = vpop.f32.mrb[19].mxu0 }
 0xb11   : > { %v1895_v25 = vadd.f32 %v1882_v2, %v1857_v19 }
 0xb12   : > { %2925 = vpow2.f32 %v2470_v17  ;;  %v2471_v20 = vmul.f32 -1.442695, %v1897_v18 }
 0xb14   : > { %2927 = vpow2.f32 %v2471_v20 }
 0xb15   : > { %2929 = vtanh.f32 %v1894_v21 }
 0xb1c   : > { %v2926_v24 = vpop.eup %2925 }
 0xb1d   : > { %v1906_v42 = vadd.f32 1.0, %v2926_v24 }
 0xb1e   : > { %v2928_v26 = vpop.eup %2927 }
 0xb1f   : > { %2931 = vrcp.f32 %v1906_v42  ;;  %v1907_v22 = vadd.f32 1.0, %v2928_v26  ;;  %v2930_v44 = vpop.eup %2929 }
 0xb20   : > { %2933 = vtanh.f32 %v1895_v25 }
 0xb21   : > { %2935 = vrcp.f32 %v1907_v22 }
 0xb29   : > { %v2932_v11 = vpop.eup %2931 }
 0xb2a   : > { %v2934_v23 = vpop.eup %2933  ;;  %v1912_v29 = vmul.f32 %v2932_v11, %v2930_v44 }
 0xb2b   : > { %v2936_v30 = vpop.eup %2935 }
 0xb2c   : > { %v1913_v12 = vmul.f32 %v2936_v30, %v2934_v23 }
 0xb2e   : > { %v1914_v31 = vpack.c.bf16 %v1913_v12, %v1912_v29 }
 0xb30   : > { %2635 = vmatpush3.bf16.msra.mxu1 %v1914_v31 }
 0xb31   : > { %2640 = vmatprep.subr.bf16.mxu1 %v3547_v0 }
 0xb33   : > { %2637 = vmatmul.mubr.msk.bf16.vlgmr.msra.gmra.mrb[16].mxu1 %vm1213_vm7, %v2900_v32 }
 0xb34   : > { %2642 = vmatprep.mubr.msk.bf16.mxu1 %vm3548_vm0, %v3547_v0 }
 0xc06   : > { %v1960_v28 = vpop.f32.mrb[16].mxu1 }
 0xc07   : > { %v1967_v34 = vadd.f32 %v1960_v28, %v1693_v27  ;;  %v2638_v35 = vpop.f32.mrb[17].mxu1 }
 0xc08   : > { %v1963_v36 = vpop.f32.mrb[18].mxu1 }
 0xc09   : > { %v1968_v37 = vadd.f32 %v1963_v36, %v1694_v33  ;;  %v2639_v38 = vpop.f32.mrb[19].mxu1  ;;  %v1982_v40 = vadd.f32 %v1975_v39, %v1967_v34 }
 0xc0b   : > { %v1983_v41 = vadd.f32 %v1980_v4, %v1968_v37 }
 0xc0d   : > { %v1984_v43 = vpack.c.bf16 %v1983_v41, %v1982_v40 }
 0xc0f   : > { %2641 = vmatpush3.bf16.msra.mxu1 %v1984_v43 }
 0xc10   : > { %2646 = vmatprep.subr.bf16.mxu1 %v3547_v0 }
 0xc12   : > { %2643 = vmatmul.mubr.msk.bf16.vlgmr.msra.gmra.mrb[20].mxu1 %vm1213_vm7, %v1985_v45 }
 0xc13   : > { %2647 = vmatpush3.bf16.msra.mxu1 %v1984_v43  ;;  %2648 = vmatprep.mubr.msk.bf16.mxu1 %vm3548_vm0, %v3547_v0 }
 0xc1a   : > { %2649 = vmatmul.mubr.msk.bf16.vlgmr.msra.gmra.mrb[24].mxu1 %vm1213_vm7, %v2035_v46 }
 0xce5   : > { %v2029_v47 = vpop.f32.mrb[20].mxu1 }
 0xce6   : > { %v2644_v48 = vpop.f32.mrb[21].mxu1  ;;  %v2030_v59 = vadd.f32 %v2029_v47, %v1990_v58 }
 0xce7   : > { %v2032_v49 = vpop.f32.mrb[22].mxu1 }
 0xce8   : > { %v2645_v50 = vpop.f32.mrb[23].mxu1 }
 0xced   : > { %v2079_v52 = vpop.f32.mrb[24].mxu1 }
 0xcee   : > { %v2080_v53 = vadd.f32 %v2079_v52, %v2040_v51  ;;  %v2650_v54 = vpop.f32.mrb[25].mxu1 }
 0xcef   : > { %v2082_v55 = vpop.f32.mrb[26].mxu1 }
 0xcf0   : > { %v2085_v56 = vmul.f32 1.442695, %v2080_v53  ;;  %2090 = vadd.xlane.f32.xlu1 %v2080_v53  ;;  %v2651_v57 = vpop.f32.mrb[27].mxu1 }
 0xcf2   : > { %2937 = vpow2.f32 %v2085_v56 }
 0xcfc   : > { %v2938_v0 = vpop.eup %2937 }
 0xcfd   : > { %v2087_v60 = vmul.f32 %v2938_v0, %v4174_v6 }
 0xcff   : > { %v2088_v61 = vadd.f32 %v2087_v60, %v2030_v59 }
 0xd01   : > { %2089 = vst [vmem:[%s800_s10] sm:$0xff] %v2088_v61 }
 0xd02   : > { %3404 = shalt.err (!%p3401_p0)
}
 0xd03   : > { %s3405_s20 = scalar_lea.hbm %s4302_s30, 128  ;;  %s3409_s0 = scalar_lea.hbm %s4468_s16, 256 }
 0xd04   : > { %p3406_p10 = scmp.ne.s32.totalorder %s4302_s30, %s3405_s20  ;;  %p3410_p8 = scmp.lt.u32.totalorder %s4302_s30, %s4468_s16 }
 0xd05   : > { %p3411_p2 = scmp.lt.u32.totalorder %s3409_s0, %s3405_s20  ;;  %p3413_p5 = scmp.lt.u32.totalorder %s3405_s20, %s4302_s30 }
 0xd06   : > { %p3407_p11 = pnand %p3406_p10, %p4469_p7 }
 0xd07   : > { %p3412_p9 = por %p3411_p2, %p3410_p8 }
 0xd08   : > { %p3408_p12 = pneg %p3407_p11 }
 0xd09   : > { %p3414_p4 = por %p3413_p5, %p3412_p9 }
 0xd0b   : > { %p3415_p1 = pnand %p3414_p4, %p3408_p12 }
 0xd0d   : > { %3418 = shalt.err (!%p3415_p1)
}
 0xd0e   : > { %2726 = dma.vmem_to_hbm [thread:$0]  (%p4469_p7), %s2121_s17, 128, %s4302_s30, %s2103_s7   ;;  %vm2100_vm12 = vcmask 0  }
 0xd0f   : > { %s2478_s4 = sshll.u32 %s4451_s9, 4  ;;  %s806_s3 = scalar_lea.vmem [#allocation30], %s4112_s5 }
 0xd10   : > { %s2133_s29 = sshll.u32 %s806_s3, 4  ;;  %s4470_s8 = sld [smem:[#allocation60_spill]]  ;;  %s4329_s29 = int_to_ptr.vmem [resolvable:$true] %s2133_s29 }
 0xd11   : > { %s2108_s30 = scalar_lea.sflag [#allocation31], %s4112_s5  ;;  %s3419_s7 = scalar_lea.vmem %s4329_s29, 16 }
 0xd12   : > { %p3420_p6 = scmp.ne.s32.totalorder %s4329_s29, %s3419_s7  ;;  %s3558_s9 = smov [#allocation30]  }
 0xd13   : > { %s3423_s28 = sshll.u32 %s3558_s9, 4  ;;  %s3424_s28 = int_to_ptr.vmem [resolvable:$false] %s3423_s28 }
 0xd14   : > { %p3421_p3 = pnand %p3420_p6, %p4469_p7  ;;  %s3425_s2 = scalar_lea.vmem %s3424_s28, 32 }
 0xd15   : > { %p3426_p0 = scmp.lt.s32.totalorder %s4329_s29, %s3424_s28  ;;  %p3427_p10 = scmp.lt.s32.totalorder %s3425_s2, %s3419_s7 }
 0xd16   : > { %s4327_s20 = scalar_lea.hbm %s4470_s8, %s2478_s4  ;;  %p3422_p13 = pneg %p3421_p3 }
 0xd17   : > { %p3428_p11 = por %p3427_p10, %p3426_p0 }
 0xd19   : > { %p3429_p12 = pnand %p3428_p11, %p3422_p13 }
 0xd7d   : > { %v2091_v6 = vpop.xlane.xlu1 %2090 }
 0xd7e   : > { %v2092_v62 = vrot.slane %v2091_v6, 4 }
 0xd80   : > { %v2093_v63 = vadd.f32 %v2092_v62, %v2091_v6 }
 0xd82   : > { %v2094_v1 = vrot.slane %v2093_v63, 2 }
 0xd84   : > { %v2095_v2 = vadd.f32 %v2094_v1, %v2093_v63 }
 0xd86   : > { %v2096_v3 = vrot.slane %v2095_v2, 1 }
 0xd88   : > { %v2097_v5 = vadd.f32 %v2096_v3, %v2095_v2 }
 0xd8a   : > { %2664 = vpush %v2097_v5 }
 0xdbb   : > { %s2665_s17 = spop %2664 }
 0xdbc   : > { %v2099_v7 = vstv %s2665_s17 }
 0xdbd   : > { %2101 = vst.msk [vmem:[%s806_s3] sm:$0x1] %vm2100_vm12, %v2099_v7 }
 0xdbe   : > { %3432 = shalt.err (!%p3429_p12)
}
 0xdbf   : > { %s3433_s5 = scalar_lea.hbm %s4327_s20, 16  ;;  %s3437_s6 = scalar_lea.hbm %s4470_s8, 32 }
 0xdc0   : > { %p3434_p8 = scmp.ne.s32.totalorder %s4327_s20, %s3433_s5  ;;  %p3438_p5 = scmp.lt.u32.totalorder %s4327_s20, %s4470_s8 }
 0xdc1   : > { %p3439_p4 = scmp.lt.u32.totalorder %s3437_s6, %s3433_s5  ;;  %p3441_p6 = scmp.lt.u32.totalorder %s3433_s5, %s4327_s20 }
 0xdc2   : > { %p3435_p2 = pnand %p3434_p8, %p4469_p7 }
 0xdc3   : > { %p3440_p1 = por %p3439_p4, %p3438_p5 }
 0xdc4   : > { %p3436_p9 = pneg %p3435_p2 }
 0xdc5   : > { %p3442_p3 = por %p3441_p6, %p3440_p1 }
 0xdc7   : > { %p3443_p13 = pnand %p3442_p3, %p3436_p9 }
 0xdc9   : > { %3446 = shalt.err (!%p3443_p13)
}
 0xdca   : > { %2727 = dma.vmem_to_hbm [thread:$0]  (%p4469_p7), %s4329_s29, 16, %s4327_s20, %s2108_s30  }
 0xdcb PF: > { %s4471_s21 = sld [smem:[#allocation44_spill]]  ;;  %p4472_p0 = scmp.ne.s32.totalorder %s4443_s19, 0 }
 0xdcc   : > { %p4473_p10 = scmp.ge.s32.totalorder %s3525_s27, 2 }
 0xdce   : > { %p2781_p11 = pnand %p4473_p10, %p4472_p0 }
 0xdd1   : > { %s2145_s22 = sand.u32 1, %s4471_s21  }
 0xdd2   : > { %s2146_s17 = scalar_lea.sflag [#allocation5], %s2145_s22 }
 0xdd3   : > { %3504 = dma.done.wait (!%p2781_p11), %s2146_s17, 128  }
 0xdd4   : > { %3506 = vsyncadd (!%p2781_p11), %s2146_s17, 4294967168  ;;  %s2155_s7 = scalar_lea.sflag [#allocation31], %s2145_s22 }
 0xdd5   : > { %3508 = dma.done.wait (!%p2781_p11), %s2155_s7, 16  }
 0xdd6   : > { %3510 = vsyncadd (!%p2781_p11), %s2155_s7, 4294967280  ;;  %s4474_s24 = sld [smem:[#allocation45_spill]]  ;;  %s4475_s9 = smov %s4000_s25 }
 0xdd7   : > { %p44_p7 = scmp.ge.s32.totalorder %s3989_s1, 4   ;;  %s4476_s25 = smov %s3521_s26 }
 0xdd8   : > { %s4477_s26 = smov %s4475_s9  ;;  %s4478_s27 = smov %s3989_s1 }
 0xdd9   :  { %46 = sbr.rel (!%p44_p7) target bundleno = 30 (0x1e), region = 227 }
 0xde0   :  { %2159 = vsyncpa [#allocation4], 1 }
 0xde1   :  { %2161 = vsyncpa [#allocation4 + $0x1], 1 }
 0xde2   :  { %2162 = vsyncpa [#allocation7], 1 }
 0xde3   :  { %2164 = vsyncpa [#allocation7 + $0x1], 1 }
 0xde4   :  { %2165 = vsyncpa [#allocation10], 1 }
 0xde5   :  { %2166 = vsyncpa [#allocation13], 1 }
 0xde6   :  { %2167 = vsyncpa [#allocation16], 1 }
 0xde7   :  { %2168 = vsyncpa [#allocation19], 1 }
 0xde8   :  { %2169 = vsyncpa [#allocation22], 1 }
 0xde9   :  { %2170 = vsyncpa [#allocation25], 1 }
 0xdea   :  { %2171 = vsyncpa [#allocation28], 1 }
 0xdeb   :  { %2172 = vsyncpa [#allocation5], 1 }
 0xdec   :  { %2174 = vsyncpa [#allocation5 + $0x1], 1 }
 0xded   :  { %2175 = vsyncpa [#allocation31], 1 }
 0xdee   :  { %2177 = vsyncpa [#allocation31 + $0x1], 1 }

// kernel: _lambda_.8
= control target key start
LH: loop header
LB: loop body
LE: loop exit
PB: predicated region body
PF: predicated region fallthrough
CT: control target
= control target key end

     0   :  { %s4379_s0 = inlined_call_operand.hbm [shape: f32[2,6,128], index: 0, kind: input, shape index: {}]   ;;  %s4380_s1 = inlined_call_operand.hbm [shape: bf16[2,64,128], index: 1, kind: input, shape index: {}]   ;;  %s4381_s2 = inlined_call_operand.hbm [shape: f32[6,6], index: 2, kind: input, shape index: {}]   ;;  %s4382_s3 = inlined_call_operand.hbm [shape: bf16[16,6], index: 3, kind: input, shape index: {}]   ;;  %s4383_s4 = inlined_call_operand.hbm [shape: f32[16,1], index: 4, kind: input, shape index: {}]   ;;  %s4384_s5 = inlined_call_operand.hbm [shape: bf16[3,32,48], index: 5, kind: input, shape index: {}]   ;;  %s4385_s6 = inlined_call_operand.hbm [shape: bf16[3,32,64], index: 6, kind: input, shape index: {}]   ;;  %s4386_s7 = inlined_call_operand.hbm [shape: f32[3,32,1], index: 7, kind: input, shape index: {}]   ;;  %s4387_s8 = inlined_call_operand.hbm [shape: bf16[3,16,16], index: 8, kind: input, shape index: {}]   ;;  %s4388_s9 = inlined_call_operand.hbm [shape: f32[3,16,1], index: 9, kind: input, shape index: {}]   ;;  %s4389_s10 = inlined_call_operand.hbm [shape: bf16[3,16,16], index: 10, kind: input, shape index: {}]   ;;  %s4390_s11 = inlined_call_operand.hbm [shape: f32[3,16,1], index: 11, kind: input, shape index: {}]   ;;  %s4391_s12 = inlined_call_operand.hbm [shape: bf16[6,16], index: 12, kind: input, shape index: {}]   ;;  %s4392_s13 = inlined_call_operand.hbm [shape: f32[6,1], index: 13, kind: input, shape index: {}]   ;;  %s4393_s14 = inlined_call_operand.hbm [shape: bf16[6,16], index: 14, kind: input, shape index: {}]   ;;  %s4394_s15 = inlined_call_operand.hbm [shape: f32[6,1], index: 15, kind: input, shape index: {}]   ;;  %s4395_s16 = inlined_call_operand.hbm [shape: f32[2,6,128], index: 16, kind: output, shape index: {0}]   ;;  %s4396_s17 = inlined_call_operand.hbm [shape: f32[2,1,1], index: 17, kind: output, shape index: {1}]  }
   0x1   :  { %4413 = sst [smem:[#allocation48_spill]] %s4379_s0 }
   0x2   :  { %4414 = sst [smem:[#allocation49_spill]] %s4380_s1 }
   0x3   :  { %4415 = sst [smem:[#allocation50_spill]] %s4381_s2 }
   0x4   :  { %4416 = sst [smem:[#allocation51_spill]] %s4382_s3 }
   0x5   :  { %4417 = sst [smem:[#allocation52_spill]] %s4383_s4 }
   0x6   :  { %4418 = sst [smem:[#allocation53_spill]] %s4384_s5 }
   0x7   :  { %4419 = sst [smem:[#allocation54_spill]] %s4385_s6 }
   0x8   :  { %4420 = sst [smem:[#allocation55_spill]] %s4386_s7 }
   0x9   :  { %4421 = sst [smem:[#allocation56_spill]] %s4387_s8 }
   0xa   :  { %4422 = sst [smem:[#allocation57_spill]] %s4388_s9 }
   0xb   :  { %4423 = sst [smem:[#allocation58_spill]] %s4389_s10 }
   0xc   :  { %4424 = sst [smem:[#allocation59_spill]] %s4395_s16 }
   0xd   :  { %4425 = sst [smem:[#allocation60_spill]] %s4396_s17 }
   0xe   :  { %23 = vsyncpa [#allocation4], 0 }
   0xf   :  { %25 = vsyncpa [#allocation4 + $0x1], 0 }
  0x10   :  { %26 = vsyncpa [#allocation7], 0 }
  0x11   :  { %28 = vsyncpa [#allocation7 + $0x1], 0 }
  0x12   :  { %29 = vsyncpa [#allocation10], 0 }
  0x13   :  { %30 = vsyncpa [#allocation13], 0 }
  0x14   :  { %31 = vsyncpa [#allocation16], 0 }
  0x15   :  { %32 = vsyncpa [#allocation19], 0 }
  0x16   :  { %33 = vsyncpa [#allocation22], 0 }
  0x17   :  { %34 = vsyncpa [#allocation25], 0 }
  0x18   :  { %35 = vsyncpa [#allocation28], 0 }
  0x19   :  { %36 = vsyncpa [#allocation5], 0 }
  0x1a   :  { %38 = vsyncpa [#allocation5 + $0x1], 0 }
  0x1b   :  { %39 = vsyncpa [#allocation31], 0 }
  0x1c   :  { %41 = vsyncpa [#allocation31 + $0x1], 0  ;;  %s3655_s24 = smov 0   ;;  %s3657_s25 = smov 0  }
  0x1d   :  { %s3659_s26 = smov 0   ;;  %s3661_s27 = smov 0  }
  0x1e LB: > { %4426 = sst [smem:[#allocation44_spill]] %s3519_s24  ;;  %s3533_s28 = smov [#allocation8]   ;;  %s3531_s27 = sphi %s3661_s27, %s4486_s27   ;;  %s3527_s26 = sphi %s3659_s26, %s4485_s26   ;;  %s3523_s25 = sphi %s3657_s25, %s4484_s25   ;;  %s3519_s24 = sphi %s3655_s24, %s4482_s24  }
  0x1f   : > { %4427 = sst [smem:[#allocation45_spill]] %s3523_s25  ;;  %s463_s29 = sshll.u32 %s3533_s28, 4  ;;  %s464_s29 = int_to_ptr.vmem [resolvable:$true] %s463_s29 }
  0x20   : > { %s3676_s0 = sadd.s32 4294967295, %s3531_s27   ;;  %p2393_p0 = scmp.ge.s32.totalorder %s3531_s27, 1 }
  0x21   : > { %4428 = sst [smem:[#allocation46_spill]] %s3676_s0  ;;  %p4402_p1 = scmp.eq.s32.totalorder %s3676_s0, 0 }
  0x22   : > { %p450_p2 = scmp.lt.s32.totalorder %s3531_s27, 3  ;;  %s3534_s18 = smov [#allocation9]  }
  0x23   : > { %s473_s19 = sshll.u32 %s3534_s18, 4  ;;  %s3535_s20 = smov [#allocation12]   ;;  %s3688_s19 = int_to_ptr.vmem [resolvable:$true] %s473_s19 }
  0x24   : > { %p3681_p3 = pnand %p2393_p0, %p450_p2  ;;  %s499_s21 = sshll.u32 %s3535_s20, 4  ;;  %s3696_s21 = int_to_ptr.vmem [resolvable:$true] %s499_s21 }
  0x25   : > { %s4432_s2 = sld [smem:[#allocation50_spill]] }
  0x26   : > { %s4429_s30 = scalar_select %p3681_p3, 1, 0 }
  0x27   : > { %p2736_p5 = pneg %p3681_p3 }
  0x28   : > { %4430 = sst [smem:[#allocation47_spill]] %s4429_s30 }
  0x29   : > { %p3692_p6 = pnand %p2736_p5, %p4402_p1 }
  0x2b   : > { %s2945_s28 = scalar_lea.hbm %s4432_s2, 128  ;;  %p3706_p8 = pneg %p3692_p6 }
  0x2c   : > { %p2946_p7 = scmp.ne.s32.totalorder %s4432_s2, %s2945_s28  ;;  %p2952_p11 = scmp.lt.u32.totalorder %s2945_s28, %s4432_s2 }
  0x2e   : > { %p2948_p9 = pnand %p3706_p8, %p2946_p7 }
  0x30   : > { %p2949_p10 = pneg %p2948_p9 }
  0x32   : > { %p2954_p12 = pnand %p2952_p11, %p2949_p10 }
  0x34   : > { %2957 = shalt.err (!%p2954_p12)
}
  0x35   : > { %s2958_s22 = scalar_lea.vmem %s464_s29, 128  ;;  %p2966_p5 = scmp.lt.s32.totalorder %s464_s29, %s464_s29 }
  0x36   : > { %p2959_p13 = scmp.ne.s32.totalorder %s464_s29, %s2958_s22  ;;  %p2967_p4 = scmp.lt.s32.totalorder %s2958_s22, %s2958_s22 }
  0x38   : > { %p2961_p0 = pnand %p2959_p13, %p3706_p8  ;;  %p2968_p1 = por %p2967_p4, %p2966_p5 }
  0x3a   : > { %p2962_p2 = pneg %p2961_p0 }
  0x3c   : > { %p2969_p3 = pnand %p2968_p1, %p2962_p2 }
  0x3e   : > { %2972 = shalt.err (!%p2969_p3)
}
  0x3f   : > { %2739 = dma.hbm_to_vmem [thread:$0]  (!%p3692_p6), %s4432_s2, 128, %s464_s29, [#allocation7]  }
  0x40   : > { %s4434_s3 = sld [smem:[#allocation51_spill]] }
  0x46   : > { %s2973_s28 = scalar_lea.hbm %s4434_s3, 128 }
  0x47   : > { %p2974_p7 = scmp.ne.s32.totalorder %s4434_s3, %s2973_s28  ;;  %p2980_p1 = scmp.lt.u32.totalorder %s2973_s28, %s4434_s3 }
  0x49   : > { %p2976_p9 = pnand %p2974_p7, %p3706_p8 }
  0x4b   : > { %p2977_p4 = pneg %p2976_p9 }
  0x4d   : > { %p2982_p3 = pnand %p2980_p1, %p2977_p4 }
  0x4f   : > { %2985 = shalt.err (!%p2982_p3)
}
  0x50   : > { %s2986_s29 = scalar_lea.vmem %s3688_s19, 128  ;;  %p2994_p13 = scmp.lt.s32.totalorder %s3688_s19, %s3688_s19 }
  0x51   : > { %p2987_p10 = scmp.ne.s32.totalorder %s3688_s19, %s2986_s29  ;;  %p2995_p0 = scmp.lt.s32.totalorder %s2986_s29, %s2986_s29 }
  0x53   : > { %p2989_p11 = pnand %p2987_p10, %p3706_p8  ;;  %p2996_p2 = por %p2995_p0, %p2994_p13 }
  0x55   : > { %p2990_p12 = pneg %p2989_p11 }
  0x57   : > { %p2997_p5 = pnand %p2996_p2, %p2990_p12 }
  0x59   : > { %3000 = shalt.err (!%p2997_p5)
}
  0x5a   : > { %s4408_s0 = smov 64   ;;  %s4410_s24 = smov 4  }
  0x5b   : > { %2742 = dma.hbm_to_vmem [thread:$0]  (!%p3692_p6), %s4434_s3, 128, %s3688_s19, [#allocation10], %s4408_s0, %s4408_s0, %s4410_s24  }
  0x5c   : > { %s4435_s5 = sld [smem:[#allocation53_spill]] }
  0x62   : > { %s3001_s28 = scalar_lea.hbm %s4435_s5, 768 }
  0x63   : > { %p3002_p7 = scmp.ne.s32.totalorder %s4435_s5, %s3001_s28  ;;  %p3008_p1 = scmp.lt.u32.totalorder %s3001_s28, %s4435_s5 }
  0x65   : > { %p3004_p9 = pnand %p3002_p7, %p3706_p8 }
  0x67   : > { %p3005_p4 = pneg %p3004_p9 }
  0x69   : > { %p3010_p3 = pnand %p3008_p1, %p3005_p4 }
  0x6b   : > { %3013 = shalt.err (!%p3010_p3)
}
  0x6c   : > { %s3014_s19 = scalar_lea.vmem %s3696_s21, 768  ;;  %p3022_p13 = scmp.lt.s32.totalorder %s3696_s21, %s3696_s21 }
  0x6d   : > { %p3015_p10 = scmp.ne.s32.totalorder %s3696_s21, %s3014_s19  ;;  %p3023_p0 = scmp.lt.s32.totalorder %s3014_s19, %s3014_s19 }
  0x6f   : > { %p3017_p11 = pnand %p3015_p10, %p3706_p8  ;;  %p3024_p2 = por %p3023_p0, %p3022_p13 }
  0x71   : > { %p3018_p12 = pneg %p3017_p11 }
  0x73   : > { %p3025_p5 = pnand %p3024_p2, %p3018_p12 }
  0x75   : > { %3028 = shalt.err (!%p3025_p5)
}
  0x76   : > { %2748 = dma.hbm_to_vmem [thread:$0]  (!%p3692_p6), %s4435_s5, 768, %s3696_s21, [#allocation13], %s4408_s0, %s4408_s0, %s4410_s24  }
  0x77   : > { %s3538_s17 = smov [#allocation15]   ;;  %s3539_s23 = smov [#allocation18]  }
  0x78   : > { %s525_s30 = sshll.u32 %s3538_s17, 4  ;;  %s551_s28 = sshll.u32 %s3539_s23, 4  ;;  %s526_s30 = int_to_ptr.vmem [resolvable:$true] %s525_s30  ;;  %s552_s28 = int_to_ptr.vmem [resolvable:$true] %s551_s28 }
  0x79   : > { %s4436_s7 = sld [smem:[#allocation55_spill]] }
  0x7f   : > { %s3029_s29 = scalar_lea.hbm %s4436_s7, 1536 }
  0x80   : > { %p3030_p7 = scmp.ne.s32.totalorder %s4436_s7, %s3029_s29  ;;  %p3036_p1 = scmp.lt.u32.totalorder %s3029_s29, %s4436_s7 }
  0x82   : > { %p3032_p9 = pnand %p3030_p7, %p3706_p8 }
  0x84   : > { %p3033_p4 = pneg %p3032_p9 }
  0x86   : > { %p3038_p3 = pnand %p3036_p1, %p3033_p4 }
  0x88   : > { %3041 = shalt.err (!%p3038_p3)
}
  0x89   : > { %s3042_s21 = scalar_lea.vmem %s526_s30, 1536  ;;  %p3050_p13 = scmp.lt.s32.totalorder %s526_s30, %s526_s30 }
  0x8a   : > { %p3043_p10 = scmp.ne.s32.totalorder %s526_s30, %s3042_s21  ;;  %p3051_p0 = scmp.lt.s32.totalorder %s3042_s21, %s3042_s21 }
  0x8c   : > { %p3045_p11 = pnand %p3043_p10, %p3706_p8  ;;  %p3052_p2 = por %p3051_p0, %p3050_p13 }
  0x8e   : > { %p3046_p12 = pneg %p3045_p11 }
  0x90   : > { %p3053_p5 = pnand %p3052_p2, %p3046_p12 }
  0x92   : > { %3056 = shalt.err (!%p3053_p5)
}
  0x93   : > { %s3540_s3 = smov 128   ;;  %s3541_s16 = smov 8  }
  0x94   : > { %2754 = dma.hbm_to_vmem [thread:$0]  (!%p3692_p6), %s4436_s7, 1536, %s526_s30, [#allocation16], %s3540_s3, %s3540_s3, %s3541_s16  }
  0x95   : > { %s4437_s9 = sld [smem:[#allocation57_spill]] }
  0x9b   : > { %s3057_s22 = scalar_lea.hbm %s4437_s9, 768 }
  0x9c   : > { %p3058_p7 = scmp.ne.s32.totalorder %s4437_s9, %s3057_s22  ;;  %p3064_p1 = scmp.lt.u32.totalorder %s3057_s22, %s4437_s9 }
  0x9e   : > { %p3060_p9 = pnand %p3058_p7, %p3706_p8 }
  0xa0   : > { %p3061_p4 = pneg %p3060_p9 }
  0xa2   : > { %p3066_p3 = pnand %p3064_p1, %p3061_p4 }
  0xa4   : > { %3069 = shalt.err (!%p3066_p3)
}
  0xa5   : > { %s3070_s25 = scalar_lea.vmem %s552_s28, 768  ;;  %p3078_p13 = scmp.lt.s32.totalorder %s552_s28, %s552_s28 }
  0xa6   : > { %p3071_p10 = scmp.ne.s32.totalorder %s552_s28, %s3070_s25  ;;  %p3079_p0 = scmp.lt.s32.totalorder %s3070_s25, %s3070_s25 }
  0xa8   : > { %p3073_p11 = pnand %p3071_p10, %p3706_p8  ;;  %p3080_p2 = por %p3079_p0, %p3078_p13 }
  0xaa   : > { %p3074_p12 = pneg %p3073_p11 }
  0xac   : > { %p3081_p5 = pnand %p3080_p2, %p3074_p12 }
  0xae   : > { %3084 = shalt.err (!%p3081_p5)
}
  0xaf   : > { %2760 = dma.hbm_to_vmem [thread:$0]  (!%p3692_p6), %s4437_s9, 768, %s552_s28, [#allocation19], %s3540_s3, %s3540_s3, %s3541_s16  }
  0xb0   : > { %s3542_s23 = smov [#allocation21]   ;;  %s3543_s22 = smov [#allocation24]  }
  0xb1   : > { %s577_s20 = sshll.u32 %s3542_s23, 4  ;;  %s602_s29 = sshll.u32 %s3543_s22, 4  ;;  %s578_s20 = int_to_ptr.vmem [resolvable:$true] %s577_s20  ;;  %s603_s29 = int_to_ptr.vmem [resolvable:$true] %s602_s29 }
  0xb2   : > { %s3085_s21 = scalar_lea.hbm %s4390_s11, 768 }
  0xb3   : > { %p3086_p7 = scmp.ne.s32.totalorder %s4390_s11, %s3085_s21  ;;  %p3092_p1 = scmp.lt.u32.totalorder %s3085_s21, %s4390_s11 }
  0xb5   : > { %p3088_p9 = pnand %p3086_p7, %p3706_p8 }
  0xb7   : > { %p3089_p4 = pneg %p3088_p9 }
  0xb9   : > { %p3094_p3 = pnand %p3092_p1, %p3089_p4 }
  0xbb   : > { %3097 = shalt.err (!%p3094_p3)
}
  0xbc   : > { %s3098_s28 = scalar_lea.vmem %s578_s20, 768  ;;  %p3106_p13 = scmp.lt.s32.totalorder %s578_s20, %s578_s20 }
  0xbd   : > { %p3099_p10 = scmp.ne.s32.totalorder %s578_s20, %s3098_s28  ;;  %p3107_p0 = scmp.lt.s32.totalorder %s3098_s28, %s3098_s28 }
  0xbf   : > { %p3101_p11 = pnand %p3099_p10, %p3706_p8  ;;  %p3108_p2 = por %p3107_p0, %p3106_p13 }
  0xc1   : > { %p3102_p12 = pneg %p3101_p11 }
  0xc3   : > { %p3109_p5 = pnand %p3108_p2, %p3102_p12 }
  0xc5   : > { %3112 = shalt.err (!%p3109_p5)
}
  0xc6   : > { %2766 = dma.hbm_to_vmem [thread:$0]  (!%p3692_p6), %s4390_s11, 768, %s578_s20, [#allocation22], %s3540_s3, %s3540_s3, %s3541_s16  }
  0xc7   : > { %s3113_s22 = scalar_lea.hbm %s4392_s13, 128 }
  0xc8   : > { %p3114_p7 = scmp.ne.s32.totalorder %s4392_s13, %s3113_s22  ;;  %p3120_p1 = scmp.lt.u32.totalorder %s3113_s22, %s4392_s13 }
  0xca   : > { %p3116_p9 = pnand %p3114_p7, %p3706_p8 }
  0xcc   : > { %p3117_p4 = pneg %p3116_p9 }
  0xce   : > { %p3122_p3 = pnand %p3120_p1, %p3117_p4 }
  0xd0   : > { %3125 = shalt.err (!%p3122_p3)
}
  0xd1   : > { %s3126_s30 = scalar_lea.vmem %s603_s29, 128  ;;  %p3134_p13 = scmp.lt.s32.totalorder %s603_s29, %s603_s29 }
  0xd2   : > { %p3127_p10 = scmp.ne.s32.totalorder %s603_s29, %s3126_s30  ;;  %p3135_p0 = scmp.lt.s32.totalorder %s3126_s30, %s3126_s30 }
  0xd4   : > { %p3129_p11 = pnand %p3127_p10, %p3706_p8  ;;  %p3136_p2 = por %p3135_p0, %p3134_p13 }
  0xd6   : > { %p3130_p12 = pneg %p3129_p11 }
  0xd8   : > { %p3137_p5 = pnand %p3136_p2, %p3130_p12 }
  0xda   : > { %3140 = shalt.err (!%p3137_p5)
}
  0xdb   : > { %2772 = dma.hbm_to_vmem [thread:$0]  (!%p3692_p6), %s4392_s13, 128, %s603_s29, [#allocation25]  }
  0xdc   : > { %s3544_s0 = smov [#allocation11]   ;;  %s3545_s17 = smov [#allocation14]  }
  0xdd   : > { %s486_s24 = sshll.u32 %s3544_s0, 4  ;;  %s512_s23 = sshll.u32 %s3545_s17, 4  ;;  %s487_s24 = int_to_ptr.vmem [resolvable:$true] %s486_s24  ;;  %s513_s23 = int_to_ptr.vmem [resolvable:$true] %s512_s23 }
  0xde   : > { %s4438_s4 = sld [smem:[#allocation52_spill]] }
  0xe4   : > { %s3141_s2 = scalar_lea.hbm %s4438_s4, 256 }
  0xe5   : > { %p3142_p7 = scmp.ne.s32.totalorder %s4438_s4, %s3141_s2  ;;  %p3148_p1 = scmp.lt.u32.totalorder %s3141_s2, %s4438_s4 }
  0xe7   : > { %p3144_p9 = pnand %p3142_p7, %p3706_p8 }
  0xe9   : > { %p3145_p4 = pneg %p3144_p9 }
  0xeb   : > { %p3150_p3 = pnand %p3148_p1, %p3145_p4 }
  0xed   : > { %3153 = shalt.err (!%p3150_p3)
}
  0xee   : > { %s3154_s29 = scalar_lea.vmem %s487_s24, 256  ;;  %p3162_p13 = scmp.lt.s32.totalorder %s487_s24, %s487_s24 }
  0xef   : > { %p3155_p10 = scmp.ne.s32.totalorder %s487_s24, %s3154_s29  ;;  %p3163_p0 = scmp.lt.s32.totalorder %s3154_s29, %s3154_s29 }
  0xf1   : > { %p3157_p11 = pnand %p3155_p10, %p3706_p8  ;;  %p3164_p2 = por %p3163_p0, %p3162_p13 }
  0xf3   : > { %p3158_p12 = pneg %p3157_p11 }
  0xf5   : > { %p3165_p5 = pnand %p3164_p2, %p3158_p12 }
  0xf7   : > { %3168 = shalt.err (!%p3165_p5)
}
  0xf8   : > { %2745 = dma.hbm_to_vmem [thread:$0]  (!%p3692_p6), %s4438_s4, 256, %s487_s24, [#allocation10], %s3540_s3, %s3540_s3, %s3541_s16  }
  0xf9   : > { %s4439_s6 = sld [smem:[#allocation54_spill]] }
  0xff   : > { %s3169_s19 = scalar_lea.hbm %s4439_s6, 768 }
 0x100   : > { %p3170_p7 = scmp.ne.s32.totalorder %s4439_s6, %s3169_s19  ;;  %p3176_p1 = scmp.lt.u32.totalorder %s3169_s19, %s4439_s6 }
 0x102   : > { %p3172_p9 = pnand %p3170_p7, %p3706_p8 }
 0x104   : > { %p3173_p4 = pneg %p3172_p9 }
 0x106   : > { %p3178_p3 = pnand %p3176_p1, %p3173_p4 }
 0x108   : > { %3181 = shalt.err (!%p3178_p3)
}
 0x109   : > { %s3182_s20 = scalar_lea.vmem %s513_s23, 768  ;;  %p3190_p13 = scmp.lt.s32.totalorder %s513_s23, %s513_s23 }
 0x10a   : > { %p3183_p10 = scmp.ne.s32.totalorder %s513_s23, %s3182_s20  ;;  %p3191_p0 = scmp.lt.s32.totalorder %s3182_s20, %s3182_s20 }
 0x10c   : > { %p3185_p11 = pnand %p3183_p10, %p3706_p8  ;;  %p3192_p2 = por %p3191_p0, %p3190_p13 }
 0x10e   : > { %p3186_p12 = pneg %p3185_p11 }
 0x110   : > { %p3193_p5 = pnand %p3192_p2, %p3186_p12 }
 0x112   : > { %3196 = shalt.err (!%p3193_p5)
}
 0x113   : > { %s4440_s3 = smov 4   ;;  %s4441_s16 = smov 64  }
 0x114   : > { %2751 = dma.hbm_to_vmem [thread:$0]  (!%p3692_p6), %s4439_s6, 768, %s513_s23, [#allocation13], %s4441_s16, %s4441_s16, %s4440_s3  }
 0x115   : > { %s3546_s28 = smov [#allocation17]   ;;  %s3547_s17 = smov [#allocation20]  }
 0x116   : > { %s538_s0 = sshll.u32 %s3546_s28, 4  ;;  %s564_s22 = sshll.u32 %s3547_s17, 4  ;;  %s539_s0 = int_to_ptr.vmem [resolvable:$true] %s538_s0  ;;  %s565_s22 = int_to_ptr.vmem [resolvable:$true] %s564_s22 }
 0x117   : > { %s4442_s8 = sld [smem:[#allocation56_spill]] }
 0x11d   : > { %s3197_s21 = scalar_lea.hbm %s4442_s8, 384 }
 0x11e   : > { %p3198_p7 = scmp.ne.s32.totalorder %s4442_s8, %s3197_s21  ;;  %p3204_p1 = scmp.lt.u32.totalorder %s3197_s21, %s4442_s8 }
 0x120   : > { %p3200_p9 = pnand %p3198_p7, %p3706_p8 }
 0x122   : > { %p3201_p4 = pneg %p3200_p9 }
 0x124   : > { %p3206_p3 = pnand %p3204_p1, %p3201_p4 }
 0x126   : > { %3209 = shalt.err (!%p3206_p3)
}
 0x127   : > { %s3210_s23 = scalar_lea.vmem %s539_s0, 384  ;;  %p3218_p13 = scmp.lt.s32.totalorder %s539_s0, %s539_s0 }
 0x128   : > { %p3211_p10 = scmp.ne.s32.totalorder %s539_s0, %s3210_s23  ;;  %p3219_p0 = scmp.lt.s32.totalorder %s3210_s23, %s3210_s23 }
 0x12a   : > { %p3213_p11 = pnand %p3211_p10, %p3706_p8  ;;  %p3220_p2 = por %p3219_p0, %p3218_p13 }
 0x12c   : > { %p3214_p12 = pneg %p3213_p11 }
 0x12e   : > { %p3221_p5 = pnand %p3220_p2, %p3214_p12 }
 0x130   : > { %3224 = shalt.err (!%p3221_p5)
}
 0x131   : > { %2757 = dma.hbm_to_vmem [thread:$0]  (!%p3692_p6), %s4442_s8, 384, %s539_s0, [#allocation16], %s4441_s16, %s4441_s16, %s4440_s3  }
 0x132   : > { %s4443_s10 = sld [smem:[#allocation58_spill]] }
 0x138   : > { %s3225_s2 = scalar_lea.hbm %s4443_s10, 384 }
 0x139   : > { %p3226_p7 = scmp.ne.s32.totalorder %s4443_s10, %s3225_s2  ;;  %p3232_p1 = scmp.lt.u32.totalorder %s3225_s2, %s4443_s10 }
 0x13b   : > { %p3228_p9 = pnand %p3226_p7, %p3706_p8 }
 0x13d   : > { %p3229_p4 = pneg %p3228_p9 }
 0x13f   : > { %p3234_p3 = pnand %p3232_p1, %p3229_p4 }
 0x141   : > { %3237 = shalt.err (!%p3234_p3)
}
 0x142   : > { %s3238_s24 = scalar_lea.vmem %s565_s22, 384  ;;  %p3246_p13 = scmp.lt.s32.totalorder %s565_s22, %s565_s22 }
 0x143   : > { %p3239_p10 = scmp.ne.s32.totalorder %s565_s22, %s3238_s24  ;;  %p3247_p0 = scmp.lt.s32.totalorder %s3238_s24, %s3238_s24 }
 0x145   : > { %p3241_p11 = pnand %p3239_p10, %p3706_p8  ;;  %p3248_p2 = por %p3247_p0, %p3246_p13 }
 0x147   : > { %p3242_p12 = pneg %p3241_p11 }
 0x149   : > { %p3249_p5 = pnand %p3248_p2, %p3242_p12 }
 0x14b   : > { %3252 = shalt.err (!%p3249_p5)
}
 0x14c   : > { %2763 = dma.hbm_to_vmem [thread:$0]  (!%p3692_p6), %s4443_s10, 384, %s565_s22, [#allocation19], %s4441_s16, %s4441_s16, %s4440_s3  }
 0x14d   : > { %s3548_s29 = smov [#allocation23]   ;;  %s3549_s17 = smov [#allocation26]  }
 0x14e   : > { %s591_s28 = sshll.u32 %s3548_s29, 4  ;;  %s613_s19 = sshll.u32 %s3549_s17, 4  ;;  %s592_s28 = int_to_ptr.vmem [resolvable:$true] %s591_s28  ;;  %s614_s19 = int_to_ptr.vmem [resolvable:$true] %s613_s19 }
 0x14f   : > { %s3253_s25 = scalar_lea.hbm %s4391_s12, 64 }
 0x150   : > { %p3254_p7 = scmp.ne.s32.totalorder %s4391_s12, %s3253_s25  ;;  %p3260_p1 = scmp.lt.u32.totalorder %s3253_s25, %s4391_s12 }
 0x152   : > { %p3256_p9 = pnand %p3254_p7, %p3706_p8 }
 0x154   : > { %p3257_p4 = pneg %p3256_p9 }
 0x156   : > { %p3262_p3 = pnand %p3260_p1, %p3257_p4 }
 0x158   : > { %3265 = shalt.err (!%p3262_p3)
}
 0x159   : > { %s3266_s22 = scalar_lea.vmem %s592_s28, 64  ;;  %p3274_p13 = scmp.lt.s32.totalorder %s592_s28, %s592_s28 }
 0x15a   : > { %p3267_p10 = scmp.ne.s32.totalorder %s592_s28, %s3266_s22  ;;  %p3275_p0 = scmp.lt.s32.totalorder %s3266_s22, %s3266_s22 }
 0x15c   : > { %p3269_p11 = pnand %p3267_p10, %p3706_p8  ;;  %p3276_p2 = por %p3275_p0, %p3274_p13 }
 0x15e   : > { %p3270_p12 = pneg %p3269_p11 }
 0x160   : > { %p3277_p5 = pnand %p3276_p2, %p3270_p12 }
 0x162   : > { %3280 = shalt.err (!%p3277_p5)
}
 0x163   : > { %2769 = dma.hbm_to_vmem [thread:$0]  (!%p3692_p6), %s4391_s12, 64, %s592_s28, [#allocation22]  }
 0x164   : > { %s3281_s21 = scalar_lea.hbm %s4393_s14, 64 }
 0x165   : > { %p3282_p7 = scmp.ne.s32.totalorder %s4393_s14, %s3281_s21  ;;  %p3288_p1 = scmp.lt.u32.totalorder %s3281_s21, %s4393_s14 }
 0x167   : > { %p3284_p9 = pnand %p3282_p7, %p3706_p8 }
 0x169   : > { %p3285_p4 = pneg %p3284_p9 }
 0x16b   : > { %p3290_p3 = pnand %p3288_p1, %p3285_p4 }
 0x16d   : > { %3293 = shalt.err (!%p3290_p3)
}
 0x16e   : > { %s3294_s0 = scalar_lea.vmem %s614_s19, 64  ;;  %p3302_p13 = scmp.lt.s32.totalorder %s614_s19, %s614_s19 }
 0x16f   : > { %p3295_p10 = scmp.ne.s32.totalorder %s614_s19, %s3294_s0  ;;  %p3303_p0 = scmp.lt.s32.totalorder %s3294_s0, %s3294_s0 }
 0x171   : > { %p3297_p11 = pnand %p3295_p10, %p3706_p8  ;;  %p3304_p2 = por %p3303_p0, %p3302_p13 }
 0x173   : > { %p3298_p12 = pneg %p3297_p11 }
 0x175   : > { %p3305_p5 = pnand %p3304_p2, %p3298_p12 }
 0x177   : > { %3308 = shalt.err (!%p3305_p5)
}
 0x178   : > { %2775 = dma.hbm_to_vmem [thread:$0]  (!%p3692_p6), %s4393_s14, 64, %s614_s19, [#allocation25]  }
 0x179   : > { %s3550_s23 = smov [#allocation27]   ;;  %s3309_s21 = scalar_lea.hbm %s4394_s15, 128 }
 0x17a   : > { %s624_s29 = sshll.u32 %s3550_s23, 4  ;;  %p3310_p7 = scmp.ne.s32.totalorder %s4394_s15, %s3309_s21  ;;  %s625_s29 = int_to_ptr.vmem [resolvable:$true] %s624_s29 }
 0x17b   : > { %p3316_p1 = scmp.lt.u32.totalorder %s3309_s21, %s4394_s15 }
 0x17c   : > { %p3312_p9 = pnand %p3310_p7, %p3706_p8 }
 0x17e   : > { %p3313_p4 = pneg %p3312_p9 }
 0x180   : > { %p3318_p3 = pnand %p3316_p1, %p3313_p4 }
 0x182   : > { %3321 = shalt.err (!%p3318_p3)
}
 0x183   : > { %s3322_s19 = scalar_lea.vmem %s625_s29, 128  ;;  %p3330_p13 = scmp.lt.s32.totalorder %s625_s29, %s625_s29 }
 0x184   : > { %p3323_p10 = scmp.ne.s32.totalorder %s625_s29, %s3322_s19  ;;  %p3331_p0 = scmp.lt.s32.totalorder %s3322_s19, %s3322_s19 }
 0x186   : > { %p3325_p11 = pnand %p3323_p10, %p3706_p8  ;;  %p3332_p2 = por %p3331_p0, %p3330_p13 }
 0x188   : > { %p3326_p12 = pneg %p3325_p11 }
 0x18a   : > { %p3333_p5 = pnand %p3332_p2, %p3326_p12 }
 0x18c   : > { %3336 = shalt.err (!%p3333_p5)
}
 0x18d   : > { %s4444_s22 = sld [smem:[#allocation45_spill]]  ;;  %s4445_s18 = sld [smem:[#allocation44_spill]] }
 0x18e   : > { %s4446_s23 = sld [smem:[#allocation46_spill]]  ;;  %s2392_s17 = sadd.s32 4294967294, %s3531_s27  }
 0x18f   : > { %2778 = dma.hbm_to_vmem [thread:$0]  (!%p3692_p6), %s4394_s15, 128, %s625_s29, [#allocation28]  }
 0x190   : > { %s3995_s1 = sadd.s32 1, %s3531_s27   ;;  %s54_s21 = sadd.s32 1, %s3527_s26 }
 0x191   : > { %s51_s2 = ssub.s32 %s3531_s27, %s3995_s1  ;;  %p62_p9 = scmp.eq.s32.totalorder %s3531_s27, 0 }
 0x192   : > { %p52_p8 = scmp.eq.s32.totalorder %s51_s2, 0  ;;  %p417_p11 = scmp.eq.s32.totalorder %s2392_s17, 1 }
 0x193   : > { %p61_p7 = scmp.ne.s32.totalorder %s3527_s26, %s4444_s22  ;;  %p67_p4 = scmp.ne.s32.totalorder %s4444_s22, %s4445_s18 }
 0x194   : > { %s4006_s25 = scalar_select %p52_p8, %s3527_s26, %s54_s21  }
 0x195   : > { %p4008_p1 = por %p62_p9, %p61_p7  ;;  %p4448_p3 = scmp.eq.s32.totalorder %s4446_s23, 0 }
 0x196   : > { %p411_p10 = scmp.eq.s32.totalorder %s4446_s23, 1  ;;  %p2807_p12 = scmp.lt.s32.totalorder %s3531_s27, 2 }
 0x197   : > { %p4014_p6 = por %p4448_p3, %p67_p4  ;;  %s4021_s20 = sand.u32 1, %s3527_s26  }
 0x198   : > { %p4023_p13 = por %p411_p10, %p61_p7  ;;  %p4027_p0 = por %p417_p11, %p67_p4 }
 0x199   : > { %s2409_s0 = sshll.u32 %s4021_s20, 3  ;;  %s2410_s28 = sshll.u32 %s3531_s27, 7 }
 0x19a   : > { %s4450_s24 = scalar_select %p4023_p13, 1, 0 }
 0x19b   : > { %s4451_s19 = scalar_select %p4027_p0, 1, 0 }
 0x19c   : > { %s4452_s23 = sld [smem:[#allocation48_spill]]  ;;  %s639_s2 = scalar_lea.vmem [#allocation3], %s2409_s0 }
 0x19d   : > { %s646_s21 = sshll.u32 %s639_s2, 4  ;;  %p4042_p2 = pnand %p2807_p12, %p4008_p1  ;;  %s4038_s21 = int_to_ptr.vmem [resolvable:$true] %s646_s21 }
 0x19e   : > { %s2411_s5 = sshll.u32 %s4021_s20, 5  ;;  %s636_s22 = scalar_lea.sflag [#allocation4], %s4021_s20 }
 0x19f   : > { %p3339_p8 = pneg %p4042_p2 }
 0x1a2   : > { %s4036_s17 = scalar_lea.hbm %s4452_s23, %s2410_s28  ;;  %s3342_s30 = scalar_lea.hbm %s4452_s23, 256 }
 0x1a3   : > { %s3337_s28 = scalar_lea.hbm %s4036_s17, 128  ;;  %p3343_p4 = scmp.lt.u32.totalorder %s4036_s17, %s4452_s23 }
 0x1a4   : > { %p3338_p5 = scmp.ne.s32.totalorder %s4036_s17, %s3337_s28  ;;  %p3344_p1 = scmp.lt.u32.totalorder %s3342_s30, %s3337_s28 }
 0x1a5   : > { %p3346_p10 = scmp.lt.u32.totalorder %s3337_s28, %s4036_s17 }
 0x1a6   : > { %p3340_p7 = pnand %p3339_p8, %p3338_p5  ;;  %p3345_p3 = por %p3344_p1, %p3343_p4 }
 0x1a8   : > { %p3341_p9 = pneg %p3340_p7  ;;  %p3347_p11 = por %p3346_p10, %p3345_p3 }
 0x1aa   : > { %p3348_p12 = pnand %p3347_p11, %p3341_p9 }
 0x1ac   : > { %3351 = shalt.err (!%p3348_p12)
}
 0x1ad   : > { %s3352_s6 = scalar_lea.vmem %s4038_s21, 128  ;;  %s3551_s0 = smov [#allocation3]  }
 0x1ae   : > { %p3353_p5 = scmp.ne.s32.totalorder %s4038_s21, %s3352_s6  ;;  %s3357_s18 = sshll.u32 %s3551_s0, 4  ;;  %s3358_s18 = int_to_ptr.vmem [resolvable:$false] %s3357_s18 }
 0x1af   : > { %s3359_s7 = scalar_lea.vmem %s3358_s18, 256  ;;  %p3360_p13 = scmp.lt.s32.totalorder %s4038_s21, %s3358_s18 }
 0x1b0   : > { %p3355_p7 = pnand %p3353_p5, %p3339_p8  ;;  %p3361_p4 = scmp.lt.s32.totalorder %s3359_s7, %s3352_s6 }
 0x1b2   : > { %p3356_p0 = pneg %p3355_p7  ;;  %p3362_p1 = por %p3361_p4, %p3360_p13 }
 0x1b4   : > { %p3363_p3 = pnand %p3362_p1, %p3356_p0 }
 0x1b6   : > { %3366 = shalt.err (!%p3363_p3)
}
 0x1b7   : > { %2782 = dma.hbm_to_vmem [thread:$0]  (!%p4042_p2), %s4036_s17, 128, %s4038_s21, %s636_s22  }
 0x1b8   : > { %s657_s28 = scalar_lea.vmem [#allocation6], %s2411_s5  ;;  %s2487_s2 = sshll.u32 %s3531_s27, 9 }
 0x1b9   : > { %s664_s30 = sshll.u32 %s657_s28, 4  ;;  %s4454_s18 = sld [smem:[#allocation49_spill]]  ;;  %s4076_s30 = int_to_ptr.vmem [resolvable:$true] %s664_s30 }
 0x1ba   : > { %s4455_s8 = sand.u32 1, %s3531_s27  }
 0x1bb   : > { %s4086_s9 = scalar_lea.sflag [#allocation7], %s4455_s8 }
 0x1bf   : > { %s4082_s7 = scalar_lea.hbm %s4454_s18, %s2487_s2  ;;  %s3372_s17 = scalar_lea.hbm %s4454_s18, 1024 }
 0x1c0   : > { %s3367_s10 = scalar_lea.hbm %s4082_s7, 512  ;;  %p3373_p10 = scmp.lt.u32.totalorder %s4082_s7, %s4454_s18 }
 0x1c1   : > { %p3368_p13 = scmp.ne.s32.totalorder %s4082_s7, %s3367_s10  ;;  %p3374_p11 = scmp.lt.u32.totalorder %s3372_s17, %s3367_s10 }
 0x1c2   : > { %p3376_p5 = scmp.lt.u32.totalorder %s3367_s10, %s4082_s7 }
 0x1c3   : > { %p3370_p0 = pnand %p3368_p13, %p3339_p8  ;;  %p3375_p12 = por %p3374_p11, %p3373_p10 }
 0x1c5   : > { %p3371_p9 = pneg %p3370_p0  ;;  %p3377_p7 = por %p3376_p5, %p3375_p12 }
 0x1c7   : > { %p3378_p4 = pnand %p3377_p7, %p3371_p9 }
 0x1c9   : > { %3381 = shalt.err (!%p3378_p4)
}
 0x1ca   : > { %s3382_s8 = scalar_lea.vmem %s4076_s30, 512  ;;  %s3552_s28 = smov [#allocation6]  }
 0x1cb   : > { %p3383_p1 = scmp.ne.s32.totalorder %s4076_s30, %s3382_s8  ;;  %s3387_s2 = sshll.u32 %s3552_s28, 4  ;;  %s3388_s2 = int_to_ptr.vmem [resolvable:$false] %s3387_s2 }
 0x1cc   : > { %s3389_s0 = scalar_lea.vmem %s3388_s2, 1024  ;;  %p3390_p0 = scmp.lt.s32.totalorder %s4076_s30, %s3388_s2 }
 0x1cd   : > { %p3385_p3 = pnand %p3383_p1, %p3339_p8  ;;  %p3391_p10 = scmp.lt.s32.totalorder %s3389_s0, %s3382_s8 }
 0x1cf   : > { %p3386_p13 = pneg %p3385_p3  ;;  %p3392_p11 = por %p3391_p10, %p3390_p0 }
 0x1d1   : > { %p3393_p12 = pnand %p3392_p11, %p3386_p13 }
 0x1d3   : > { %3396 = shalt.err (!%p3393_p12)
}
 0x1d4   : > { %2785 = dma.hbm_to_vmem [thread:$0]  (!%p4042_p2), %s4082_s7, 512, %s4076_s30, %s4086_s9, %s4441_s16, %s4441_s16, %s4440_s3  }
 0x1d5   : > { %s4456_s10 = sld [smem:[#allocation47_spill]] }
 0x1db   : > { %p4457_p8 = scmp.ne.s32.totalorder %s4456_s10, 0 }
 0x1dc   : > { %s4458_s6 = sld [smem:[#allocation45_spill]] (!%p4457_p8) }
 0x1dd   : > { %676 = sbr.rel (%p4457_p8) target bundleno = 3532 (0xdcc), region = 84 }
 0x1e2   : > { %s4118_s5 = sand.u32 (!%p4457_p8), 1, %s4458_s6  }
 0x1e3   : > { %s2415_s20 = sshll.u32 (!%p4457_p8), %s4118_s5, 3  ;;  %s679_s17 = scalar_lea.sflag (!%p4457_p8), [#allocation4], %s4118_s5 }
 0x1e4   : > { %s4124_s4 = scalar_lea.vmem [#allocation3], %s2415_s20 }
 0x1e5   : > { %3470 = dma.done.wait (%p4014_p6), %s679_s17, 128  }
 0x1e6   : > { %3472 = vsyncadd (%p4014_p6), %s679_s17, 4294967168  ;;  %s4459_s9 = sld [smem:[#allocation46_spill]]  ;;  %s2416_s16 = sshll.u32 %s4118_s5, 5 }
 0x1e7   : > { %s4132_s7 = scalar_lea.vmem [#allocation6], %s2416_s16 }
 0x1ec   : > { %s687_s3 = sand.u32 1, %s4459_s9  }
 0x1ed   : > { %s688_s30 = scalar_lea.sflag [#allocation7], %s687_s3 }
 0x1ee   : > { %3474 = dma.done.wait (%p4014_p6), %s688_s30, 512  }
 0x1ef   : > { %3476 = vsyncadd (%p4014_p6), %s688_s30, 4294966784  ;;  %p4460_p2 = scmp.eq.s32.totalorder %s4459_s9, 0 }
 0x1f1   : > { %3478 = dma.done.wait (%p4460_p2), [#allocation7], 128   ;;  %p4461_p9 = pmov %p4460_p2 }
 0x1f2   : > { %p4462_p5 = pmov %p4460_p2 }
 0x1f3   : > { %3480 = vsyncadd (%p4461_p9), [#allocation7], 4294967168 }
 0x1f4   : > { %3482 = dma.done.wait (%p4462_p5), [#allocation10], 384   ;;  %p4463_p7 = pmov %p4460_p2 }
 0x1f5   : > { %p4464_p4 = pmov %p4460_p2 }
 0x1f6   : > { %3484 = vsyncadd (%p4463_p7), [#allocation10], 4294966912 }
 0x1f7   : > { %3486 = dma.done.wait (%p4464_p4), [#allocation13], 1536   ;;  %p4465_p1 = pmov %p4460_p2 }
 0x1f9   : > { %3488 = vsyncadd (%p4465_p1), [#allocation13], 4294965760  ;;  %p4466_p6 = pmov %p4465_p1 }
 0x1fa   : > { %p4467_p3 = pmov %p4465_p1 }
 0x1fb   : > { %3490 = dma.done.wait (%p4466_p6), [#allocation16], 1920  }
 0x1fc   : > { %3492 = vsyncadd (%p4467_p3), [#allocation16], 4294965376  ;;  %p4468_p13 = pmov %p4465_p1 }
 0x1fd   : > { %p4469_p0 = pmov %p4465_p1 }
 0x1fe   : > { %3494 = dma.done.wait (%p4468_p13), [#allocation19], 1152  }
 0x1ff   : > { %3496 = vsyncadd (%p4469_p0), [#allocation19], 4294966144  ;;  %p4470_p10 = pmov %p4469_p0 }
 0x200   : > { %p4471_p11 = pmov %p4469_p0 }
 0x201   : > { %3498 = dma.done.wait (%p4470_p10), [#allocation22], 832  }
 0x202   : > { %3500 = vsyncadd (%p4471_p11), [#allocation22], 4294966464  ;;  %p4472_p12 = pmov %p4469_p0 }
 0x203   : > { %p4473_p8 = pmov %p4469_p0 }
 0x204   : > { %3502 = dma.done.wait (%p4472_p12), [#allocation25], 192  }
 0x205   : > { %3504 = vsyncadd (%p4473_p8), [#allocation25], 4294967104  ;;  %p4474_p2 = pmov %p4469_p0 }
 0x206   : > { %p4475_p9 = pmov %p4469_p0 }
 0x207   : > { %3506 = dma.done.wait (%p4474_p2), [#allocation28], 128  }
 0x208   : > { %3508 = vsyncadd (%p4475_p9), [#allocation28], 4294967168  ;;  %v3553_v0 = vmov 0.0   ;;  %vm3554_vm0 = vmmov 0   ;;  %vm814_vm1 = vcmask 1045504   ;;  %vm810_vm2 = vcmask 48128  }
 0x209   : > { %2539 = vmatprep.subr.mxu0 %v3553_v0  ;;  %2541 = vmatprep.mubr.msk.f32.mxu0 %vm3554_vm0, %v3553_v0  ;;  %v809_v1 = vld [vmem:[%s4124_s4] sm:$0x3f]  ;;  %v808_v2 = vld [vmem:[#allocation8] sm:$0x3f]  ;;  %v3555_v4 = vmov 0   ;;  %vm919_vm3 = vcmask 1042432  }
 0x20a   : > { %2544 = vmatprep.subr.bf16.mxu1 %v3553_v0  ;;  %2546 = vmatprep.mubr.msk.bf16.mxu1 %vm3554_vm0, %v3553_v0  ;;  %v899_v3 = vld [vmem:[#allocation11] sm:$0xff]  ;;  %v900_v5 = vld [vmem:[#allocation11 + $0x8] sm:$0xff]  ;;  %v2885_v10 = vld [vmem:[#allocation9] sm:$0xff]   ;;  %s3556_s29 = smov 126   ;;  %vm1026_vm4 = vcmask 523264   ;;  %s3557_s21 = smov 1  }
 0x20b   : > { %2540 = vmatpush3.msk.msra.mxu0 %vm814_vm1, %v809_v1  ;;  %2883 = vset.pattern.permute.xlu0 %v3555_v4  ;;  %v4192_v11 = vld [vmem:[%s4132_s7] sm:$0xff]   ;;  %v4195_v12 = vld [vmem:[%s4132_s7 + $0x8] sm:$0xff]   ;;  %v4202_v13 = vld [vmem:[%s4132_s7 + $0x10] sm:$0xff]   ;;  %s3558_s22 = smov 127   ;;  %vm1109_vm5 = vcmask 392192   ;;  %vm982_vm6 = vcmask 1031168  }
 0x20c   : > { %2542 = vmatmul.mubr.msk.f32.vlgmr.msra.gmra.mrb[0].mxu0 %vm810_vm2, %v808_v2  ;;  %2884 = vset.pattern.permute.xlu1 %v3555_v4  ;;  %v4207_v15 = vld [vmem:[%s4132_s7 + $0x18] sm:$0xff]   ;;  %v2890_v18 = vld [vmem:[#allocation14] sm:$0xff]   ;;  %v2892_v26 = vld [vmem:[#allocation12] sm:$0xff]   ;;  %vm1103_vm7 = vcmask 7168   ;;  %vm1217_vm8 = vcmask 130048   ;;  %s3559_s8 = smov 124  }
 0x20d   : > { %903 = vperm.xlu0 %2883, %v899_v3   ;;  %2550 = vmatprep.subr.bf16.mxu0 %v4192_v11  ;;  %v2891_v21 = vld [vmem:[#allocation14 + $0x8] sm:$0xff]   ;;  %v1167_v31 = vld [vmem:[#allocation15 + $0x10] sm:$0xff]  ;;  %v1165_v35 = vld [vmem:[#allocation15] sm:$0xff]  ;;  %s3560_s28 = smov 2   ;;  %vm1356_vm9 = vcmask 1014784   ;;  %vm1454_vm10 = vcmask 15360  }
 0x20e   : > { %2551 = vmatpush3.bf16.msra.mxu0 %v4192_v11  ;;  %2558 = vmatprep.mubr.msk.bf16.mxu0 %vm1026_vm4, %v2890_v18  ;;  %v1264_v36 = vld [vmem:[#allocation18] sm:$0xff]  ;;  %v1166_v38 = vld [vmem:[#allocation15 + $0x8] sm:$0xff]  ;;  %v1265_v39 = vld [vmem:[#allocation18 + $0x8] sm:$0xff]  ;;  %s3561_s2 = smov 120   ;;  %s3562_s0 = smov 4   ;;  %vm1714_vm11 = vcmask 982016  }
 0x20f   : > { %2552 = vmatprep.subr.bf16.mxu0 %v4195_v12  ;;  %v1168_v37 = vld [vmem:[#allocation15 + $0x18] sm:$0xff]  ;;  %v2893_v44 = vld [vmem:[#allocation12 + $0x8] sm:$0xff]   ;;  %vm1812_vm12 = vcmask 31744   ;;  %s800_s10 = scalar_lea.vmem [#allocation29], %s2415_s20  ;;  %s2483_s6 = sshll.u32 %s4459_s9, 7 }
 0x210   : > { %s2125_s17 = sshll.u32 %s800_s10, 4  ;;  %s4476_s16 = sld [smem:[#allocation59_spill]]  ;;  %s2126_s17 = int_to_ptr.vmem [resolvable:$true] %s2125_s17 }
 0x211   : > { %908 = vperm.xlu0 %2883, %v900_v5   ;;  %s2108_s7 = scalar_lea.sflag [#allocation5], %s4118_s5  ;;  %p4477_p7 = scmp.ne.s32.totalorder %s4450_s24, 0 }
 0x212   : > { %2553 = vmatpush3.bf16.msra.mxu0 %v4195_v12 }
 0x213   : > { %2554 = vmatprep.subr.bf16.mxu0 %v4202_v13 }
 0x215   : > { %980 = vrot.lane.b32.xlu0 %v3555_v4, %s3556_s29 }
 0x216   : > { %2555 = vmatpush3.bf16.msra.mxu0 %v4202_v13  ;;  %s4310_s30 = scalar_lea.hbm %s4476_s16, %s2483_s6 }
 0x217   : > { %2556 = vmatprep.subr.bf16.mxu0 %v4207_v15 }
 0x21a   : > { %2557 = vmatpush3.bf16.msra.mxu0 %v4207_v15 }
 0x21d   : > { %2559 = vmatmul.mubr.msk.bf16.vlgmr.msra.gmra.mrb[4].mxu0 %vm1026_vm4, %v2891_v21  ;;  %v2896_v21 = vld [vmem:[#allocation14 + $0x10] sm:$0xff]  }
 0x21e   : > { %2568 = vmatprep.mubr.msk.bf16.mxu0 %vm1109_vm5, %v2892_v26  ;;  %v2897_v26 = vld [vmem:[#allocation14 + $0x18] sm:$0xff]  }
 0x28c   : > { %v904_v14 = vpop.permute.xlu0 %903 }
 0x290   : > { %v909_v19 = vpop.permute.xlu0 %908 }
 0x294   : > { %v981_v28 = vpop.permute.xlu0 %980 }
 0x2df   : > { %v4181_v6 = vpop.f32.mrb[0].mxu0 }
 0x2e0   : > { %v888_v7 = vpack.c.bf16 %v4181_v6, %v4181_v6  ;;  %v2543_v8 = vpop.f32.mrb[1].mxu0 }
 0x2e2   : > { %v921_v9 = vsel %vm919_vm3, %v888_v7, 0 }
 0x2e3   : > { %2545 = vmatpush3.bf16.msra.mxu1 %v921_v9  ;;  %v2894_v9 = vld [vmem:[#allocation17] sm:$0xff]  }
 0x2e4   : > { %2572 = vmatprep.subr.bf16.mxu1 %v3553_v0 }
 0x2e6   : > { %2547 = vmatmul.mubr.msk.bf16.vlgmr.msra.gmra.mrb[0].mxu1 %vm810_vm2, %v2885_v10  ;;  %v2895_v10 = vld [vmem:[#allocation20] sm:$0xff]  }
 0x2e7   : > { %2574 = vmatprep.mubr.msk.bf16.mxu1 %vm3554_vm0, %v3553_v0 }
 0x3b9   : > { %v957_v16 = vpop.f32.mrb[0].mxu1 }
 0x3ba   : > { %v2548_v17 = vpop.f32.mrb[1].mxu1  ;;  %v4211_v22 = vadd.f32 %v957_v16, %v904_v14 }
 0x3bb   : > { %v960_v20 = vpop.f32.mrb[2].mxu1 }
 0x3bc   : > { %v4213_v23 = vadd.f32 %v960_v20, %v909_v19  ;;  %v2549_v24 = vpop.f32.mrb[3].mxu1 }
 0x3be   : > { %v967_v25 = vpack.c.bf16 %v4213_v23, %v4211_v22 }
 0x3c0   : > { %1095 = vrot.lane.b32.xlu0 %v967_v25, %s3557_s21  ;;  %974 = vrot.lane.b32.xlu1 %v967_v25, %s3558_s22 }
 0x3c4   : > { %978 = vrot.lane.b32.xlu1 %v967_v25, %s3556_s29 }
 0x3c8   : > { %1093 = vrot.lane.b32.xlu1 %v3555_v4, %s3557_s21 }
 0x432   : > { %v975_v27 = vpop.permute.xlu1 %974  ;;  %v1096_v32 = vpop.permute.xlu0 %1095 }
 0x433   : > { %1097 = vrot.lane.b32.xlu1 %v975_v27, %s3557_s21 }
 0x436   : > { %v979_v29 = vpop.permute.xlu1 %978 }
 0x437   : > { %1099 = vrot.lane.b32.xlu0 %v979_v29, %s3557_s21  ;;  %v983_v30 = vsel %vm982_vm6, %v979_v29, %v981_v28 }
 0x438   : > { %1101 = vrot.lane.b32.xlu1 %v983_v30, %s3557_s21  ;;  %s3563_s21 = smov [#allocation29]  }
 0x439   : > { %s3401_s22 = sshll.u32 %s3563_s21, 4  ;;  %s3402_s22 = int_to_ptr.vmem [resolvable:$false] %s3401_s22 }
 0x43a   : > { %v1094_v33 = vpop.permute.xlu1 %1093  ;;  %p3404_p6 = scmp.lt.s32.totalorder %s2126_s17, %s3402_s22 }
 0x43b   : > { %1181 = vperm.xlu0 %2883, %v1167_v31   ;;  %v1104_v34 = vsel %vm1103_vm7, %v1094_v33, %v1096_v32  ;;  %v1518_v31 = vld [vmem:[#allocation15 + $0x30] sm:$0xff] }
 0x43c   : > { %2562 = vmatprep.subr.bf16.mxu0 %v1104_v34  ;;  %1186 = vperm.xlu1 %2884, %v1168_v37  }
 0x43d   : > { %2563 = vmatpush3.bf16.msra.mxu0 %v1104_v34 }
 0x43f   : > { %1171 = vperm.xlu0 %2883, %v1165_v35   ;;  %v1516_v35 = vld [vmem:[#allocation15 + $0x20] sm:$0xff] }
 0x440   : > { %1176 = vperm.xlu1 %2884, %v1166_v38  }
 0x443   : > { %1268 = vperm.xlu0 %2883, %v1264_v36   ;;  %v1519_v36 = vld [vmem:[#allocation15 + $0x38] sm:$0xff] }
 0x444   : > { %1273 = vperm.xlu1 %2884, %v1265_v39   ;;  %v1616_v39 = vld [vmem:[#allocation18 + $0x10] sm:$0xff] }
 0x4a5   : > { %v1098_v40 = vpop.permute.xlu1 %1097 }
 0x4a6   : > { %2564 = vmatprep.subr.bf16.mxu0 %v1098_v40 }
 0x4a7   : > { %2565 = vmatpush3.bf16.msra.mxu0 %v1098_v40  ;;  %v1517_v40 = vld [vmem:[#allocation15 + $0x28] sm:$0xff] }
 0x4a9   : > { %v1100_v41 = vpop.permute.xlu0 %1099 }
 0x4aa   : > { %v1102_v42 = vpop.permute.xlu1 %1101 }
 0x4ab   : > { %v1105_v43 = vsel %vm1103_vm7, %v1100_v41, %v1102_v42  ;;  %v1617_v41 = vld [vmem:[#allocation18 + $0x18] sm:$0xff] }
 0x4ac   : > { %2566 = vmatprep.subr.bf16.mxu0 %v1105_v43 }
 0x4ad   : > { %2567 = vmatpush3.bf16.msra.mxu0 %v1105_v43 }
 0x4ae   : > { %2606 = vmatprep.subr.bf16.mxu0 %v3553_v0 }
 0x4b0   : > { %2569 = vmatmul.mubr.msk.bf16.vlgmr.msra.gmra.mrb[4].mxu0 %vm1109_vm5, %v2893_v44 }
 0x4b1   : > { %2608 = vmatprep.mubr.msk.bf16.mxu0 %vm3554_vm0, %v3553_v0 }
 0x4ba   : > { %v1182_v45 = vpop.permute.xlu0 %1181 }
 0x4bb   : > { %v1187_v49 = vpop.permute.xlu1 %1186 }
 0x4be   : > { %v1172_v55 = vpop.permute.xlu0 %1171 }
 0x4bf   : > { %v1177_v57 = vpop.permute.xlu1 %1176 }
 0x4c2   : > { %v1269_v24 = vpop.permute.xlu0 %1268 }
 0x4c3   : > { %v1274_v25 = vpop.permute.xlu1 %1273 }
 0x583   : > { %v2570_v46 = vpop.f32.mrb[4].mxu0 }
 0x584   : > { %v1191_v47 = vadd.f32 %v2570_v46, %v1182_v45  ;;  %v1150_v48 = vpop.f32.mrb[5].mxu0 }
 0x585   : > { %v2571_v50 = vpop.f32.mrb[6].mxu0  ;;  %v1189_v56 = vadd.f32 %v1172_v55, %v1150_v48 }
 0x586   : > { %v2448_v51 = vmul.f32 -1.442695, %v1191_v47  ;;  %v1192_v52 = vadd.f32 %v2571_v50, %v1187_v49  ;;  %v1153_v53 = vpop.f32.mrb[7].mxu0  ;;  %v2899_v50 = vld [vmem:[#allocation12 + $0x18] sm:$0xff]  }
 0x587   : > { %v1190_v59 = vadd.f32 %v1177_v57, %v1153_v53 }
 0x588   : > { %2907 = vpow2.f32 %v2448_v51  ;;  %v2449_v54 = vmul.f32 -1.442695, %v1192_v52 }
 0x58a   : > { %2909 = vpow2.f32 %v2449_v54 }
 0x58b   : > { %2911 = vtanh.f32 %v1189_v56 }
 0x592   : > { %v2908_v58 = vpop.eup %2907 }
 0x593   : > { %v1201_v60 = vadd.f32 1.0, %v2908_v58 }
 0x594   : > { %v2910_v61 = vpop.eup %2909 }
 0x595   : > { %2913 = vrcp.f32 %v1201_v60  ;;  %v1202_v62 = vadd.f32 1.0, %v2910_v61  ;;  %v2912_v63 = vpop.eup %2911 }
 0x596   : > { %2915 = vtanh.f32 %v1190_v59 }
 0x597   : > { %2917 = vrcp.f32 %v1202_v62 }
 0x59f   : > { %v2914_v1 = vpop.eup %2913 }
 0x5a0   : > { %v2916_v2 = vpop.eup %2915  ;;  %v1207_v3 = vmul.f32 %v2914_v1, %v2912_v63 }
 0x5a1   : > { %v2918_v5 = vpop.eup %2917 }
 0x5a2   : > { %v1208_v7 = vmul.f32 %v2918_v5, %v2916_v2 }
 0x5a4   : > { %v1209_v8 = vpack.c.bf16 %v1208_v7, %v1207_v3 }
 0x5a6   : > { %2573 = vmatpush3.bf16.msra.mxu1 %v1209_v8 }
 0x5a7   : > { %2578 = vmatprep.subr.bf16.mxu1 %v3553_v0 }
 0x5a9   : > { %2575 = vmatmul.mubr.msk.bf16.vlgmr.msra.gmra.mrb[4].mxu1 %vm1217_vm8, %v2894_v9 }
 0x5aa   : > { %2579 = vmatpush3.bf16.msra.mxu1 %v1209_v8  ;;  %2580 = vmatprep.mubr.msk.bf16.mxu1 %vm3554_vm0, %v3553_v0 }
 0x5ab   : > { %2584 = vmatprep.subr.bf16.mxu1 %v4192_v11 }
 0x5b1   : > { %2581 = vmatmul.mubr.msk.bf16.vlgmr.msra.gmra.mrb[8].mxu1 %vm1217_vm8, %v2895_v10 }
 0x5b2   : > { %2585 = vmatpush3.bf16.msra.mxu1 %v4192_v11  ;;  %2592 = vmatprep.mubr.msk.bf16.mxu1 %vm1026_vm4, %v2896_v21 }
 0x5b3   : > { %2586 = vmatprep.subr.bf16.mxu1 %v4195_v12 }
 0x5b6   : > { %2587 = vmatpush3.bf16.msra.mxu1 %v4195_v12 }
 0x5b7   : > { %2588 = vmatprep.subr.bf16.mxu1 %v4202_v13 }
 0x5ba   : > { %2589 = vmatpush3.bf16.msra.mxu1 %v4202_v13 }
 0x5bb   : > { %2590 = vmatprep.subr.bf16.mxu1 %v4207_v15 }
 0x5be   : > { %2591 = vmatpush3.bf16.msra.mxu1 %v4207_v15 }
 0x5c1   : > { %2593 = vmatmul.mubr.msk.bf16.vlgmr.msra.gmra.mrb[12].mxu1 %vm1026_vm4, %v2897_v26 }
 0x67c   : > { %v1255_v14 = vpop.f32.mrb[4].mxu1 }
 0x67d   : > { %v1262_v16 = vadd.f32 %v1255_v14, %v4211_v22  ;;  %v2576_v17 = vpop.f32.mrb[5].mxu1 }
 0x67e   : > { %v1258_v18 = vpop.f32.mrb[6].mxu1 }
 0x67f   : > { %v1263_v19 = vadd.f32 %v1258_v18, %v4213_v23  ;;  %v2577_v20 = vpop.f32.mrb[7].mxu1  ;;  %v4243_v27 = vadd.f32 %v1269_v24, %v1262_v16  ;;  %v2898_v23 = vld [vmem:[#allocation12 + $0x10] sm:$0xff]  }
 0x680   : > { %2602 = vmatprep.mubr.msk.bf16.mxu1 %vm1109_vm5, %v2898_v23  ;;  %v2901_v20 = vld [vmem:[#allocation20 + $0x8] sm:$0xff]  }
 0x681   : > { %v4245_v28 = vadd.f32 %v1274_v25, %v1263_v19  ;;  %v2900_v19 = vld [vmem:[#allocation17 + $0x8] sm:$0xff]   ;;  %v2902_v23 = vld [vmem:[#allocation14 + $0x20] sm:$0xff]  }
 0x683   : > { %v1341_v22 = vpack.c.bf16 %v4245_v28, %v4243_v27 }
 0x684   : > { %v4258_v42 = vpop.f32.mrb[8].mxu1 }
 0x685   : > { %1352 = vrot.lane.b32.xlu1 %v1341_v22, %s3559_s8  ;;  %1348 = vrot.lane.b32.xlu0 %v1341_v22, %s3556_s29  ;;  %v2582_v43 = vpop.f32.mrb[9].mxu1  ;;  %s3397_s29 = scalar_lea.vmem %s2126_s17, 128 }
 0x686   : > { %v4260_v44 = vpop.f32.mrb[10].mxu1  ;;  %p3398_p5 = scmp.ne.s32.totalorder %s2126_s17, %s3397_s29 }
 0x687   : > { %v2583_v45 = vpop.f32.mrb[11].mxu1 }
 0x688   : > { %v1685_v45 = vld [vmem:[#allocation21 + $0x10] sm:$0xff]  ;;  %p3399_p4 = pnand %p3398_p5, %p4477_p7 }
 0x689   : > { %1354 = vrot.lane.b32.xlu0 %v3555_v4, %s3559_s8  ;;  %1444 = vrot.lane.b32.xlu1 %v3555_v4, %s3560_s28 }
 0x68a   : > { %p3400_p1 = pneg %p3399_p4 }
 0x68d   : > { %1446 = vrot.lane.b32.xlu0 %v1341_v22, %s3560_s28 }
 0x6f7   : > { %v1353_v29 = vpop.permute.xlu1 %1352  ;;  %v1349_v30 = vpop.permute.xlu0 %1348 }
 0x6f8   : > { %1450 = vrot.lane.b32.xlu0 %v1353_v29, %s3560_s28  ;;  %1448 = vrot.lane.b32.xlu1 %v1349_v30, %s3560_s28 }
 0x6fb   : > { %v1355_v32 = vpop.permute.xlu0 %1354  ;;  %v1445_v34 = vpop.permute.xlu1 %1444 }
 0x6fc   : > { %1532 = vperm.xlu0 %2883, %v1518_v31   ;;  %v1357_v33 = vsel %vm1356_vm9, %v1353_v29, %v1355_v32 }
 0x6fd   : > { %1452 = vrot.lane.b32.xlu1 %v1357_v33, %s3560_s28  ;;  %v1876_v33 = vld [vmem:[#allocation15 + $0x50] sm:$0xff] }
 0x6ff   : > { %v1447_v37 = vpop.permute.xlu0 %1446 }
 0x700   : > { %1522 = vperm.xlu0 %2883, %v1516_v35   ;;  %v1455_v38 = vsel %vm1454_vm10, %v1445_v34, %v1447_v37  ;;  %v1874_v37 = vld [vmem:[#allocation15 + $0x40] sm:$0xff] }
 0x701   : > { %1537 = vperm.xlu1 %2884, %v1519_v36   ;;  %2596 = vmatprep.subr.bf16.mxu1 %v1455_v38 }
 0x702   : > { %2597 = vmatpush3.bf16.msra.mxu1 %v1455_v38  ;;  %v1877_v38 = vld [vmem:[#allocation15 + $0x58] sm:$0xff] }
 0x704   : > { %1620 = vperm.xlu0 %2883, %v1616_v39  }
 0x705   : > { %1527 = vperm.xlu1 %2884, %v1517_v40   ;;  %v1280_v40 = vld [vmem:[#allocation21] sm:$0xff] }
 0x709   : > { %1625 = vperm.xlu1 %2884, %v1617_v41   ;;  %v1875_v41 = vld [vmem:[#allocation15 + $0x48] sm:$0xff] }
 0x76a   : > { %v1449_v46 = vpop.permute.xlu1 %1448  ;;  %v1451_v47 = vpop.permute.xlu0 %1450 }
 0x76b   : > { %2598 = vmatprep.subr.bf16.mxu1 %v1449_v46 }
 0x76c   : > { %2599 = vmatpush3.bf16.msra.mxu1 %v1449_v46 }
 0x76f   : > { %v1453_v48 = vpop.permute.xlu1 %1452 }
 0x770   : > { %v1456_v49 = vsel %vm1454_vm10, %v1451_v47, %v1453_v48  ;;  %v1281_v47 = vld [vmem:[#allocation21 + $0x8] sm:$0xff]  ;;  %v1974_v48 = vld [vmem:[#allocation21 + $0x20] sm:$0xff] }
 0x771   : > { %2600 = vmatprep.subr.bf16.mxu1 %v1456_v49 }
 0x772   : > { %2601 = vmatpush3.bf16.msra.mxu1 %v1456_v49 }
 0x773   : > { %2640 = vmatprep.subr.bf16.mxu1 %v3553_v0 }
 0x775   : > { %2603 = vmatmul.mubr.msk.bf16.vlgmr.msra.gmra.mrb[12].mxu1 %vm1109_vm5, %v2899_v50  ;;  %v1686_v50 = vld [vmem:[#allocation21 + $0x18] sm:$0xff] }
 0x776   : > { %2642 = vmatprep.mubr.msk.bf16.mxu1 %vm3554_vm0, %v3553_v0 }
 0x77b   : > { %v1533_v51 = vpop.permute.xlu0 %1532 }
 0x77f   : > { %v1523_v61 = vpop.permute.xlu0 %1522 }
 0x780   : > { %v1538_v55 = vpop.permute.xlu1 %1537 }
 0x783   : > { %v1621_v29 = vpop.permute.xlu0 %1620 }
 0x784   : > { %v1528_v63 = vpop.permute.xlu1 %1527 }
 0x788   : > { %v1626_v30 = vpop.permute.xlu1 %1625 }
 0x848   : > { %v2604_v52 = vpop.f32.mrb[12].mxu1 }
 0x849   : > { %v1542_v53 = vadd.f32 %v2604_v52, %v1533_v51  ;;  %v1500_v54 = vpop.f32.mrb[13].mxu1  ;;  %v2040_v52 = vld [vmem:[#allocation27] sm:$0x3f] }
 0x84a   : > { %v2605_v56 = vpop.f32.mrb[14].mxu1  ;;  %v1540_v62 = vadd.f32 %v1523_v61, %v1500_v54  ;;  %v1990_v54 = vld [vmem:[#allocation24] sm:$0x3f] }
 0x84b   : > { %v2462_v57 = vmul.f32 -1.442695, %v1542_v53  ;;  %v1543_v58 = vadd.f32 %v2605_v56, %v1538_v55  ;;  %v1503_v59 = vpop.f32.mrb[15].mxu1  ;;  %v1975_v53 = vld [vmem:[#allocation21 + $0x28] sm:$0xff] }
 0x84c   : > { %v1541_v2 = vadd.f32 %v1528_v63, %v1503_v59  ;;  %v2905_v59 = vld [vmem:[#allocation12 + $0x28] sm:$0xff]  }
 0x84d   : > { %2919 = vpow2.f32 %v2462_v57  ;;  %v2463_v60 = vmul.f32 -1.442695, %v1543_v58 }
 0x84f   : > { %2921 = vpow2.f32 %v2463_v60 }
 0x850   : > { %2923 = vtanh.f32 %v1540_v62 }
 0x857   : > { %v2920_v1 = vpop.eup %2919 }
 0x858   : > { %v1552_v3 = vadd.f32 1.0, %v2920_v1 }
 0x859   : > { %v2922_v5 = vpop.eup %2921 }
 0x85a   : > { %2925 = vrcp.f32 %v1552_v3  ;;  %v1553_v7 = vadd.f32 1.0, %v2922_v5  ;;  %v2924_v8 = vpop.eup %2923 }
 0x85b   : > { %2927 = vtanh.f32 %v1541_v2 }
 0x85c   : > { %2929 = vrcp.f32 %v1553_v7 }
 0x864   : > { %v2926_v9 = vpop.eup %2925 }
 0x865   : > { %v2928_v10 = vpop.eup %2927  ;;  %v1558_v14 = vmul.f32 %v2926_v9, %v2924_v8 }
 0x866   : > { %v2930_v16 = vpop.eup %2929 }
 0x867   : > { %v1559_v17 = vmul.f32 %v2930_v16, %v2928_v10 }
 0x869   : > { %v1560_v18 = vpack.c.bf16 %v1559_v17, %v1558_v14 }
 0x86b   : > { %2607 = vmatpush3.bf16.msra.mxu0 %v1560_v18 }
 0x86c   : > { %2612 = vmatprep.subr.bf16.mxu0 %v3553_v0 }
 0x86e   : > { %2609 = vmatmul.mubr.msk.bf16.vlgmr.msra.gmra.mrb[8].mxu0 %vm1217_vm8, %v2900_v19 }
 0x86f   : > { %2613 = vmatpush3.bf16.msra.mxu0 %v1560_v18  ;;  %2614 = vmatprep.mubr.msk.bf16.mxu0 %vm3554_vm0, %v3553_v0 }
 0x870   : > { %2618 = vmatprep.subr.bf16.mxu0 %v4192_v11 }
 0x876   : > { %2615 = vmatmul.mubr.msk.bf16.vlgmr.msra.gmra.mrb[12].mxu0 %vm1217_vm8, %v2901_v20 }
 0x877   : > { %2619 = vmatpush3.bf16.msra.mxu0 %v4192_v11  ;;  %2626 = vmatprep.mubr.msk.bf16.mxu0 %vm1026_vm4, %v2902_v23 }
 0x878   : > { %2620 = vmatprep.subr.bf16.mxu0 %v4195_v12 }
 0x87b   : > { %2621 = vmatpush3.bf16.msra.mxu0 %v4195_v12  ;;  %v2903_v12 = vld [vmem:[#allocation14 + $0x28] sm:$0xff]  }
 0x87c   : > { %2622 = vmatprep.subr.bf16.mxu0 %v4202_v13 }
 0x87f   : > { %2623 = vmatpush3.bf16.msra.mxu0 %v4202_v13 }
 0x880   : > { %2624 = vmatprep.subr.bf16.mxu0 %v4207_v15 }
 0x883   : > { %2625 = vmatpush3.bf16.msra.mxu0 %v4207_v15  ;;  %v2904_v15 = vld [vmem:[#allocation12 + $0x20] sm:$0xff]  }
 0x886   : > { %2627 = vmatmul.mubr.msk.bf16.vlgmr.msra.gmra.mrb[16].mxu0 %vm1026_vm4, %v2903_v12 }
 0x887   : > { %2636 = vmatprep.mubr.msk.bf16.mxu0 %vm1109_vm5, %v2904_v15 }
 0x941   : > { %v1606_v21 = vpop.f32.mrb[8].mxu0 }
 0x942   : > { %v1613_v24 = vadd.f32 %v1606_v21, %v4243_v27  ;;  %v2610_v25 = vpop.f32.mrb[9].mxu0 }
 0x943   : > { %v1609_v26 = vpop.f32.mrb[10].mxu0 }
 0x944   : > { %v1614_v22 = vadd.f32 %v1609_v26, %v4245_v28  ;;  %v2611_v11 = vpop.f32.mrb[11].mxu0  ;;  %v1628_v31 = vadd.f32 %v1621_v29, %v1613_v24 }
 0x946   : > { %v1629_v32 = vadd.f32 %v1626_v30, %v1614_v22 }
 0x948   : > { %v1699_v13 = vpack.c.bf16 %v1629_v32, %v1628_v31  ;;  %v2906_v32 = vld [vmem:[#allocation20 + $0x10] sm:$0xff]  }
 0x949   : > { %v1675_v43 = vpop.f32.mrb[12].mxu0 }
 0x94a   : > { %1710 = vrot.lane.b32.xlu1 %v1699_v13, %s3561_s2  ;;  %1706 = vrot.lane.b32.xlu0 %v1699_v13, %s3559_s8  ;;  %v2616_v46 = vpop.f32.mrb[13].mxu0  ;;  %s3403_s8 = scalar_lea.vmem %s3402_s22, 256 }
 0x94b   : > { %v1678_v49 = vpop.f32.mrb[14].mxu0  ;;  %v2039_v46 = vld [vmem:[#allocation26] sm:$0x7]  ;;  %p3405_p3 = scmp.lt.s32.totalorder %s3403_s8, %s3397_s29 }
 0x94c   : > { %v2617_v51 = vpop.f32.mrb[15].mxu0 }
 0x94d   : > { %p3406_p13 = por %p3405_p3, %p3404_p6 }
 0x94e   : > { %1712 = vrot.lane.b32.xlu0 %v3555_v4, %s3561_s2  ;;  %1802 = vrot.lane.b32.xlu1 %v3555_v4, %s3562_s0 }
 0x94f   : > { %p3407_p0 = pnand %p3406_p13, %p3400_p1 }
 0x952   : > { %1804 = vrot.lane.b32.xlu0 %v1699_v13, %s3562_s0 }
 0x9bc   : > { %v1711_v27 = vpop.permute.xlu1 %1710  ;;  %v1707_v28 = vpop.permute.xlu0 %1706 }
 0x9bd   : > { %1808 = vrot.lane.b32.xlu0 %v1711_v27, %s3562_s0  ;;  %1806 = vrot.lane.b32.xlu1 %v1707_v28, %s3562_s0 }
 0x9c0   : > { %v1713_v34 = vpop.permute.xlu0 %1712  ;;  %v1803_v36 = vpop.permute.xlu1 %1802 }
 0x9c1   : > { %1890 = vperm.xlu0 %2883, %v1876_v33   ;;  %v1715_v35 = vsel %vm1714_vm11, %v1711_v27, %v1713_v34 }
 0x9c2   : > { %1810 = vrot.lane.b32.xlu1 %v1715_v35, %s3562_s0 }
 0x9c4   : > { %v1805_v39 = vpop.permute.xlu0 %1804 }
 0x9c5   : > { %1880 = vperm.xlu0 %2883, %v1874_v37   ;;  %v1813_v4 = vsel %vm1812_vm12, %v1803_v36, %v1805_v39 }
 0x9c6   : > { %1895 = vperm.xlu1 %2884, %v1877_v38   ;;  %2630 = vmatprep.subr.bf16.mxu0 %v1813_v4 }
 0x9c7   : > { %2631 = vmatpush3.bf16.msra.mxu0 %v1813_v4 }
 0x9c9   : > { %1284 = vperm.xlu0 %2883, %v1280_v40  }
 0x9ca   : > { %1885 = vperm.xlu1 %2884, %v1875_v41  }
 0x9cd   : > { %1689 = vperm.xlu0 %2883, %v1685_v45   ;;  %v1989_v45 = vld [vmem:[#allocation23] sm:$0x7] }
 0x9ce   : > { %1289 = vperm.xlu1 %2884, %v1281_v47  }
 0x9d1   : > { %1978 = vperm.xlu0 %2883, %v1974_v48  }
 0x9d2   : > { %1694 = vperm.xlu1 %2884, %v1686_v50  }
 0x9d5   : > { %2043 = vperm.xlu0 %2883, %v2040_v52  }
 0x9d6   : > { %1983 = vperm.xlu1 %2884, %v1975_v53  }
 0x9d9   : > { %1993 = vperm.xlu0 %2883, %v1990_v54  }
 0xa2f   : > { %v1807_v55 = vpop.permute.xlu1 %1806  ;;  %v1809_v56 = vpop.permute.xlu0 %1808 }
 0xa30   : > { %2632 = vmatprep.subr.bf16.mxu0 %v1807_v55 }
 0xa31   : > { %2633 = vmatpush3.bf16.msra.mxu0 %v1807_v55 }
 0xa34   : > { %v1811_v57 = vpop.permute.xlu1 %1810 }
 0xa35   : > { %v1814_v58 = vsel %vm1812_vm12, %v1809_v56, %v1811_v57 }
 0xa36   : > { %2634 = vmatprep.subr.bf16.mxu0 %v1814_v58 }
 0xa37   : > { %2635 = vmatpush3.bf16.msra.mxu0 %v1814_v58 }
 0xa3a   : > { %2637 = vmatmul.mubr.msk.bf16.vlgmr.msra.gmra.mrb[16].mxu0 %vm1109_vm5, %v2905_v59 }
 0xa40   : > { %v1891_v60 = vpop.permute.xlu0 %1890 }
 0xa44   : > { %v1881_v61 = vpop.permute.xlu0 %1880 }
 0xa45   : > { %v1896_v62 = vpop.permute.xlu1 %1895 }
 0xa48   : > { %v1285_v63 = vpop.permute.xlu0 %1284 }
 0xa49   : > { %v1335_v1 = vadd.f32 %v4258_v42, %v1285_v63  ;;  %v1886_v2 = vpop.permute.xlu1 %1885 }
 0xa4b   : > { %v1682_v3 = vadd.f32 %v1675_v43, %v1335_v1 }
 0xa4c   : > { %v1690_v13 = vpop.permute.xlu0 %1689 }
 0xa4d   : > { %v1290_v5 = vpop.permute.xlu1 %1289  ;;  %v1697_v27 = vadd.f32 %v1690_v13, %v1682_v3 }
 0xa4e   : > { %v1338_v7 = vadd.f32 %v4260_v44, %v1290_v5 }
 0xa50   : > { %v1683_v8 = vadd.f32 %v1678_v49, %v1338_v7  ;;  %v1979_v39 = vpop.permute.xlu0 %1978 }
 0xa51   : > { %v1695_v15 = vpop.permute.xlu1 %1694 }
 0xa52   : > { %v1698_v33 = vadd.f32 %v1695_v15, %v1683_v8 }
 0xa54   : > { %v2044_v51 = vpop.permute.xlu0 %2043 }
 0xa55   : > { %v1984_v4 = vpop.permute.xlu1 %1983 }
 0xa58   : > { %v1994_v59 = vpop.permute.xlu0 %1993 }
 0xb0d   : > { %v2638_v9 = vpop.f32.mrb[16].mxu0 }
 0xb0e   : > { %v1900_v10 = vadd.f32 %v2638_v9, %v1891_v60  ;;  %v1858_v14 = vpop.f32.mrb[17].mxu0 }
 0xb0f   : > { %v2639_v16 = vpop.f32.mrb[18].mxu0  ;;  %v1898_v21 = vadd.f32 %v1881_v61, %v1858_v14 }
 0xb10   : > { %v2476_v17 = vmul.f32 -1.442695, %v1900_v10  ;;  %v1901_v18 = vadd.f32 %v2639_v16, %v1896_v62  ;;  %v1861_v19 = vpop.f32.mrb[19].mxu0 }
 0xb11   : > { %v1899_v25 = vadd.f32 %v1886_v2, %v1861_v19 }
 0xb12   : > { %2931 = vpow2.f32 %v2476_v17  ;;  %v2477_v20 = vmul.f32 -1.442695, %v1901_v18 }
 0xb14   : > { %2933 = vpow2.f32 %v2477_v20 }
 0xb15   : > { %2935 = vtanh.f32 %v1898_v21 }
 0xb1c   : > { %v2932_v24 = vpop.eup %2931 }
 0xb1d   : > { %v1910_v42 = vadd.f32 1.0, %v2932_v24 }
 0xb1e   : > { %v2934_v26 = vpop.eup %2933 }
 0xb1f   : > { %2937 = vrcp.f32 %v1910_v42  ;;  %v1911_v22 = vadd.f32 1.0, %v2934_v26  ;;  %v2936_v44 = vpop.eup %2935 }
 0xb20   : > { %2939 = vtanh.f32 %v1899_v25 }
 0xb21   : > { %2941 = vrcp.f32 %v1911_v22 }
 0xb29   : > { %v2938_v11 = vpop.eup %2937 }
 0xb2a   : > { %v2940_v23 = vpop.eup %2939  ;;  %v1916_v29 = vmul.f32 %v2938_v11, %v2936_v44 }
 0xb2b   : > { %v2942_v30 = vpop.eup %2941 }
 0xb2c   : > { %v1917_v12 = vmul.f32 %v2942_v30, %v2940_v23 }
 0xb2e   : > { %v1918_v31 = vpack.c.bf16 %v1917_v12, %v1916_v29 }
 0xb30   : > { %2641 = vmatpush3.bf16.msra.mxu1 %v1918_v31 }
 0xb31   : > { %2646 = vmatprep.subr.bf16.mxu1 %v3553_v0 }
 0xb33   : > { %2643 = vmatmul.mubr.msk.bf16.vlgmr.msra.gmra.mrb[16].mxu1 %vm1217_vm8, %v2906_v32 }
 0xb34   : > { %2648 = vmatprep.mubr.msk.bf16.mxu1 %vm3554_vm0, %v3553_v0 }
 0xc06   : > { %v1964_v28 = vpop.f32.mrb[16].mxu1 }
 0xc07   : > { %v1971_v34 = vadd.f32 %v1964_v28, %v1697_v27  ;;  %v2644_v35 = vpop.f32.mrb[17].mxu1 }
 0xc08   : > { %v1967_v36 = vpop.f32.mrb[18].mxu1 }
 0xc09   : > { %v1972_v37 = vadd.f32 %v1967_v36, %v1698_v33  ;;  %v2645_v38 = vpop.f32.mrb[19].mxu1  ;;  %v1986_v40 = vadd.f32 %v1979_v39, %v1971_v34 }
 0xc0b   : > { %v1987_v41 = vadd.f32 %v1984_v4, %v1972_v37 }
 0xc0d   : > { %v1988_v43 = vpack.c.bf16 %v1987_v41, %v1986_v40 }
 0xc0f   : > { %2647 = vmatpush3.bf16.msra.mxu1 %v1988_v43 }
 0xc10   : > { %2652 = vmatprep.subr.bf16.mxu1 %v3553_v0 }
 0xc12   : > { %2649 = vmatmul.mubr.msk.bf16.vlgmr.msra.gmra.mrb[20].mxu1 %vm1217_vm8, %v1989_v45 }
 0xc13   : > { %2653 = vmatpush3.bf16.msra.mxu1 %v1988_v43  ;;  %2654 = vmatprep.mubr.msk.bf16.mxu1 %vm3554_vm0, %v3553_v0 }
 0xc1a   : > { %2655 = vmatmul.mubr.msk.bf16.vlgmr.msra.gmra.mrb[24].mxu1 %vm1217_vm8, %v2039_v46 }
 0xce5   : > { %v2033_v47 = vpop.f32.mrb[20].mxu1 }
 0xce6   : > { %v2650_v48 = vpop.f32.mrb[21].mxu1  ;;  %v2034_v60 = vadd.f32 %v2033_v47, %v1994_v59 }
 0xce7   : > { %v2036_v49 = vpop.f32.mrb[22].mxu1 }
 0xce8   : > { %v2651_v50 = vpop.f32.mrb[23].mxu1 }
 0xced   : > { %v2083_v52 = vpop.f32.mrb[24].mxu1 }
 0xcee   : > { %v2084_v53 = vadd.f32 %v2083_v52, %v2044_v51  ;;  %v2656_v54 = vpop.f32.mrb[25].mxu1 }
 0xcef   : > { %v2086_v55 = vpop.f32.mrb[26].mxu1 }
 0xcf0   : > { %v2089_v56 = vmul.f32 1.442695, %v2084_v53  ;;  %v2094_v57 = vsel %vm814_vm1, %v2084_v53, 0.0  ;;  %v2657_v58 = vpop.f32.mrb[27].mxu1 }
 0xcf1   : > { %2095 = vadd.xlane.f32.xlu1 %v2094_v57 }
 0xcf2   : > { %2943 = vpow2.f32 %v2089_v56 }
 0xcfc   : > { %v2944_v0 = vpop.eup %2943 }
 0xcfd   : > { %v2091_v61 = vmul.f32 %v2944_v0, %v4181_v6 }
 0xcff   : > { %v2092_v62 = vadd.f32 %v2091_v61, %v2034_v60 }
 0xd01   : > { %2093 = vst [vmem:[%s800_s10] sm:$0x3f] %v2092_v62 }
 0xd02   : > { %3410 = shalt.err (!%p3407_p0)
}
 0xd03   : > { %s3411_s20 = scalar_lea.hbm %s4310_s30, 128  ;;  %s3415_s0 = scalar_lea.hbm %s4476_s16, 256 }
 0xd04   : > { %p3412_p10 = scmp.ne.s32.totalorder %s4310_s30, %s3411_s20  ;;  %p3416_p8 = scmp.lt.u32.totalorder %s4310_s30, %s4476_s16 }
 0xd05   : > { %p3417_p2 = scmp.lt.u32.totalorder %s3415_s0, %s3411_s20  ;;  %p3419_p5 = scmp.lt.u32.totalorder %s3411_s20, %s4310_s30 }
 0xd06   : > { %p3413_p11 = pnand %p3412_p10, %p4477_p7 }
 0xd07   : > { %p3418_p9 = por %p3417_p2, %p3416_p8 }
 0xd08   : > { %p3414_p12 = pneg %p3413_p11 }
 0xd09   : > { %p3420_p4 = por %p3419_p5, %p3418_p9 }
 0xd0b   : > { %p3421_p1 = pnand %p3420_p4, %p3414_p12 }
 0xd0d   : > { %3424 = shalt.err (!%p3421_p1)
}
 0xd0e   : > { %2732 = dma.vmem_to_hbm [thread:$0]  (%p4477_p7), %s2126_s17, 128, %s4310_s30, %s2108_s7   ;;  %vm2105_vm13 = vcmask 0  }
 0xd0f   : > { %s2484_s4 = sshll.u32 %s4459_s9, 4  ;;  %s806_s3 = scalar_lea.vmem [#allocation30], %s4118_s5 }
 0xd10   : > { %s2138_s29 = sshll.u32 %s806_s3, 4  ;;  %s4478_s8 = sld [smem:[#allocation60_spill]]  ;;  %s4337_s29 = int_to_ptr.vmem [resolvable:$true] %s2138_s29 }
 0xd11   : > { %s2113_s30 = scalar_lea.sflag [#allocation31], %s4118_s5  ;;  %s3425_s7 = scalar_lea.vmem %s4337_s29, 16 }
 0xd12   : > { %p3426_p6 = scmp.ne.s32.totalorder %s4337_s29, %s3425_s7  ;;  %s3564_s9 = smov [#allocation30]  }
 0xd13   : > { %s3429_s28 = sshll.u32 %s3564_s9, 4  ;;  %s3430_s28 = int_to_ptr.vmem [resolvable:$false] %s3429_s28 }
 0xd14   : > { %p3427_p3 = pnand %p3426_p6, %p4477_p7  ;;  %s3431_s2 = scalar_lea.vmem %s3430_s28, 32 }
 0xd15   : > { %p3432_p0 = scmp.lt.s32.totalorder %s4337_s29, %s3430_s28  ;;  %p3433_p10 = scmp.lt.s32.totalorder %s3431_s2, %s3425_s7 }
 0xd16   : > { %s4335_s20 = scalar_lea.hbm %s4478_s8, %s2484_s4  ;;  %p3428_p13 = pneg %p3427_p3 }
 0xd17   : > { %p3434_p11 = por %p3433_p10, %p3432_p0 }
 0xd19   : > { %p3435_p12 = pnand %p3434_p11, %p3428_p13 }
 0xd7e   : > { %v2096_v6 = vpop.xlane.xlu1 %2095 }
 0xd7f   : > { %v2097_v63 = vrot.slane %v2096_v6, 4 }
 0xd81   : > { %v2098_v1 = vadd.f32 %v2097_v63, %v2096_v6 }
 0xd83   : > { %v2099_v2 = vrot.slane %v2098_v1, 2 }
 0xd85   : > { %v2100_v3 = vadd.f32 %v2099_v2, %v2098_v1 }
 0xd87   : > { %v2101_v5 = vrot.slane %v2100_v3, 1 }
 0xd89   : > { %v2102_v7 = vadd.f32 %v2101_v5, %v2100_v3 }
 0xd8b   : > { %2670 = vpush %v2102_v7 }
 0xdbc   : > { %s2671_s17 = spop %2670 }
 0xdbd   : > { %v2104_v8 = vstv %s2671_s17 }
 0xdbe   : > { %2106 = vst.msk [vmem:[%s806_s3] sm:$0x1] %vm2105_vm13, %v2104_v8 }
 0xdbf   : > { %3438 = shalt.err (!%p3435_p12)
}
 0xdc0   : > { %s3439_s5 = scalar_lea.hbm %s4335_s20, 16  ;;  %s3443_s6 = scalar_lea.hbm %s4478_s8, 32 }
 0xdc1   : > { %p3440_p8 = scmp.ne.s32.totalorder %s4335_s20, %s3439_s5  ;;  %p3444_p5 = scmp.lt.u32.totalorder %s4335_s20, %s4478_s8 }
 0xdc2   : > { %p3445_p4 = scmp.lt.u32.totalorder %s3443_s6, %s3439_s5  ;;  %p3447_p6 = scmp.lt.u32.totalorder %s3439_s5, %s4335_s20 }
 0xdc3   : > { %p3441_p2 = pnand %p3440_p8, %p4477_p7 }
 0xdc4   : > { %p3446_p1 = por %p3445_p4, %p3444_p5 }
 0xdc5   : > { %p3442_p9 = pneg %p3441_p2 }
 0xdc6   : > { %p3448_p3 = por %p3447_p6, %p3446_p1 }
 0xdc8   : > { %p3449_p13 = pnand %p3448_p3, %p3442_p9 }
 0xdca   : > { %3452 = shalt.err (!%p3449_p13)
}
 0xdcb   : > { %2733 = dma.vmem_to_hbm [thread:$0]  (%p4477_p7), %s4337_s29, 16, %s4335_s20, %s2113_s30  }
 0xdcc PF: > { %s4479_s21 = sld [smem:[#allocation44_spill]]  ;;  %p4480_p0 = scmp.ne.s32.totalorder %s4451_s19, 0 }
 0xdcd   : > { %p4481_p10 = scmp.ge.s32.totalorder %s3531_s27, 2 }
 0xdcf   : > { %p2787_p11 = pnand %p4481_p10, %p4480_p0 }
 0xdd2   : > { %s2150_s22 = sand.u32 1, %s4479_s21  }
 0xdd3   : > { %s2151_s17 = scalar_lea.sflag [#allocation5], %s2150_s22 }
 0xdd4   : > { %3510 = dma.done.wait (!%p2787_p11), %s2151_s17, 128  }
 0xdd5   : > { %3512 = vsyncadd (!%p2787_p11), %s2151_s17, 4294967168  ;;  %s2160_s7 = scalar_lea.sflag [#allocation31], %s2150_s22 }
 0xdd6   : > { %3514 = dma.done.wait (!%p2787_p11), %s2160_s7, 16  }
 0xdd7   : > { %3516 = vsyncadd (!%p2787_p11), %s2160_s7, 4294967280  ;;  %s4482_s24 = sld [smem:[#allocation45_spill]]  ;;  %s4483_s9 = smov %s4006_s25 }
 0xdd8   : > { %p44_p7 = scmp.ge.s32.totalorder %s3995_s1, 4   ;;  %s4484_s25 = smov %s3527_s26 }
 0xdd9   : > { %s4485_s26 = smov %s4483_s9  ;;  %s4486_s27 = smov %s3995_s1 }
 0xdda   :  { %46 = sbr.rel (!%p44_p7) target bundleno = 30 (0x1e), region = 227 }
 0xde1   :  { %2164 = vsyncpa [#allocation4], 1 }
 0xde2   :  { %2166 = vsyncpa [#allocation4 + $0x1], 1 }
 0xde3   :  { %2167 = vsyncpa [#allocation7], 1 }
 0xde4   :  { %2169 = vsyncpa [#allocation7 + $0x1], 1 }
 0xde5   :  { %2170 = vsyncpa [#allocation10], 1 }
 0xde6   :  { %2171 = vsyncpa [#allocation13], 1 }
 0xde7   :  { %2172 = vsyncpa [#allocation16], 1 }
 0xde8   :  { %2173 = vsyncpa [#allocation19], 1 }
 0xde9   :  { %2174 = vsyncpa [#allocation22], 1 }
 0xdea   :  { %2175 = vsyncpa [#allocation25], 1 }
 0xdeb   :  { %2176 = vsyncpa [#allocation28], 1 }
 0xdec   :  { %2177 = vsyncpa [#allocation5], 1 }
 0xded   :  { %2179 = vsyncpa [#allocation5 + $0x1], 1 }
 0xdee   :  { %2180 = vsyncpa [#allocation31], 1 }
 0xdef   :  { %2182 = vsyncpa [#allocation31 + $0x1], 1 }

</bundles_post_ra>
